<compile_context>
chip_gen: v7x
topology: tpu7x:2x2x1
jax: 0.10.0
libtpu: 0.0.40
codegen_flags: <defaults>
</compile_context>

<pallas_src>
import functools

import jax
import jax.numpy as jnp
from jax import lax
from jax.experimental import pallas as pl
from jax.experimental.pallas import tpu as pltpu

KSIZE = 5
PAD = 2
BN_EPS = 1e-5
LANE = 128  # lane width; channel padding to this is applied only when Cout>=64


def _round_up(v, m):
    return (v + m - 1) // m * m


def _vmem_limit_bytes(needed):
    """Scoped-VMEM limit from the real footprint, clamped to ~85% of VMEM."""
    cap = 64 * 1024 * 1024
    try:
        info = pltpu.get_tpu_info()
        cap = int(getattr(info, "vmem_capacity_bytes", cap))
    except Exception:
        pass
    return int(min(max(2 * needed, 32 * 1024 * 1024), int(cap * 0.85)))


# ---------------------------------------------------------------------------
# Pallas kernels
# ---------------------------------------------------------------------------
def _conv_im2col_kernel(x_ref, scale_ref, shift_ref, w_ref, b_ref, *rest,
                        ksize, spad, prologue, add_bias, emit_stats):
    """Stride-1 ksize x ksize conv via kh-partial im2col, one image per step.

    x_ref     : (1, H, W, Ce)   f32  un-padded input tile
    scale_ref : (1, 1, Ce)      f32  fused BN scale of the previous layer
    shift_ref : (1, 1, Ce)      f32  fused BN shift of the previous layer
    w_ref     : (ksize, Kpad, Co) bf16  per-kernel-row packed weights
                                  (rows kw*Ce..(kw+1)*Ce, zero K-padding)
    b_ref     : (1, Co)         f32  bias
    rest (outputs then scratch):
      o_ref   : (1, Ho, Wo, Co) f32  conv output
      sum_ref : (1, 1, Co)      f32  per-image channel sum        [if stats]
      ssq_ref : (1, 1, Co)      f32  per-image channel sum-of-sq  [if stats]
      xp_ref  : VMEM (H+2p, W+2p, Ce) f32   zero-padded post-prologue input
      patch_ref: VMEM (2, Ho*Wo, Kpad) bf16 double-buffered kh-row patch
      acc_ref : VMEM (Ho*Wo, Co) f32  matmul accumulator
    """
    if emit_stats:
        o_ref, sum_ref, ssq_ref, xp_ref, patch_ref, acc_ref = rest
    else:
        o_ref, xp_ref, patch_ref, acc_ref = rest
        sum_ref = ssq_ref = None

    h, w, ce = x_ref.shape[1], x_ref.shape[2], x_ref.shape[3]
    ho, wo, co = o_ref.shape[1], o_ref.shape[2], o_ref.shape[3]

    # One-time scratch init: the zero border of xp and the zero K-padding
    # columns of the patch persist across grid steps (scratch is persistent);
    # the live interior / live columns are fully overwritten every step.
    @pl.when(pl.program_id(0) == 0)
    def _():
        xp_ref[...] = jnp.zeros_like(xp_ref)
        patch_ref[...] = jnp.zeros_like(patch_ref)

    x = x_ref[0]                                               # (H, W, Ce) f32
    if prologue:
        # Previous layer's BatchNorm affine + ReLU, fused into this conv
        # (f32 math; zero padding happens AFTER this, matching PyTorch).
        x = jnp.maximum(x * scale_ref[...] + shift_ref[...], 0.0)
    xp_ref[spad:spad + h, spad:spad + w, :] = x

    # kh-partial im2col: per kernel row, pack only the kw taps (K = ksize*Ce,
    # zero-padded to a lane multiple), cast to bf16 and run one accumulating
    # MXU matmul per row.  Double-buffering over kh removes the WAR hazard so
    # packing of row kh+1 can overlap the matmul of row kh.
    for kh in range(ksize):
        slot = kh & 1
        for kw in range(ksize):
            tap = xp_ref[kh:kh + ho, kw:kw + wo, :].reshape(ho * wo, ce)
            patch_ref[slot, :, kw * ce:(kw + 1) * ce] = (
                tap.astype(patch_ref.dtype))
        part = jnp.dot(patch_ref[slot], w_ref[kh],
                       preferred_element_type=jnp.float32)     # (Ho*Wo, Co)
        if kh == 0:
            acc_ref[...] = part
        else:
            acc_ref[...] += part

    acc = acc_ref[...]
    if add_bias:
        acc = acc + b_ref[...]
    o_ref[...] = acc.reshape(1, ho, wo, co).astype(o_ref.dtype)

    if emit_stats:
        # Single-pass BatchNorm statistics (f32, summed over this image).
        sum_ref[...] = jnp.sum(acc, axis=0, keepdims=True).reshape(1, 1, co)
        ssq_ref[...] = jnp.sum(acc * acc, axis=0,
                               keepdims=True).reshape(1, 1, co)


def _affine_relu_kernel(x_ref, scale_ref, shift_ref, o_ref):
    """Final BatchNorm affine + ReLU (memory-bound elementwise pass)."""
    y = x_ref[...] * scale_ref[...] + shift_ref[...]
    o_ref[...] = jnp.maximum(y, 0.0).astype(o_ref.dtype)


# ---------------------------------------------------------------------------
# pallas_call wrappers
# ---------------------------------------------------------------------------
def _conv_layer(x, w_packed, bias, scale, shift, *,
                ksize, spad, prologue, add_bias, emit_stats):
    """Runs the conv kernel over the batch. Returns (y, sums, sumsqs)."""
    n, h, w, ce = x.shape
    _, kpad, cout = w_packed.shape
    ho = h + 2 * spad - ksize + 1
    wo = w + 2 * spad - ksize + 1
    hp, wp = h + 2 * spad, w + 2 * spad
    m = ho * wo

    kernel = functools.partial(
        _conv_im2col_kernel, ksize=ksize, spad=spad, prologue=prologue,
        add_bias=add_bias, emit_stats=emit_stats)

    conv_shape = jax.ShapeDtypeStruct((n, ho, wo, cout), jnp.float32)
    conv_spec = pl.BlockSpec((1, ho, wo, cout), lambda i: (i, 0, 0, 0))
    if emit_stats:
        out_shape = (conv_shape,
                     jax.ShapeDtypeStruct((n, 1, cout), jnp.float32),
                     jax.ShapeDtypeStruct((n, 1, cout), jnp.float32))
        out_specs = (conv_spec,
                     pl.BlockSpec((1, 1, cout), lambda i: (i, 0, 0)),
                     pl.BlockSpec((1, 1, cout), lambda i: (i, 0, 0)))
    else:
        out_shape = conv_shape
        out_specs = conv_spec

    scratch = [
        pltpu.VMEM((hp, wp, ce), jnp.float32),      # padded prologue'd input
        pltpu.VMEM((2, m, kpad), jnp.bfloat16),     # double-buffered patch
        pltpu.VMEM((m, cout), jnp.float32),         # f32 matmul accumulator
    ]
    needed = (2 * h * w * ce * 4                    # double-buffered x blocks
              + 2 * ksize * kpad * cout * 2         # weights (bf16)
              + 2 * m * cout * 4                    # output blocks
              + hp * wp * ce * 4                    # xp scratch
              + 2 * m * kpad * 2                    # patch scratch (bf16)
              + m * cout * 4)                       # acc scratch

    result = pl.pallas_call(
        kernel,
        out_shape=out_shape,
        grid=(n,),
        in_specs=[
            pl.BlockSpec((1, h, w, ce), lambda i: (i, 0, 0, 0)),
            pl.BlockSpec((1, 1, ce), lambda i: (0, 0, 0)),
            pl.BlockSpec((1, 1, ce), lambda i: (0, 0, 0)),
            pl.BlockSpec((ksize, kpad, cout), lambda i: (0, 0, 0)),
            pl.BlockSpec((1, cout), lambda i: (0, 0)),
        ],
        out_specs=out_specs,
        scratch_shapes=scratch,
        compiler_params=pltpu.CompilerParams(
            dimension_semantics=("parallel",),
            vmem_limit_bytes=_vmem_limit_bytes(needed)),
    )(x, scale, shift, w_packed, bias)

    if emit_stats:
        return result
    return result, None, None


def _affine_relu(x, scale, shift):
    n, h, w, c = x.shape
    # Bounded (~2 MiB output) row tiles: purely memory-bound, fits v7x VMEM,
    # and the extra parallel grid axis feeds a second TensorCore.
    th = max(1, min(h, (2 * 1024 * 1024) // max(1, w * c * 4)))
    needed = 4 * th * w * c * 4
    return pl.pallas_call(
        _affine_relu_kernel,
        out_shape=jax.ShapeDtypeStruct((n, h, w, c), jnp.float32),
        grid=(n, pl.cdiv(h, th)),
        in_specs=[
            pl.BlockSpec((1, th, w, c), lambda i, j: (i, j, 0, 0)),
            pl.BlockSpec((1, 1, 1, c), lambda i, j: (0, 0, 0, 0)),
            pl.BlockSpec((1, 1, 1, c), lambda i, j: (0, 0, 0, 0)),
        ],
        out_specs=pl.BlockSpec((1, th, w, c), lambda i, j: (i, j, 0, 0)),
        compiler_params=pltpu.CompilerParams(
            dimension_semantics=("parallel", "parallel"),
            vmem_limit_bytes=_vmem_limit_bytes(needed)),
    )(x, scale.reshape(1, 1, 1, c), shift.reshape(1, 1, 1, c))


# ---------------------------------------------------------------------------
# Glue: space-to-depth, weight packing, BN scale/shift from fused stats
# ---------------------------------------------------------------------------
def _space_to_depth(x):
    """(N, H, W, C) -> (N, H//2, W//2, 4*C); block-channel order is (p, q, c)."""
    n, h, w, c = x.shape
    if h % 2 or w % 2:
        # TODO(synk): dense stride-2 fallback for odd spatial dims.
        raise NotImplementedError("space-to-depth path requires even H, W")
    x = x.reshape(n, h // 2, 2, w // 2, 2, c)
    x = x.transpose(0, 1, 3, 2, 4, 5)
    return x.reshape(n, h // 2, w // 2, 4 * c)


def _pack_weights_s2d(w, kpad):
    """(5,5,Cin,Cout) -> bf16 (3, Kpad, Cout): exact 5x5/stride-2 conv as a
    3x3/stride-1 conv over the space-to-depth input; per-kernel-row rows are
    ordered (bw, p, q, c), odd taps zero-masked, K zero-padded to `kpad`."""
    k, _, cin, cout = w.shape
    kb = (k + 1) // 2                                          # 3
    w6 = jnp.pad(w, ((0, 2 * kb - k), (0, 2 * kb - k), (0, 0), (0, 0)))
    w6 = w6.reshape(kb, 2, kb, 2, cin, cout).transpose(0, 2, 1, 3, 4, 5)
    wk = w6.reshape(kb, kb * 4 * cin, cout)
    wk = jnp.pad(wk, ((0, 0), (0, kpad - kb * 4 * cin), (0, 0)))
    return wk.astype(jnp.bfloat16)


def _pack_weights_dense(w, kpad):
    """(K,K,Cin,Cout) -> bf16 (K, Kpad, Cout), per-row order (kw, c)."""
    k, _, cin, cout = w.shape
    wk = w.reshape(k, k * cin, cout)
    wk = jnp.pad(wk, ((0, 0), (0, kpad - k * cin), (0, 0)))
    return wk.astype(jnp.bfloat16)


def _bn_scale_shift(sums, ssqs, count, gamma, beta, eps=BN_EPS):
    """PyTorch training-mode BN (biased variance) from single-pass sums."""
    s = jnp.sum(sums, axis=(0, 1))
    sq = jnp.sum(ssqs, axis=(0, 1))
    mean = s / count
    var = jnp.maximum(sq / count - mean * mean, 0.0)
    scale = gamma / jnp.sqrt(var + eps)
    shift = beta - mean * scale
    return scale, shift


# ---------------------------------------------------------------------------
# DoubleConv parameters + forward
# ---------------------------------------------------------------------------
def init_double_conv_params(key, in_channels, out_channels):
    keys = jax.random.split(key, 6)

    def conv_init(kw, kb, cin, cout):
        fan_in = cin * KSIZE * KSIZE
        bound = 1.0 / (fan_in ** 0.5)
        w = jax.random.uniform(kw, (KSIZE, KSIZE, cin, cout), jnp.float32,
                               -bound, bound)
        b = jax.random.uniform(kb, (cout,), jnp.float32, -bound, bound)
        return w, b

    w1, b1 = conv_init(keys[0], keys[1], in_channels, out_channels)
    w2, b2 = conv_init(keys[2], keys[3], out_channels, out_channels)
    w3, b3 = conv_init(keys[4], keys[5], out_channels, out_channels)
    ones = jnp.ones((out_channels,), jnp.float32)
    zeros = jnp.zeros((out_channels,), jnp.float32)
    return dict(w1=w1, b1=b1, w2=w2, b2=b2, w3=w3, b3=b3,
                g1=ones, be1=zeros, g2=ones, be2=zeros, g3=ones, be3=zeros)


@functools.partial(jax.jit, static_argnames=("last",))
def double_conv_forward(params, x_nchw, last=False):
    w1, w2, w3 = params["w1"], params["w2"], params["w3"]
    cout = w1.shape[3]
    # Lane-dense 128-padding of the internal channel axis only pays when Cout
    # is already wide; for small Cout it inflates inter-layer HBM traffic.
    cout_p = _round_up(cout, LANE) if cout >= 64 else cout
    pad_c = cout_p - cout

    def padc(v):
        return jnp.pad(v, (0, pad_c))

    g1, be1 = padc(params["g1"]), padc(params["be1"])
    g2, be2 = padc(params["g2"]), padc(params["be2"])
    g3, be3 = padc(params["g3"]), padc(params["be3"])
    b3 = padc(params["b3"]).reshape(1, cout_p)
    zero_bias = jnp.zeros((1, cout_p), jnp.float32)

    # Zero weight columns keep any padded channels exactly zero end-to-end.
    w1p = jnp.pad(w1, ((0, 0), (0, 0), (0, 0), (0, pad_c)))
    w2p = jnp.pad(w2, ((0, 0), (0, 0), (0, 0), (0, pad_c)))
    w3p = jnp.pad(w3, ((0, 0), (0, 0), (0, pad_c), (0, pad_c)))

    x = jnp.transpose(x_nchw, (0, 2, 3, 1)).astype(jnp.float32)   # NCHW->NHWC
    n = x.shape[0]

    # --- conv1: 5x5/stride-2 == exact 3x3/stride-1 over the space-to-depth
    #     input.  Conv bias dropped (exactly cancelled by the following BN).
    # TODO(synk): fold space-to-depth into the kernel patch build (stride-2
    #             reads of xp) to eliminate this extra HBM pass.
    x1 = _space_to_depth(x)                                       # (n,H/2,W/2,4Cin)
    kpad1 = _round_up(3 * x1.shape[-1], LANE)
    dummy1 = jnp.zeros((1, 1, x1.shape[-1]), jnp.float32)
    y1, s1, q1 = _conv_layer(x1, _pack_weights_s2d(w1p, kpad1), zero_bias,
                             dummy1, dummy1, ksize=3, spad=1,
                             prologue=False, add_bias=False, emit_stats=True)
    scale1, shift1 = _bn_scale_shift(s1, q1, n * y1.shape[1] * y1.shape[2],
                                     g1, be1)

    # --- conv2: stride-2 via s2d; BN1 + ReLU fused as in-kernel prologue.
    x2 = _space_to_depth(y1[..., :cout])                          # (n,H/4,W/4,4Cout)
    kpad2 = _round_up(3 * x2.shape[-1], LANE)
    sc1 = jnp.tile(scale1[:cout], 4).reshape(1, 1, 4 * cout)
    sh1 = jnp.tile(shift1[:cout], 4).reshape(1, 1, 4 * cout)
    y2, s2, q2 = _conv_layer(x2, _pack_weights_s2d(w2p, kpad2), zero_bias,
                             sc1, sh1, ksize=3, spad=1,
                             prologue=True, add_bias=False, emit_stats=True)
    scale2, shift2 = _bn_scale_shift(s2, q2, n * y2.shape[1] * y2.shape[2],
                                     g2, be2)

    # --- conv3: 5x5/stride-1; BN2 + ReLU fused as prologue; bias kept.
    #     BN stats only emitted when actually needed (not `last`).
    kpad3 = _round_up(KSIZE * cout_p, LANE)
    y3, s3, q3 = _conv_layer(y2, _pack_weights_dense(w3p, kpad3), b3,
                             scale2.reshape(1, 1, cout_p),
                             shift2.reshape(1, 1, cout_p),
                             ksize=KSIZE, spad=PAD,
                             prologue=True, add_bias=True,
                             emit_stats=not last)

    out = y3
    if not last:
        scale3, shift3 = _bn_scale_shift(s3, q3, n * y3.shape[1] * y3.shape[2],
                                         g3, be3)
        out = _affine_relu(y3, scale3, shift3)

    out = out[..., :cout]
    return jnp.transpose(out, (0, 3, 1, 2))                       # NHWC->NCHW


# ---------------------------------------------------------------------------
# Pure-JAX reference (correctness check)
# ---------------------------------------------------------------------------
def _ref_conv(x, w, b, stride):
    y = lax.conv_general_dilated(
        x, w, (stride, stride), ((PAD, PAD), (PAD, PAD)),
        dimension_numbers=("NHWC", "HWIO", "NHWC"))
    return y + b


def _ref_bn_relu(x, g, be, eps=BN_EPS):
    mean = jnp.mean(x, axis=(0, 1, 2))
    var = jnp.mean(jnp.square(x - mean), axis=(0, 1, 2))
    return jnp.maximum((x - mean) / jnp.sqrt(var + eps) * g + be, 0.0)


def reference_forward(params, x_nchw, last=False):
    x = jnp.transpose(x_nchw, (0, 2, 3, 1))
    x = _ref_conv(x, params["w1"], params["b1"], 2)
    x = _ref_bn_relu(x, params["g1"], params["be1"])
    x = _ref_conv(x, params["w2"], params["b2"], 2)
    x = _ref_bn_relu(x, params["g2"], params["be2"])
    x = _ref_conv(x, params["w3"], params["b3"], 1)
    if not last:
        x = _ref_bn_relu(x, params["g3"], params["be3"])
    return jnp.transpose(x, (0, 3, 1, 2))


if __name__ == "__main__":
    key = jax.random.PRNGKey(0)
    kx, kp = jax.random.split(key)

    in_channels, out_channels = 4, 8
    x = jax.random.normal(kx, (2, in_channels, 16, 16), jnp.float32)  # NCHW
    params = init_double_conv_params(kp, in_channels, out_channels)

    # Not-last path (conv -> BN -> ReLU at the end).
    y = jax.block_until_ready(double_conv_forward(params, x, last=False))
    assert y.shape == (2, out_channels, 4, 4), y.shape
    y_ref = reference_forward(params, x, last=False)
    err = float(jnp.max(jnp.abs(y - y_ref)))
    # bf16 MXU operands with f32 accumulation -> tolerance relaxed vs f32 ref.
    assert jnp.allclose(y, y_ref, atol=5e-2, rtol=5e-2), err

    # Last path (raw conv3 output with bias, no final BN/ReLU).
    yl = jax.block_until_ready(double_conv_forward(params, x, last=True))
    yl_ref = reference_forward(params, x, last=True)
    errl = float(jnp.max(jnp.abs(yl - yl_ref)))
    assert jnp.allclose(yl, yl_ref, atol=5e-2, rtol=5e-2), errl

    print("KERNEL_OK")
</pallas_src>

<mosaic_0001>
module attributes {stable_mosaic.version = 11 : i64} {
  func.func @_conv_im2col_kernel(%arg0: i32, %arg1: memref<1x8x8x16xf32, #tpu.memory_space<vmem>>, %arg2: memref<1x1x16xf32, #tpu.memory_space<vmem>>, %arg3: memref<1x1x16xf32, #tpu.memory_space<vmem>>, %arg4: memref<3x128x8xbf16, #tpu.memory_space<vmem>>, %arg5: memref<1x8xf32, #tpu.memory_space<vmem>>, %arg6: memref<1x8x8x8xf32, #tpu.memory_space<vmem>>, %arg7: memref<1x1x8xf32, #tpu.memory_space<vmem>>, %arg8: memref<1x1x8xf32, #tpu.memory_space<vmem>>, %arg9: memref<10x10x16xf32, #tpu.memory_space<vmem>>, %arg10: memref<2x64x128xbf16, #tpu.memory_space<vmem>>, %arg11: memref<64x8xf32, #tpu.memory_space<vmem>>) attributes {dimension_semantics = [#tpu.dimension_semantics<parallel>], iteration_bounds = array<i64: 2>, scalar_prefetch = 0 : i64, scratch_operands = 3 : i64, tpu.core_type = #tpu.core_type<tc>, window_params = [{transform_indices = @transform_0, window_bounds = array<i64: 1, 8, 8, 16>}, {pipeline_mode = #tpu.pipeline_mode<synchronous>, transform_indices = @transform_1, window_bounds = array<i64: 1, 1, 16>}, {pipeline_mode = #tpu.pipeline_mode<synchronous>, transform_indices = @transform_2, window_bounds = array<i64: 1, 1, 16>}, {pipeline_mode = #tpu.pipeline_mode<synchronous>, transform_indices = @transform_3, window_bounds = array<i64: 3, 128, 8>}, {pipeline_mode = #tpu.pipeline_mode<synchronous>, transform_indices = @transform_4, window_bounds = array<i64: 1, 8>}, {transform_indices = @transform_5, window_bounds = array<i64: 1, 8, 8, 8>}, {transform_indices = @transform_6, window_bounds = array<i64: 1, 1, 8>}, {transform_indices = @transform_7, window_bounds = array<i64: 1, 1, 8>}]} {
    %c0_i32 = arith.constant 0 : i32
    %0 = arith.cmpi eq, %arg0, %c0_i32 : i32
    %1 = arith.extui %0 : i1 to i32
    %c0_i32_0 = arith.constant 0 : i32
    %2 = arith.cmpi ne, %1, %c0_i32_0 : i32
    scf.if %2 {
      %cst_101 = arith.constant 0.000000e+00 : f32
      %94 = vector.broadcast %cst_101 : f32 to vector<10x10x16xf32>
      %c0_102 = arith.constant 0 : index
      %c0_103 = arith.constant 0 : index
      %c0_104 = arith.constant 0 : index
      %95 = vector.load %arg9[%c0_102, %c0_103, %c0_104] : memref<10x10x16xf32, #tpu.memory_space<vmem>>, vector<10x10x16xf32>
      tpu.vector_store %arg9[%c0_102, %c0_103, %c0_104], %94 {strides = array<i32>} : memref<10x10x16xf32, #tpu.memory_space<vmem>>, vector<10x10x16xf32>,
      %cst_105 = arith.constant 0.000000e+00 : bf16
      %96 = vector.broadcast %cst_105 : bf16 to vector<2x64x128xbf16>
      %c0_106 = arith.constant 0 : index
      %c0_107 = arith.constant 0 : index
      %c0_108 = arith.constant 0 : index
      %97 = vector.load %arg10[%c0_106, %c0_107, %c0_108] : memref<2x64x128xbf16, #tpu.memory_space<vmem>>, vector<2x64x128xbf16>
      tpu.vector_store %arg10[%c0_106, %c0_107, %c0_108], %96 {strides = array<i32>} : memref<2x64x128xbf16, #tpu.memory_space<vmem>>, vector<2x64x128xbf16>,
    } else {
    }
    %c0 = arith.constant 0 : index
    %c0_1 = arith.constant 0 : index
    %c0_2 = arith.constant 0 : index
    %c0_3 = arith.constant 0 : index
    %3 = vector.load %arg1[%c0, %c0_1, %c0_2, %c0_3] : memref<1x8x8x16xf32, #tpu.memory_space<vmem>>, vector<1x8x8x16xf32>
    %4 = vector.shape_cast %3 : vector<1x8x8x16xf32> to vector<8x8x16xf32>
    %c1 = arith.constant 1 : index
    %c1_4 = arith.constant 1 : index
    %c0_5 = arith.constant 0 : index
    %5 = vector.load %arg9[%c1, %c1_4, %c0_5] : memref<10x10x16xf32, #tpu.memory_space<vmem>>, vector<8x8x16xf32>
    tpu.vector_store %arg9[%c1, %c1_4, %c0_5], %4 {strides = array<i32>} : memref<10x10x16xf32, #tpu.memory_space<vmem>>, vector<8x8x16xf32>,
    %c0_6 = arith.constant 0 : index
    %c0_7 = arith.constant 0 : index
    %c0_8 = arith.constant 0 : index
    %6 = vector.load %arg9[%c0_6, %c0_7, %c0_8] : memref<10x10x16xf32, #tpu.memory_space<vmem>>, vector<8x8x16xf32>
    %7 = vector.shape_cast %6 : vector<8x8x16xf32> to vector<64x16xf32>
    %8 = arith.truncf %7 : vector<64x16xf32> to vector<64x16xbf16>
    %c0_9 = arith.constant 0 : index
    %c0_10 = arith.constant 0 : index
    %c0_11 = arith.constant 0 : index
    %9 = vector.load %arg10[%c0_9, %c0_10, %c0_11] : memref<2x64x128xbf16, #tpu.memory_space<vmem>>, vector<1x64x16xbf16>
    %10 = vector.shape_cast %9 : vector<1x64x16xbf16> to vector<64x16xbf16>
    %11 = vector.shape_cast %8 : vector<64x16xbf16> to vector<1x64x16xbf16>
    tpu.vector_store %arg10[%c0_9, %c0_10, %c0_11], %11 {strides = array<i32>} : memref<2x64x128xbf16, #tpu.memory_space<vmem>>, vector<1x64x16xbf16>,
    %c0_12 = arith.constant 0 : index
    %c1_13 = arith.constant 1 : index
    %c0_14 = arith.constant 0 : index
    %12 = vector.load %arg9[%c0_12, %c1_13, %c0_14] : memref<10x10x16xf32, #tpu.memory_space<vmem>>, vector<8x8x16xf32>
    %13 = vector.shape_cast %12 : vector<8x8x16xf32> to vector<64x16xf32>
    %14 = arith.truncf %13 : vector<64x16xf32> to vector<64x16xbf16>
    %c0_15 = arith.constant 0 : index
    %c0_16 = arith.constant 0 : index
    %c16 = arith.constant 16 : index
    %15 = vector.load %arg10[%c0_15, %c0_16, %c16] : memref<2x64x128xbf16, #tpu.memory_space<vmem>>, vector<1x64x16xbf16>
    %16 = vector.shape_cast %15 : vector<1x64x16xbf16> to vector<64x16xbf16>
    %17 = vector.shape_cast %14 : vector<64x16xbf16> to vector<1x64x16xbf16>
    tpu.vector_store %arg10[%c0_15, %c0_16, %c16], %17 {strides = array<i32>} : memref<2x64x128xbf16, #tpu.memory_space<vmem>>, vector<1x64x16xbf16>,
    %c0_17 = arith.constant 0 : index
    %c2 = arith.constant 2 : index
    %c0_18 = arith.constant 0 : index
    %18 = vector.load %arg9[%c0_17, %c2, %c0_18] : memref<10x10x16xf32, #tpu.memory_space<vmem>>, vector<8x8x16xf32>
    %19 = vector.shape_cast %18 : vector<8x8x16xf32> to vector<64x16xf32>
    %20 = arith.truncf %19 : vector<64x16xf32> to vector<64x16xbf16>
    %c0_19 = arith.constant 0 : index
    %c0_20 = arith.constant 0 : index
    %c32 = arith.constant 32 : index
    %21 = vector.load %arg10[%c0_19, %c0_20, %c32] : memref<2x64x128xbf16, #tpu.memory_space<vmem>>, vector<1x64x16xbf16>
    %22 = vector.shape_cast %21 : vector<1x64x16xbf16> to vector<64x16xbf16>
    %23 = vector.shape_cast %20 : vector<64x16xbf16> to vector<1x64x16xbf16>
    tpu.vector_store %arg10[%c0_19, %c0_20, %c32], %23 {strides = array<i32>} : memref<2x64x128xbf16, #tpu.memory_space<vmem>>, vector<1x64x16xbf16>,
    %c0_21 = arith.constant 0 : index
    %c0_22 = arith.constant 0 : index
    %c0_23 = arith.constant 0 : index
    %24 = vector.load %arg10[%c0_21, %c0_22, %c0_23] : memref<2x64x128xbf16, #tpu.memory_space<vmem>>, vector<1x64x128xbf16>
    %25 = vector.shape_cast %24 : vector<1x64x128xbf16> to vector<64x128xbf16>
    %c0_24 = arith.constant 0 : index
    %c0_25 = arith.constant 0 : index
    %c0_26 = arith.constant 0 : index
    %26 = vector.load %arg4[%c0_24, %c0_25, %c0_26] : memref<3x128x8xbf16, #tpu.memory_space<vmem>>, vector<1x128x8xbf16>
    %27 = vector.shape_cast %26 : vector<1x128x8xbf16> to vector<128x8xbf16>
    %cst = arith.constant dense<0.000000e+00> : vector<64x8xf32>
    %28 = tpu.matmul %25, %27, %cst {dimension_numbers = #tpu.dot_dimension_numbers<[1], [0], [0], [1], [0, 0, 1, 1], [], []>} : vector<64x128xbf16>, vector<128x8xbf16>, vector<64x8xf32> -> vector<64x8xf32>
    %c0_27 = arith.constant 0 : index
    %c0_28 = arith.constant 0 : index
    %29 = vector.load %arg11[%c0_27, %c0_28] : memref<64x8xf32, #tpu.memory_space<vmem>>, vector<64x8xf32>
    tpu.vector_store %arg11[%c0_27, %c0_28], %28 {strides = array<i32>} : memref<64x8xf32, #tpu.memory_space<vmem>>, vector<64x8xf32>,
    %c1_29 = arith.constant 1 : index
    %c0_30 = arith.constant 0 : index
    %c0_31 = arith.constant 0 : index
    %30 = vector.load %arg9[%c1_29, %c0_30, %c0_31] : memref<10x10x16xf32, #tpu.memory_space<vmem>>, vector<8x8x16xf32>
    %31 = vector.shape_cast %30 : vector<8x8x16xf32> to vector<64x16xf32>
    %32 = arith.truncf %31 : vector<64x16xf32> to vector<64x16xbf16>
    %c1_32 = arith.constant 1 : index
    %c0_33 = arith.constant 0 : index
    %c0_34 = arith.constant 0 : index
    %33 = vector.load %arg10[%c1_32, %c0_33, %c0_34] : memref<2x64x128xbf16, #tpu.memory_space<vmem>>, vector<1x64x16xbf16>
    %34 = vector.shape_cast %33 : vector<1x64x16xbf16> to vector<64x16xbf16>
    %35 = vector.shape_cast %32 : vector<64x16xbf16> to vector<1x64x16xbf16>
    tpu.vector_store %arg10[%c1_32, %c0_33, %c0_34], %35 {strides = array<i32>} : memref<2x64x128xbf16, #tpu.memory_space<vmem>>, vector<1x64x16xbf16>,
    %c1_35 = arith.constant 1 : index
    %c1_36 = arith.constant 1 : index
    %c0_37 = arith.constant 0 : index
    %36 = vector.load %arg9[%c1_35, %c1_36, %c0_37] : memref<10x10x16xf32, #tpu.memory_space<vmem>>, vector<8x8x16xf32>
    %37 = vector.shape_cast %36 : vector<8x8x16xf32> to vector<64x16xf32>
    %38 = arith.truncf %37 : vector<64x16xf32> to vector<64x16xbf16>
    %c1_38 = arith.constant 1 : index
    %c0_39 = arith.constant 0 : index
    %c16_40 = arith.constant 16 : index
    %39 = vector.load %arg10[%c1_38, %c0_39, %c16_40] : memref<2x64x128xbf16, #tpu.memory_space<vmem>>, vector<1x64x16xbf16>
    %40 = vector.shape_cast %39 : vector<1x64x16xbf16> to vector<64x16xbf16>
    %41 = vector.shape_cast %38 : vector<64x16xbf16> to vector<1x64x16xbf16>
    tpu.vector_store %arg10[%c1_38, %c0_39, %c16_40], %41 {strides = array<i32>} : memref<2x64x128xbf16, #tpu.memory_space<vmem>>, vector<1x64x16xbf16>,
    %c1_41 = arith.constant 1 : index
    %c2_42 = arith.constant 2 : index
    %c0_43 = arith.constant 0 : index
    %42 = vector.load %arg9[%c1_41, %c2_42, %c0_43] : memref<10x10x16xf32, #tpu.memory_space<vmem>>, vector<8x8x16xf32>
    %43 = vector.shape_cast %42 : vector<8x8x16xf32> to vector<64x16xf32>
    %44 = arith.truncf %43 : vector<64x16xf32> to vector<64x16xbf16>
    %c1_44 = arith.constant 1 : index
    %c0_45 = arith.constant 0 : index
    %c32_46 = arith.constant 32 : index
    %45 = vector.load %arg10[%c1_44, %c0_45, %c32_46] : memref<2x64x128xbf16, #tpu.memory_space<vmem>>, vector<1x64x16xbf16>
    %46 = vector.shape_cast %45 : vector<1x64x16xbf16> to vector<64x16xbf16>
    %47 = vector.shape_cast %44 : vector<64x16xbf16> to vector<1x64x16xbf16>
    tpu.vector_store %arg10[%c1_44, %c0_45, %c32_46], %47 {strides = array<i32>} : memref<2x64x128xbf16, #tpu.memory_space<vmem>>, vector<1x64x16xbf16>,
    %c1_47 = arith.constant 1 : index
    %c0_48 = arith.constant 0 : index
    %c0_49 = arith.constant 0 : index
    %48 = vector.load %arg10[%c1_47, %c0_48, %c0_49] : memref<2x64x128xbf16, #tpu.memory_space<vmem>>, vector<1x64x128xbf16>
    %49 = vector.shape_cast %48 : vector<1x64x128xbf16> to vector<64x128xbf16>
    %c1_50 = arith.constant 1 : index
    %c0_51 = arith.constant 0 : index
    %c0_52 = arith.constant 0 : index
    %50 = vector.load %arg4[%c1_50, %c0_51, %c0_52] : memref<3x128x8xbf16, #tpu.memory_space<vmem>>, vector<1x128x8xbf16>
    %51 = vector.shape_cast %50 : vector<1x128x8xbf16> to vector<128x8xbf16>
    %cst_53 = arith.constant dense<0.000000e+00> : vector<64x8xf32>
    %52 = tpu.matmul %49, %51, %cst_53 {dimension_numbers = #tpu.dot_dimension_numbers<[1], [0], [0], [1], [0, 0, 1, 1], [], []>} : vector<64x128xbf16>, vector<128x8xbf16>, vector<64x8xf32> -> vector<64x8xf32>
    %c0_54 = arith.constant 0 : index
    %c0_55 = arith.constant 0 : index
    %53 = vector.load %arg11[%c0_54, %c0_55] : memref<64x8xf32, #tpu.memory_space<vmem>>, vector<64x8xf32>
    %54 = arith.addf %53, %52 : vector<64x8xf32>
    %c0_56 = arith.constant 0 : index
    %c0_57 = arith.constant 0 : index
    %55 = vector.load %arg11[%c0_56, %c0_57] : memref<64x8xf32, #tpu.memory_space<vmem>>, vector<64x8xf32>
    tpu.vector_store %arg11[%c0_56, %c0_57], %54 {strides = array<i32>} : memref<64x8xf32, #tpu.memory_space<vmem>>, vector<64x8xf32>,
    %c2_58 = arith.constant 2 : index
    %c0_59 = arith.constant 0 : index
    %c0_60 = arith.constant 0 : index
    %56 = vector.load %arg9[%c2_58, %c0_59, %c0_60] : memref<10x10x16xf32, #tpu.memory_space<vmem>>, vector<8x8x16xf32>
    %57 = vector.shape_cast %56 : vector<8x8x16xf32> to vector<64x16xf32>
    %58 = arith.truncf %57 : vector<64x16xf32> to vector<64x16xbf16>
    %c0_61 = arith.constant 0 : index
    %c0_62 = arith.constant 0 : index
    %c0_63 = arith.constant 0 : index
    %59 = vector.load %arg10[%c0_61, %c0_62, %c0_63] : memref<2x64x128xbf16, #tpu.memory_space<vmem>>, vector<1x64x16xbf16>
    %60 = vector.shape_cast %59 : vector<1x64x16xbf16> to vector<64x16xbf16>
    %61 = vector.shape_cast %58 : vector<64x16xbf16> to vector<1x64x16xbf16>
    tpu.vector_store %arg10[%c0_61, %c0_62, %c0_63], %61 {strides = array<i32>} : memref<2x64x128xbf16, #tpu.memory_space<vmem>>, vector<1x64x16xbf16>,
    %c2_64 = arith.constant 2 : index
    %c1_65 = arith.constant 1 : index
    %c0_66 = arith.constant 0 : index
    %62 = vector.load %arg9[%c2_64, %c1_65, %c0_66] : memref<10x10x16xf32, #tpu.memory_space<vmem>>, vector<8x8x16xf32>
    %63 = vector.shape_cast %62 : vector<8x8x16xf32> to vector<64x16xf32>
    %64 = arith.truncf %63 : vector<64x16xf32> to vector<64x16xbf16>
    %c0_67 = arith.constant 0 : index
    %c0_68 = arith.constant 0 : index
    %c16_69 = arith.constant 16 : index
    %65 = vector.load %arg10[%c0_67, %c0_68, %c16_69] : memref<2x64x128xbf16, #tpu.memory_space<vmem>>, vector<1x64x16xbf16>
    %66 = vector.shape_cast %65 : vector<1x64x16xbf16> to vector<64x16xbf16>
    %67 = vector.shape_cast %64 : vector<64x16xbf16> to vector<1x64x16xbf16>
    tpu.vector_store %arg10[%c0_67, %c0_68, %c16_69], %67 {strides = array<i32>} : memref<2x64x128xbf16, #tpu.memory_space<vmem>>, vector<1x64x16xbf16>,
    %c2_70 = arith.constant 2 : index
    %c2_71 = arith.constant 2 : index
    %c0_72 = arith.constant 0 : index
    %68 = vector.load %arg9[%c2_70, %c2_71, %c0_72] : memref<10x10x16xf32, #tpu.memory_space<vmem>>, vector<8x8x16xf32>
    %69 = vector.shape_cast %68 : vector<8x8x16xf32> to vector<64x16xf32>
    %70 = arith.truncf %69 : vector<64x16xf32> to vector<64x16xbf16>
    %c0_73 = arith.constant 0 : index
    %c0_74 = arith.constant 0 : index
    %c32_75 = arith.constant 32 : index
    %71 = vector.load %arg10[%c0_73, %c0_74, %c32_75] : memref<2x64x128xbf16, #tpu.memory_space<vmem>>, vector<1x64x16xbf16>
    %72 = vector.shape_cast %71 : vector<1x64x16xbf16> to vector<64x16xbf16>
    %73 = vector.shape_cast %70 : vector<64x16xbf16> to vector<1x64x16xbf16>
    tpu.vector_store %arg10[%c0_73, %c0_74, %c32_75], %73 {strides = array<i32>} : memref<2x64x128xbf16, #tpu.memory_space<vmem>>, vector<1x64x16xbf16>,
    %c0_76 = arith.constant 0 : index
    %c0_77 = arith.constant 0 : index
    %c0_78 = arith.constant 0 : index
    %74 = vector.load %arg10[%c0_76, %c0_77, %c0_78] : memref<2x64x128xbf16, #tpu.memory_space<vmem>>, vector<1x64x128xbf16>
    %75 = vector.shape_cast %74 : vector<1x64x128xbf16> to vector<64x128xbf16>
    %c2_79 = arith.constant 2 : index
    %c0_80 = arith.constant 0 : index
    %c0_81 = arith.constant 0 : index
    %76 = vector.load %arg4[%c2_79, %c0_80, %c0_81] : memref<3x128x8xbf16, #tpu.memory_space<vmem>>, vector<1x128x8xbf16>
    %77 = vector.shape_cast %76 : vector<1x128x8xbf16> to vector<128x8xbf16>
    %cst_82 = arith.constant dense<0.000000e+00> : vector<64x8xf32>
    %78 = tpu.matmul %75, %77, %cst_82 {dimension_numbers = #tpu.dot_dimension_numbers<[1], [0], [0], [1], [0, 0, 1, 1], [], []>} : vector<64x128xbf16>, vector<128x8xbf16>, vector<64x8xf32> -> vector<64x8xf32>
    %c0_83 = arith.constant 0 : index
    %c0_84 = arith.constant 0 : index
    %79 = vector.load %arg11[%c0_83, %c0_84] : memref<64x8xf32, #tpu.memory_space<vmem>>, vector<64x8xf32>
    %80 = arith.addf %79, %78 : vector<64x8xf32>
    %c0_85 = arith.constant 0 : index
    %c0_86 = arith.constant 0 : index
    %81 = vector.load %arg11[%c0_85, %c0_86] : memref<64x8xf32, #tpu.memory_space<vmem>>, vector<64x8xf32>
    tpu.vector_store %arg11[%c0_85, %c0_86], %80 {strides = array<i32>} : memref<64x8xf32, #tpu.memory_space<vmem>>, vector<64x8xf32>,
    %c0_87 = arith.constant 0 : index
    %c0_88 = arith.constant 0 : index
    %82 = vector.load %arg11[%c0_87, %c0_88] : memref<64x8xf32, #tpu.memory_space<vmem>>, vector<64x8xf32>
    %83 = vector.shape_cast %82 : vector<64x8xf32> to vector<1x8x8x8xf32>
    %c0_89 = arith.constant 0 : index
    %c0_90 = arith.constant 0 : index
    %c0_91 = arith.constant 0 : index
    %c0_92 = arith.constant 0 : index
    %84 = vector.load %arg6[%c0_89, %c0_90, %c0_91, %c0_92] : memref<1x8x8x8xf32, #tpu.memory_space<vmem>>, vector<1x8x8x8xf32>
    tpu.vector_store %arg6[%c0_89, %c0_90, %c0_91, %c0_92], %83 {strides = array<i32>} : memref<1x8x8x8xf32, #tpu.memory_space<vmem>>, vector<1x8x8x8xf32>,
    %cst_93 = arith.constant dense<0.000000e+00> : vector<8xf32>
    %85 = vector.multi_reduction <add>, %82, %cst_93 [0] : vector<64x8xf32> to vector<8xf32>
    %86 = vector.shape_cast %85 : vector<8xf32> to vector<1x8xf32>
    %87 = vector.shape_cast %86 : vector<1x8xf32> to vector<1x1x8xf32>
    %c0_94 = arith.constant 0 : index
    %c0_95 = arith.constant 0 : index
    %c0_96 = arith.constant 0 : index
    %88 = vector.load %arg7[%c0_94, %c0_95, %c0_96] : memref<1x1x8xf32, #tpu.memory_space<vmem>>, vector<1x1x8xf32>
    tpu.vector_store %arg7[%c0_94, %c0_95, %c0_96], %87 {strides = array<i32>} : memref<1x1x8xf32, #tpu.memory_space<vmem>>, vector<1x1x8xf32>,
    %89 = arith.mulf %82, %82 : vector<64x8xf32>
    %cst_97 = arith.constant dense<0.000000e+00> : vector<8xf32>
    %90 = vector.multi_reduction <add>, %89, %cst_97 [0] : vector<64x8xf32> to vector<8xf32>
    %91 = vector.shape_cast %90 : vector<8xf32> to vector<1x8xf32>
    %92 = vector.shape_cast %91 : vector<1x8xf32> to vector<1x1x8xf32>
    %c0_98 = arith.constant 0 : index
    %c0_99 = arith.constant 0 : index
    %c0_100 = arith.constant 0 : index
    %93 = vector.load %arg8[%c0_98, %c0_99, %c0_100] : memref<1x1x8xf32, #tpu.memory_space<vmem>>, vector<1x1x8xf32>
    tpu.vector_store %arg8[%c0_98, %c0_99, %c0_100], %92 {strides = array<i32>} : memref<1x1x8xf32, #tpu.memory_space<vmem>>, vector<1x1x8xf32>,
    return
  }
  func.func @transform_0(%arg0: i32) -> (i32, i32, i32, i32) {
    %c0_i32 = arith.constant 0 : i32
    %c0_i32_0 = arith.constant 0 : i32
    %c0_i32_1 = arith.constant 0 : i32
    %c0_i32_2 = arith.constant 0 : i32
    return %arg0, %c0_i32, %c0_i32_0, %c0_i32_1 : i32, i32, i32, i32
  }
  func.func @transform_1(%arg0: i32) -> (i32, i32, i32) {
    %c0_i32 = arith.constant 0 : i32
    %c0_i32_0 = arith.constant 0 : i32
    %c0_i32_1 = arith.constant 0 : i32
    %c0_i32_2 = arith.constant 0 : i32
    return %c0_i32, %c0_i32_0, %c0_i32_1 : i32, i32, i32
  }
  func.func @transform_2(%arg0: i32) -> (i32, i32, i32) {
    %c0_i32 = arith.constant 0 : i32
    %c0_i32_0 = arith.constant 0 : i32
    %c0_i32_1 = arith.constant 0 : i32
    %c0_i32_2 = arith.constant 0 : i32
    return %c0_i32, %c0_i32_0, %c0_i32_1 : i32, i32, i32
  }
  func.func @transform_3(%arg0: i32) -> (i32, i32, i32) {
    %c0_i32 = arith.constant 0 : i32
    %c0_i32_0 = arith.constant 0 : i32
    %c0_i32_1 = arith.constant 0 : i32
    %c0_i32_2 = arith.constant 0 : i32
    return %c0_i32, %c0_i32_0, %c0_i32_1 : i32, i32, i32
  }
  func.func @transform_4(%arg0: i32) -> (i32, i32) {
    %c0_i32 = arith.constant 0 : i32
    %c0_i32_0 = arith.constant 0 : i32
    %c0_i32_1 = arith.constant 0 : i32
    return %c0_i32, %c0_i32_0 : i32, i32
  }
  func.func @transform_5(%arg0: i32) -> (i32, i32, i32, i32) {
    %c0_i32 = arith.constant 0 : i32
    %c0_i32_0 = arith.constant 0 : i32
    %c0_i32_1 = arith.constant 0 : i32
    %c0_i32_2 = arith.constant 0 : i32
    return %arg0, %c0_i32, %c0_i32_0, %c0_i32_1 : i32, i32, i32, i32
  }
  func.func @transform_6(%arg0: i32) -> (i32, i32, i32) {
    %c0_i32 = arith.constant 0 : i32
    %c0_i32_0 = arith.constant 0 : i32
    %c0_i32_1 = arith.constant 0 : i32
    return %arg0, %c0_i32, %c0_i32_0 : i32, i32, i32
  }
  func.func @transform_7(%arg0: i32) -> (i32, i32, i32) {
    %c0_i32 = arith.constant 0 : i32
    %c0_i32_0 = arith.constant 0 : i32
    %c0_i32_1 = arith.constant 0 : i32
    return %arg0, %c0_i32, %c0_i32_0 : i32, i32, i32
  }
}

module attributes {stable_mosaic.version = 11 : i64} {
  func.func @_conv_im2col_kernel(%arg0: i32, %arg1: memref<1x4x4x32xf32, #tpu.memory_space<vmem>>, %arg2: memref<1x1x32xf32, #tpu.memory_space<vmem>>, %arg3: memref<1x1x32xf32, #tpu.memory_space<vmem>>, %arg4: memref<3x128x8xbf16, #tpu.memory_space<vmem>>, %arg5: memref<1x8xf32, #tpu.memory_space<vmem>>, %arg6: memref<1x4x4x8xf32, #tpu.memory_space<vmem>>, %arg7: memref<1x1x8xf32, #tpu.memory_space<vmem>>, %arg8: memref<1x1x8xf32, #tpu.memory_space<vmem>>, %arg9: memref<6x6x32xf32, #tpu.memory_space<vmem>>, %arg10: memref<2x16x128xbf16, #tpu.memory_space<vmem>>, %arg11: memref<16x8xf32, #tpu.memory_space<vmem>>) attributes {dimension_semantics = [#tpu.dimension_semantics<parallel>], iteration_bounds = array<i64: 2>, scalar_prefetch = 0 : i64, scratch_operands = 3 : i64, tpu.core_type = #tpu.core_type<tc>, window_params = [{transform_indices = @transform_0, window_bounds = array<i64: 1, 4, 4, 32>}, {pipeline_mode = #tpu.pipeline_mode<synchronous>, transform_indices = @transform_1, window_bounds = array<i64: 1, 1, 32>}, {pipeline_mode = #tpu.pipeline_mode<synchronous>, transform_indices = @transform_2, window_bounds = array<i64: 1, 1, 32>}, {pipeline_mode = #tpu.pipeline_mode<synchronous>, transform_indices = @transform_3, window_bounds = array<i64: 3, 128, 8>}, {pipeline_mode = #tpu.pipeline_mode<synchronous>, transform_indices = @transform_4, window_bounds = array<i64: 1, 8>}, {transform_indices = @transform_5, window_bounds = array<i64: 1, 4, 4, 8>}, {transform_indices = @transform_6, window_bounds = array<i64: 1, 1, 8>}, {transform_indices = @transform_7, window_bounds = array<i64: 1, 1, 8>}]} {
    %c0_i32 = arith.constant 0 : i32
    %0 = arith.cmpi eq, %arg0, %c0_i32 : i32
    %1 = arith.extui %0 : i1 to i32
    %c0_i32_0 = arith.constant 0 : i32
    %2 = arith.cmpi ne, %1, %c0_i32_0 : i32
    scf.if %2 {
      %cst_108 = arith.constant 0.000000e+00 : f32
      %102 = vector.broadcast %cst_108 : f32 to vector<6x6x32xf32>
      %c0_109 = arith.constant 0 : index
      %c0_110 = arith.constant 0 : index
      %c0_111 = arith.constant 0 : index
      %103 = vector.load %arg9[%c0_109, %c0_110, %c0_111] : memref<6x6x32xf32, #tpu.memory_space<vmem>>, vector<6x6x32xf32>
      tpu.vector_store %arg9[%c0_109, %c0_110, %c0_111], %102 {strides = array<i32>} : memref<6x6x32xf32, #tpu.memory_space<vmem>>, vector<6x6x32xf32>,
      %cst_112 = arith.constant 0.000000e+00 : bf16
      %104 = vector.broadcast %cst_112 : bf16 to vector<2x16x128xbf16>
      %c0_113 = arith.constant 0 : index
      %c0_114 = arith.constant 0 : index
      %c0_115 = arith.constant 0 : index
      %105 = vector.load %arg10[%c0_113, %c0_114, %c0_115] : memref<2x16x128xbf16, #tpu.memory_space<vmem>>, vector<2x16x128xbf16>
      tpu.vector_store %arg10[%c0_113, %c0_114, %c0_115], %104 {strides = array<i32>} : memref<2x16x128xbf16, #tpu.memory_space<vmem>>, vector<2x16x128xbf16>,
    } else {
    }
    %c0 = arith.constant 0 : index
    %c0_1 = arith.constant 0 : index
    %c0_2 = arith.constant 0 : index
    %c0_3 = arith.constant 0 : index
    %3 = vector.load %arg1[%c0, %c0_1, %c0_2, %c0_3] : memref<1x4x4x32xf32, #tpu.memory_space<vmem>>, vector<1x4x4x32xf32>
    %4 = vector.shape_cast %3 : vector<1x4x4x32xf32> to vector<4x4x32xf32>
    %c0_4 = arith.constant 0 : index
    %c0_5 = arith.constant 0 : index
    %c0_6 = arith.constant 0 : index
    %5 = vector.load %arg2[%c0_4, %c0_5, %c0_6] : memref<1x1x32xf32, #tpu.memory_space<vmem>>, vector<1x1x32xf32>
    %6 = vector.broadcast %5 : vector<1x1x32xf32> to vector<4x4x32xf32>
    %7 = arith.mulf %4, %6 : vector<4x4x32xf32>
    %c0_7 = arith.constant 0 : index
    %c0_8 = arith.constant 0 : index
    %c0_9 = arith.constant 0 : index
    %8 = vector.load %arg3[%c0_7, %c0_8, %c0_9] : memref<1x1x32xf32, #tpu.memory_space<vmem>>, vector<1x1x32xf32>
    %9 = vector.broadcast %8 : vector<1x1x32xf32> to vector<4x4x32xf32>
    %10 = arith.addf %7, %9 : vector<4x4x32xf32>
    %cst = arith.constant 0.000000e+00 : f32
    %11 = vector.broadcast %cst : f32 to vector<4x4x32xf32>
    %12 = arith.maximumf %10, %11 : vector<4x4x32xf32>
    %c1 = arith.constant 1 : index
    %c1_10 = arith.constant 1 : index
    %c0_11 = arith.constant 0 : index
    %13 = vector.load %arg9[%c1, %c1_10, %c0_11] : memref<6x6x32xf32, #tpu.memory_space<vmem>>, vector<4x4x32xf32>
    tpu.vector_store %arg9[%c1, %c1_10, %c0_11], %12 {strides = array<i32>} : memref<6x6x32xf32, #tpu.memory_space<vmem>>, vector<4x4x32xf32>,
    %c0_12 = arith.constant 0 : index
    %c0_13 = arith.constant 0 : index
    %c0_14 = arith.constant 0 : index
    %14 = vector.load %arg9[%c0_12, %c0_13, %c0_14] : memref<6x6x32xf32, #tpu.memory_space<vmem>>, vector<4x4x32xf32>
    %15 = vector.shape_cast %14 : vector<4x4x32xf32> to vector<16x32xf32>
    %16 = arith.truncf %15 : vector<16x32xf32> to vector<16x32xbf16>
    %c0_15 = arith.constant 0 : index
    %c0_16 = arith.constant 0 : index
    %c0_17 = arith.constant 0 : index
    %17 = vector.load %arg10[%c0_15, %c0_16, %c0_17] : memref<2x16x128xbf16, #tpu.memory_space<vmem>>, vector<1x16x32xbf16>
    %18 = vector.shape_cast %17 : vector<1x16x32xbf16> to vector<16x32xbf16>
    %19 = vector.shape_cast %16 : vector<16x32xbf16> to vector<1x16x32xbf16>
    tpu.vector_store %arg10[%c0_15, %c0_16, %c0_17], %19 {strides = array<i32>} : memref<2x16x128xbf16, #tpu.memory_space<vmem>>, vector<1x16x32xbf16>,
    %c0_18 = arith.constant 0 : index
    %c1_19 = arith.constant 1 : index
    %c0_20 = arith.constant 0 : index
    %20 = vector.load %arg9[%c0_18, %c1_19, %c0_20] : memref<6x6x32xf32, #tpu.memory_space<vmem>>, vector<4x4x32xf32>
    %21 = vector.shape_cast %20 : vector<4x4x32xf32> to vector<16x32xf32>
    %22 = arith.truncf %21 : vector<16x32xf32> to vector<16x32xbf16>
    %c0_21 = arith.constant 0 : index
    %c0_22 = arith.constant 0 : index
    %c32 = arith.constant 32 : index
    %23 = vector.load %arg10[%c0_21, %c0_22, %c32] : memref<2x16x128xbf16, #tpu.memory_space<vmem>>, vector<1x16x32xbf16>
    %24 = vector.shape_cast %23 : vector<1x16x32xbf16> to vector<16x32xbf16>
    %25 = vector.shape_cast %22 : vector<16x32xbf16> to vector<1x16x32xbf16>
    tpu.vector_store %arg10[%c0_21, %c0_22, %c32], %25 {strides = array<i32>} : memref<2x16x128xbf16, #tpu.memory_space<vmem>>, vector<1x16x32xbf16>,
    %c0_23 = arith.constant 0 : index
    %c2 = arith.constant 2 : index
    %c0_24 = arith.constant 0 : index
    %26 = vector.load %arg9[%c0_23, %c2, %c0_24] : memref<6x6x32xf32, #tpu.memory_space<vmem>>, vector<4x4x32xf32>
    %27 = vector.shape_cast %26 : vector<4x4x32xf32> to vector<16x32xf32>
    %28 = arith.truncf %27 : vector<16x32xf32> to vector<16x32xbf16>
    %c0_25 = arith.constant 0 : index
    %c0_26 = arith.constant 0 : index
    %c64 = arith.constant 64 : index
    %29 = vector.load %arg10[%c0_25, %c0_26, %c64] : memref<2x16x128xbf16, #tpu.memory_space<vmem>>, vector<1x16x32xbf16>
    %30 = vector.shape_cast %29 : vector<1x16x32xbf16> to vector<16x32xbf16>
    %31 = vector.shape_cast %28 : vector<16x32xbf16> to vector<1x16x32xbf16>
    tpu.vector_store %arg10[%c0_25, %c0_26, %c64], %31 {strides = array<i32>} : memref<2x16x128xbf16, #tpu.memory_space<vmem>>, vector<1x16x32xbf16>,
    %c0_27 = arith.constant 0 : index
    %c0_28 = arith.constant 0 : index
    %c0_29 = arith.constant 0 : index
    %32 = vector.load %arg10[%c0_27, %c0_28, %c0_29] : memref<2x16x128xbf16, #tpu.memory_space<vmem>>, vector<1x16x128xbf16>
    %33 = vector.shape_cast %32 : vector<1x16x128xbf16> to vector<16x128xbf16>
    %c0_30 = arith.constant 0 : index
    %c0_31 = arith.constant 0 : index
    %c0_32 = arith.constant 0 : index
    %34 = vector.load %arg4[%c0_30, %c0_31, %c0_32] : memref<3x128x8xbf16, #tpu.memory_space<vmem>>, vector<1x128x8xbf16>
    %35 = vector.shape_cast %34 : vector<1x128x8xbf16> to vector<128x8xbf16>
    %cst_33 = arith.constant dense<0.000000e+00> : vector<16x8xf32>
    %36 = tpu.matmul %33, %35, %cst_33 {dimension_numbers = #tpu.dot_dimension_numbers<[1], [0], [0], [1], [0, 0, 1, 1], [], []>} : vector<16x128xbf16>, vector<128x8xbf16>, vector<16x8xf32> -> vector<16x8xf32>
    %c0_34 = arith.constant 0 : index
    %c0_35 = arith.constant 0 : index
    %37 = vector.load %arg11[%c0_34, %c0_35] : memref<16x8xf32, #tpu.memory_space<vmem>>, vector<16x8xf32>
    tpu.vector_store %arg11[%c0_34, %c0_35], %36 {strides = array<i32>} : memref<16x8xf32, #tpu.memory_space<vmem>>, vector<16x8xf32>,
    %c1_36 = arith.constant 1 : index
    %c0_37 = arith.constant 0 : index
    %c0_38 = arith.constant 0 : index
    %38 = vector.load %arg9[%c1_36, %c0_37, %c0_38] : memref<6x6x32xf32, #tpu.memory_space<vmem>>, vector<4x4x32xf32>
    %39 = vector.shape_cast %38 : vector<4x4x32xf32> to vector<16x32xf32>
    %40 = arith.truncf %39 : vector<16x32xf32> to vector<16x32xbf16>
    %c1_39 = arith.constant 1 : index
    %c0_40 = arith.constant 0 : index
    %c0_41 = arith.constant 0 : index
    %41 = vector.load %arg10[%c1_39, %c0_40, %c0_41] : memref<2x16x128xbf16, #tpu.memory_space<vmem>>, vector<1x16x32xbf16>
    %42 = vector.shape_cast %41 : vector<1x16x32xbf16> to vector<16x32xbf16>
    %43 = vector.shape_cast %40 : vector<16x32xbf16> to vector<1x16x32xbf16>
    tpu.vector_store %arg10[%c1_39, %c0_40, %c0_41], %43 {strides = array<i32>} : memref<2x16x128xbf16, #tpu.memory_space<vmem>>, vector<1x16x32xbf16>,
    %c1_42 = arith.constant 1 : index
    %c1_43 = arith.constant 1 : index
    %c0_44 = arith.constant 0 : index
    %44 = vector.load %arg9[%c1_42, %c1_43, %c0_44] : memref<6x6x32xf32, #tpu.memory_space<vmem>>, vector<4x4x32xf32>
    %45 = vector.shape_cast %44 : vector<4x4x32xf32> to vector<16x32xf32>
    %46 = arith.truncf %45 : vector<16x32xf32> to vector<16x32xbf16>
    %c1_45 = arith.constant 1 : index
    %c0_46 = arith.constant 0 : index
    %c32_47 = arith.constant 32 : index
    %47 = vector.load %arg10[%c1_45, %c0_46, %c32_47] : memref<2x16x128xbf16, #tpu.memory_space<vmem>>, vector<1x16x32xbf16>
    %48 = vector.shape_cast %47 : vector<1x16x32xbf16> to vector<16x32xbf16>
    %49 = vector.shape_cast %46 : vector<16x32xbf16> to vector<1x16x32xbf16>
    tpu.vector_store %arg10[%c1_45, %c0_46, %c32_47], %49 {strides = array<i32>} : memref<2x16x128xbf16, #tpu.memory_space<vmem>>, vector<1x16x32xbf16>,
    %c1_48 = arith.constant 1 : index
    %c2_49 = arith.constant 2 : index
    %c0_50 = arith.constant 0 : index
    %50 = vector.load %arg9[%c1_48, %c2_49, %c0_50] : memref<6x6x32xf32, #tpu.memory_space<vmem>>, vector<4x4x32xf32>
    %51 = vector.shape_cast %50 : vector<4x4x32xf32> to vector<16x32xf32>
    %52 = arith.truncf %51 : vector<16x32xf32> to vector<16x32xbf16>
    %c1_51 = arith.constant 1 : index
    %c0_52 = arith.constant 0 : index
    %c64_53 = arith.constant 64 : index
    %53 = vector.load %arg10[%c1_51, %c0_52, %c64_53] : memref<2x16x128xbf16, #tpu.memory_space<vmem>>, vector<1x16x32xbf16>
    %54 = vector.shape_cast %53 : vector<1x16x32xbf16> to vector<16x32xbf16>
    %55 = vector.shape_cast %52 : vector<16x32xbf16> to vector<1x16x32xbf16>
    tpu.vector_store %arg10[%c1_51, %c0_52, %c64_53], %55 {strides = array<i32>} : memref<2x16x128xbf16, #tpu.memory_space<vmem>>, vector<1x16x32xbf16>,
    %c1_54 = arith.constant 1 : index
    %c0_55 = arith.constant 0 : index
    %c0_56 = arith.constant 0 : index
    %56 = vector.load %arg10[%c1_54, %c0_55, %c0_56] : memref<2x16x128xbf16, #tpu.memory_space<vmem>>, vector<1x16x128xbf16>
    %57 = vector.shape_cast %56 : vector<1x16x128xbf16> to vector<16x128xbf16>
    %c1_57 = arith.constant 1 : index
    %c0_58 = arith.constant 0 : index
    %c0_59 = arith.constant 0 : index
    %58 = vector.load %arg4[%c1_57, %c0_58, %c0_59] : memref<3x128x8xbf16, #tpu.memory_space<vmem>>, vector<1x128x8xbf16>
    %59 = vector.shape_cast %58 : vector<1x128x8xbf16> to vector<128x8xbf16>
    %cst_60 = arith.constant dense<0.000000e+00> : vector<16x8xf32>
    %60 = tpu.matmul %57, %59, %cst_60 {dimension_numbers = #tpu.dot_dimension_numbers<[1], [0], [0], [1], [0, 0, 1, 1], [], []>} : vector<16x128xbf16>, vector<128x8xbf16>, vector<16x8xf32> -> vector<16x8xf32>
    %c0_61 = arith.constant 0 : index
    %c0_62 = arith.constant 0 : index
    %61 = vector.load %arg11[%c0_61, %c0_62] : memref<16x8xf32, #tpu.memory_space<vmem>>, vector<16x8xf32>
    %62 = arith.addf %61, %60 : vector<16x8xf32>
    %c0_63 = arith.constant 0 : index
    %c0_64 = arith.constant 0 : index
    %63 = vector.load %arg11[%c0_63, %c0_64] : memref<16x8xf32, #tpu.memory_space<vmem>>, vector<16x8xf32>
    tpu.vector_store %arg11[%c0_63, %c0_64], %62 {strides = array<i32>} : memref<16x8xf32, #tpu.memory_space<vmem>>, vector<16x8xf32>,
    %c2_65 = arith.constant 2 : index
    %c0_66 = arith.constant 0 : index
    %c0_67 = arith.constant 0 : index
    %64 = vector.load %arg9[%c2_65, %c0_66, %c0_67] : memref<6x6x32xf32, #tpu.memory_space<vmem>>, vector<4x4x32xf32>
    %65 = vector.shape_cast %64 : vector<4x4x32xf32> to vector<16x32xf32>
    %66 = arith.truncf %65 : vector<16x32xf32> to vector<16x32xbf16>
    %c0_68 = arith.constant 0 : index
    %c0_69 = arith.constant 0 : index
    %c0_70 = arith.constant 0 : index
    %67 = vector.load %arg10[%c0_68, %c0_69, %c0_70] : memref<2x16x128xbf16, #tpu.memory_space<vmem>>, vector<1x16x32xbf16>
    %68 = vector.shape_cast %67 : vector<1x16x32xbf16> to vector<16x32xbf16>
    %69 = vector.shape_cast %66 : vector<16x32xbf16> to vector<1x16x32xbf16>
    tpu.vector_store %arg10[%c0_68, %c0_69, %c0_70], %69 {strides = array<i32>} : memref<2x16x128xbf16, #tpu.memory_space<vmem>>, vector<1x16x32xbf16>,
    %c2_71 = arith.constant 2 : index
    %c1_72 = arith.constant 1 : index
    %c0_73 = arith.constant 0 : index
    %70 = vector.load %arg9[%c2_71, %c1_72, %c0_73] : memref<6x6x32xf32, #tpu.memory_space<vmem>>, vector<4x4x32xf32>
    %71 = vector.shape_cast %70 : vector<4x4x32xf32> to vector<16x32xf32>
    %72 = arith.truncf %71 : vector<16x32xf32> to vector<16x32xbf16>
    %c0_74 = arith.constant 0 : index
    %c0_75 = arith.constant 0 : index
    %c32_76 = arith.constant 32 : index
    %73 = vector.load %arg10[%c0_74, %c0_75, %c32_76] : memref<2x16x128xbf16, #tpu.memory_space<vmem>>, vector<1x16x32xbf16>
    %74 = vector.shape_cast %73 : vector<1x16x32xbf16> to vector<16x32xbf16>
    %75 = vector.shape_cast %72 : vector<16x32xbf16> to vector<1x16x32xbf16>
    tpu.vector_store %arg10[%c0_74, %c0_75, %c32_76], %75 {strides = array<i32>} : memref<2x16x128xbf16, #tpu.memory_space<vmem>>, vector<1x16x32xbf16>,
    %c2_77 = arith.constant 2 : index
    %c2_78 = arith.constant 2 : index
    %c0_79 = arith.constant 0 : index
    %76 = vector.load %arg9[%c2_77, %c2_78, %c0_79] : memref<6x6x32xf32, #tpu.memory_space<vmem>>, vector<4x4x32xf32>
    %77 = vector.shape_cast %76 : vector<4x4x32xf32> to vector<16x32xf32>
    %78 = arith.truncf %77 : vector<16x32xf32> to vector<16x32xbf16>
    %c0_80 = arith.constant 0 : index
    %c0_81 = arith.constant 0 : index
    %c64_82 = arith.constant 64 : index
    %79 = vector.load %arg10[%c0_80, %c0_81, %c64_82] : memref<2x16x128xbf16, #tpu.memory_space<vmem>>, vector<1x16x32xbf16>
    %80 = vector.shape_cast %79 : vector<1x16x32xbf16> to vector<16x32xbf16>
    %81 = vector.shape_cast %78 : vector<16x32xbf16> to vector<1x16x32xbf16>
    tpu.vector_store %arg10[%c0_80, %c0_81, %c64_82], %81 {strides = array<i32>} : memref<2x16x128xbf16, #tpu.memory_space<vmem>>, vector<1x16x32xbf16>,
    %c0_83 = arith.constant 0 : index
    %c0_84 = arith.constant 0 : index
    %c0_85 = arith.constant 0 : index
    %82 = vector.load %arg10[%c0_83, %c0_84, %c0_85] : memref<2x16x128xbf16, #tpu.memory_space<vmem>>, vector<1x16x128xbf16>
    %83 = vector.shape_cast %82 : vector<1x16x128xbf16> to vector<16x128xbf16>
    %c2_86 = arith.constant 2 : index
    %c0_87 = arith.constant 0 : index
    %c0_88 = arith.constant 0 : index
    %84 = vector.load %arg4[%c2_86, %c0_87, %c0_88] : memref<3x128x8xbf16, #tpu.memory_space<vmem>>, vector<1x128x8xbf16>
    %85 = vector.shape_cast %84 : vector<1x128x8xbf16> to vector<128x8xbf16>
    %cst_89 = arith.constant dense<0.000000e+00> : vector<16x8xf32>
    %86 = tpu.matmul %83, %85, %cst_89 {dimension_numbers = #tpu.dot_dimension_numbers<[1], [0], [0], [1], [0, 0, 1, 1], [], []>} : vector<16x128xbf16>, vector<128x8xbf16>, vector<16x8xf32> -> vector<16x8xf32>
    %c0_90 = arith.constant 0 : index
    %c0_91 = arith.constant 0 : index
    %87 = vector.load %arg11[%c0_90, %c0_91] : memref<16x8xf32, #tpu.memory_space<vmem>>, vector<16x8xf32>
    %88 = arith.addf %87, %86 : vector<16x8xf32>
    %c0_92 = arith.constant 0 : index
    %c0_93 = arith.constant 0 : index
    %89 = vector.load %arg11[%c0_92, %c0_93] : memref<16x8xf32, #tpu.memory_space<vmem>>, vector<16x8xf32>
    tpu.vector_store %arg11[%c0_92, %c0_93], %88 {strides = array<i32>} : memref<16x8xf32, #tpu.memory_space<vmem>>, vector<16x8xf32>,
    %c0_94 = arith.constant 0 : index
    %c0_95 = arith.constant 0 : index
    %90 = vector.load %arg11[%c0_94, %c0_95] : memref<16x8xf32, #tpu.memory_space<vmem>>, vector<16x8xf32>
    %91 = vector.shape_cast %90 : vector<16x8xf32> to vector<1x4x4x8xf32>
    %c0_96 = arith.constant 0 : index
    %c0_97 = arith.constant 0 : index
    %c0_98 = arith.constant 0 : index
    %c0_99 = arith.constant 0 : index
    %92 = vector.load %arg6[%c0_96, %c0_97, %c0_98, %c0_99] : memref<1x4x4x8xf32, #tpu.memory_space<vmem>>, vector<1x4x4x8xf32>
    tpu.vector_store %arg6[%c0_96, %c0_97, %c0_98, %c0_99], %91 {strides = array<i32>} : memref<1x4x4x8xf32, #tpu.memory_space<vmem>>, vector<1x4x4x8xf32>,
    %cst_100 = arith.constant dense<0.000000e+00> : vector<8xf32>
    %93 = vector.multi_reduction <add>, %90, %cst_100 [0] : vector<16x8xf32> to vector<8xf32>
    %94 = vector.shape_cast %93 : vector<8xf32> to vector<1x8xf32>
    %95 = vector.shape_cast %94 : vector<1x8xf32> to vector<1x1x8xf32>
    %c0_101 = arith.constant 0 : index
    %c0_102 = arith.constant 0 : index
    %c0_103 = arith.constant 0 : index
    %96 = vector.load %arg7[%c0_101, %c0_102, %c0_103] : memref<1x1x8xf32, #tpu.memory_space<vmem>>, vector<1x1x8xf32>
    tpu.vector_store %arg7[%c0_101, %c0_102, %c0_103], %95 {strides = array<i32>} : memref<1x1x8xf32, #tpu.memory_space<vmem>>, vector<1x1x8xf32>,
    %97 = arith.mulf %90, %90 : vector<16x8xf32>
    %cst_104 = arith.constant dense<0.000000e+00> : vector<8xf32>
    %98 = vector.multi_reduction <add>, %97, %cst_104 [0] : vector<16x8xf32> to vector<8xf32>
    %99 = vector.shape_cast %98 : vector<8xf32> to vector<1x8xf32>
    %100 = vector.shape_cast %99 : vector<1x8xf32> to vector<1x1x8xf32>
    %c0_105 = arith.constant 0 : index
    %c0_106 = arith.constant 0 : index
    %c0_107 = arith.constant 0 : index
    %101 = vector.load %arg8[%c0_105, %c0_106, %c0_107] : memref<1x1x8xf32, #tpu.memory_space<vmem>>, vector<1x1x8xf32>
    tpu.vector_store %arg8[%c0_105, %c0_106, %c0_107], %100 {strides = array<i32>} : memref<1x1x8xf32, #tpu.memory_space<vmem>>, vector<1x1x8xf32>,
    return
  }
  func.func @transform_0(%arg0: i32) -> (i32, i32, i32, i32) {
    %c0_i32 = arith.constant 0 : i32
    %c0_i32_0 = arith.constant 0 : i32
    %c0_i32_1 = arith.constant 0 : i32
    %c0_i32_2 = arith.constant 0 : i32
    return %arg0, %c0_i32, %c0_i32_0, %c0_i32_1 : i32, i32, i32, i32
  }
  func.func @transform_1(%arg0: i32) -> (i32, i32, i32) {
    %c0_i32 = arith.constant 0 : i32
    %c0_i32_0 = arith.constant 0 : i32
    %c0_i32_1 = arith.constant 0 : i32
    %c0_i32_2 = arith.constant 0 : i32
    return %c0_i32, %c0_i32_0, %c0_i32_1 : i32, i32, i32
  }
  func.func @transform_2(%arg0: i32) -> (i32, i32, i32) {
    %c0_i32 = arith.constant 0 : i32
    %c0_i32_0 = arith.constant 0 : i32
    %c0_i32_1 = arith.constant 0 : i32
    %c0_i32_2 = arith.constant 0 : i32
    return %c0_i32, %c0_i32_0, %c0_i32_1 : i32, i32, i32
  }
  func.func @transform_3(%arg0: i32) -> (i32, i32, i32) {
    %c0_i32 = arith.constant 0 : i32
    %c0_i32_0 = arith.constant 0 : i32
    %c0_i32_1 = arith.constant 0 : i32
    %c0_i32_2 = arith.constant 0 : i32
    return %c0_i32, %c0_i32_0, %c0_i32_1 : i32, i32, i32
  }
  func.func @transform_4(%arg0: i32) -> (i32, i32) {
    %c0_i32 = arith.constant 0 : i32
    %c0_i32_0 = arith.constant 0 : i32
    %c0_i32_1 = arith.constant 0 : i32
    return %c0_i32, %c0_i32_0 : i32, i32
  }
  func.func @transform_5(%arg0: i32) -> (i32, i32, i32, i32) {
    %c0_i32 = arith.constant 0 : i32
    %c0_i32_0 = arith.constant 0 : i32
    %c0_i32_1 = arith.constant 0 : i32
    %c0_i32_2 = arith.constant 0 : i32
    return %arg0, %c0_i32, %c0_i32_0, %c0_i32_1 : i32, i32, i32, i32
  }
  func.func @transform_6(%arg0: i32) -> (i32, i32, i32) {
    %c0_i32 = arith.constant 0 : i32
    %c0_i32_0 = arith.constant 0 : i32
    %c0_i32_1 = arith.constant 0 : i32
    return %arg0, %c0_i32, %c0_i32_0 : i32, i32, i32
  }
  func.func @transform_7(%arg0: i32) -> (i32, i32, i32) {
    %c0_i32 = arith.constant 0 : i32
    %c0_i32_0 = arith.constant 0 : i32
    %c0_i32_1 = arith.constant 0 : i32
    return %arg0, %c0_i32, %c0_i32_0 : i32, i32, i32
  }
}

module attributes {stable_mosaic.version = 11 : i64} {
  func.func @_affine_relu_kernel(%arg0: i32, %arg1: i32, %arg2: memref<1x4x4x8xf32, #tpu.memory_space<vmem>>, %arg3: memref<1x1x1x8xf32, #tpu.memory_space<vmem>>, %arg4: memref<1x1x1x8xf32, #tpu.memory_space<vmem>>, %arg5: memref<1x4x4x8xf32, #tpu.memory_space<vmem>>) attributes {dimension_semantics = [#tpu.dimension_semantics<parallel>, #tpu.dimension_semantics<parallel>], iteration_bounds = array<i64: 2, 1>, scalar_prefetch = 0 : i64, scratch_operands = 0 : i64, tpu.core_type = #tpu.core_type<tc>, window_params = [{transform_indices = @transform_0, window_bounds = array<i64: 1, 4, 4, 8>}, {pipeline_mode = #tpu.pipeline_mode<synchronous>, transform_indices = @transform_1, window_bounds = array<i64: 1, 1, 1, 8>}, {pipeline_mode = #tpu.pipeline_mode<synchronous>, transform_indices = @transform_2, window_bounds = array<i64: 1, 1, 1, 8>}, {transform_indices = @transform_3, window_bounds = array<i64: 1, 4, 4, 8>}]} {
    %c0 = arith.constant 0 : index
    %c0_0 = arith.constant 0 : index
    %c0_1 = arith.constant 0 : index
    %c0_2 = arith.constant 0 : index
    %0 = vector.load %arg2[%c0, %c0_0, %c0_1, %c0_2] : memref<1x4x4x8xf32, #tpu.memory_space<vmem>>, vector<1x4x4x8xf32>
    %c0_3 = arith.constant 0 : index
    %c0_4 = arith.constant 0 : index
    %c0_5 = arith.constant 0 : index
    %c0_6 = arith.constant 0 : index
    %1 = vector.load %arg3[%c0_3, %c0_4, %c0_5, %c0_6] : memref<1x1x1x8xf32, #tpu.memory_space<vmem>>, vector<1x1x1x8xf32>
    %2 = vector.broadcast %1 : vector<1x1x1x8xf32> to vector<1x4x4x8xf32>
    %3 = arith.mulf %0, %2 : vector<1x4x4x8xf32>
    %c0_7 = arith.constant 0 : index
    %c0_8 = arith.constant 0 : index
    %c0_9 = arith.constant 0 : index
    %c0_10 = arith.constant 0 : index
    %4 = vector.load %arg4[%c0_7, %c0_8, %c0_9, %c0_10] : memref<1x1x1x8xf32, #tpu.memory_space<vmem>>, vector<1x1x1x8xf32>
    %5 = vector.broadcast %4 : vector<1x1x1x8xf32> to vector<1x4x4x8xf32>
    %6 = arith.addf %3, %5 : vector<1x4x4x8xf32>
    %cst = arith.constant 0.000000e+00 : f32
    %7 = vector.broadcast %cst : f32 to vector<1x4x4x8xf32>
    %8 = arith.maximumf %6, %7 : vector<1x4x4x8xf32>
    %c0_11 = arith.constant 0 : index
    %c0_12 = arith.constant 0 : index
    %c0_13 = arith.constant 0 : index
    %c0_14 = arith.constant 0 : index
    %9 = vector.load %arg5[%c0_11, %c0_12, %c0_13, %c0_14] : memref<1x4x4x8xf32, #tpu.memory_space<vmem>>, vector<1x4x4x8xf32>
    tpu.vector_store %arg5[%c0_11, %c0_12, %c0_13, %c0_14], %8 {strides = array<i32>} : memref<1x4x4x8xf32, #tpu.memory_space<vmem>>, vector<1x4x4x8xf32>,
    return
  }
  func.func @transform_0(%arg0: i32, %arg1: i32) -> (i32, i32, i32, i32) {
    %c0_i32 = arith.constant 0 : i32
    %c0_i32_0 = arith.constant 0 : i32
    %c0_i32_1 = arith.constant 0 : i32
    return %arg0, %arg1, %c0_i32, %c0_i32_0 : i32, i32, i32, i32
  }
  func.func @transform_1(%arg0: i32, %arg1: i32) -> (i32, i32, i32, i32) {
    %c0_i32 = arith.constant 0 : i32
    %c0_i32_0 = arith.constant 0 : i32
    %c0_i32_1 = arith.constant 0 : i32
    %c0_i32_2 = arith.constant 0 : i32
    %c0_i32_3 = arith.constant 0 : i32
    return %c0_i32, %c0_i32_0, %c0_i32_1, %c0_i32_2 : i32, i32, i32, i32
  }
  func.func @transform_2(%arg0: i32, %arg1: i32) -> (i32, i32, i32, i32) {
    %c0_i32 = arith.constant 0 : i32
    %c0_i32_0 = arith.constant 0 : i32
    %c0_i32_1 = arith.constant 0 : i32
    %c0_i32_2 = arith.constant 0 : i32
    %c0_i32_3 = arith.constant 0 : i32
    return %c0_i32, %c0_i32_0, %c0_i32_1, %c0_i32_2 : i32, i32, i32, i32
  }
  func.func @transform_3(%arg0: i32, %arg1: i32) -> (i32, i32, i32, i32) {
    %c0_i32 = arith.constant 0 : i32
    %c0_i32_0 = arith.constant 0 : i32
    %c0_i32_1 = arith.constant 0 : i32
    return %arg0, %arg1, %c0_i32, %c0_i32_0 : i32, i32, i32, i32
  }
}

module attributes {stable_mosaic.version = 11 : i64} {
  func.func @_conv_im2col_kernel(%arg0: i32, %arg1: memref<1x4x4x8xf32, #tpu.memory_space<vmem>>, %arg2: memref<1x1x8xf32, #tpu.memory_space<vmem>>, %arg3: memref<1x1x8xf32, #tpu.memory_space<vmem>>, %arg4: memref<5x128x8xbf16, #tpu.memory_space<vmem>>, %arg5: memref<1x8xf32, #tpu.memory_space<vmem>>, %arg6: memref<1x4x4x8xf32, #tpu.memory_space<vmem>>, %arg7: memref<1x1x8xf32, #tpu.memory_space<vmem>>, %arg8: memref<1x1x8xf32, #tpu.memory_space<vmem>>, %arg9: memref<8x8x8xf32, #tpu.memory_space<vmem>>, %arg10: memref<2x16x128xbf16, #tpu.memory_space<vmem>>, %arg11: memref<16x8xf32, #tpu.memory_space<vmem>>) attributes {dimension_semantics = [#tpu.dimension_semantics<parallel>], iteration_bounds = array<i64: 2>, scalar_prefetch = 0 : i64, scratch_operands = 3 : i64, tpu.core_type = #tpu.core_type<tc>, window_params = [{transform_indices = @transform_0, window_bounds = array<i64: 1, 4, 4, 8>}, {pipeline_mode = #tpu.pipeline_mode<synchronous>, transform_indices = @transform_1, window_bounds = array<i64: 1, 1, 8>}, {pipeline_mode = #tpu.pipeline_mode<synchronous>, transform_indices = @transform_2, window_bounds = array<i64: 1, 1, 8>}, {pipeline_mode = #tpu.pipeline_mode<synchronous>, transform_indices = @transform_3, window_bounds = array<i64: 5, 128, 8>}, {pipeline_mode = #tpu.pipeline_mode<synchronous>, transform_indices = @transform_4, window_bounds = array<i64: 1, 8>}, {transform_indices = @transform_5, window_bounds = array<i64: 1, 4, 4, 8>}, {transform_indices = @transform_6, window_bounds = array<i64: 1, 1, 8>}, {transform_indices = @transform_7, window_bounds = array<i64: 1, 1, 8>}]} {
    %c0_i32 = arith.constant 0 : i32
    %0 = arith.cmpi eq, %arg0, %c0_i32 : i32
    %1 = arith.extui %0 : i1 to i32
    %c0_i32_0 = arith.constant 0 : i32
    %2 = arith.cmpi ne, %1, %c0_i32_0 : i32
    scf.if %2 {
      %cst_224 = arith.constant 0.000000e+00 : f32
      %217 = vector.broadcast %cst_224 : f32 to vector<8x8x8xf32>
      %c0_225 = arith.constant 0 : index
      %c0_226 = arith.constant 0 : index
      %c0_227 = arith.constant 0 : index
      %218 = vector.load %arg9[%c0_225, %c0_226, %c0_227] : memref<8x8x8xf32, #tpu.memory_space<vmem>>, vector<8x8x8xf32>
      tpu.vector_store %arg9[%c0_225, %c0_226, %c0_227], %217 {strides = array<i32>} : memref<8x8x8xf32, #tpu.memory_space<vmem>>, vector<8x8x8xf32>,
      %cst_228 = arith.constant 0.000000e+00 : bf16
      %219 = vector.broadcast %cst_228 : bf16 to vector<2x16x128xbf16>
      %c0_229 = arith.constant 0 : index
      %c0_230 = arith.constant 0 : index
      %c0_231 = arith.constant 0 : index
      %220 = vector.load %arg10[%c0_229, %c0_230, %c0_231] : memref<2x16x128xbf16, #tpu.memory_space<vmem>>, vector<2x16x128xbf16>
      tpu.vector_store %arg10[%c0_229, %c0_230, %c0_231], %219 {strides = array<i32>} : memref<2x16x128xbf16, #tpu.memory_space<vmem>>, vector<2x16x128xbf16>,
    } else {
    }
    %c0 = arith.constant 0 : index
    %c0_1 = arith.constant 0 : index
    %c0_2 = arith.constant 0 : index
    %c0_3 = arith.constant 0 : index
    %3 = vector.load %arg1[%c0, %c0_1, %c0_2, %c0_3] : memref<1x4x4x8xf32, #tpu.memory_space<vmem>>, vector<1x4x4x8xf32>
    %4 = vector.shape_cast %3 : vector<1x4x4x8xf32> to vector<4x4x8xf32>
    %c0_4 = arith.constant 0 : index
    %c0_5 = arith.constant 0 : index
    %c0_6 = arith.constant 0 : index
    %5 = vector.load %arg2[%c0_4, %c0_5, %c0_6] : memref<1x1x8xf32, #tpu.memory_space<vmem>>, vector<1x1x8xf32>
    %6 = vector.broadcast %5 : vector<1x1x8xf32> to vector<4x4x8xf32>
    %7 = arith.mulf %4, %6 : vector<4x4x8xf32>
    %c0_7 = arith.constant 0 : index
    %c0_8 = arith.constant 0 : index
    %c0_9 = arith.constant 0 : index
    %8 = vector.load %arg3[%c0_7, %c0_8, %c0_9] : memref<1x1x8xf32, #tpu.memory_space<vmem>>, vector<1x1x8xf32>
    %9 = vector.broadcast %8 : vector<1x1x8xf32> to vector<4x4x8xf32>
    %10 = arith.addf %7, %9 : vector<4x4x8xf32>
    %cst = arith.constant 0.000000e+00 : f32
    %11 = vector.broadcast %cst : f32 to vector<4x4x8xf32>
    %12 = arith.maximumf %10, %11 : vector<4x4x8xf32>
    %c2 = arith.constant 2 : index
    %c2_10 = arith.constant 2 : index
    %c0_11 = arith.constant 0 : index
    %13 = vector.load %arg9[%c2, %c2_10, %c0_11] : memref<8x8x8xf32, #tpu.memory_space<vmem>>, vector<4x4x8xf32>
    tpu.vector_store %arg9[%c2, %c2_10, %c0_11], %12 {strides = array<i32>} : memref<8x8x8xf32, #tpu.memory_space<vmem>>, vector<4x4x8xf32>,
    %c0_12 = arith.constant 0 : index
    %c0_13 = arith.constant 0 : index
    %c0_14 = arith.constant 0 : index
    %14 = vector.load %arg9[%c0_12, %c0_13, %c0_14] : memref<8x8x8xf32, #tpu.memory_space<vmem>>, vector<4x4x8xf32>
    %15 = vector.shape_cast %14 : vector<4x4x8xf32> to vector<16x8xf32>
    %16 = arith.truncf %15 : vector<16x8xf32> to vector<16x8xbf16>
    %c0_15 = arith.constant 0 : index
    %c0_16 = arith.constant 0 : index
    %c0_17 = arith.constant 0 : index
    %17 = vector.load %arg10[%c0_15, %c0_16, %c0_17] : memref<2x16x128xbf16, #tpu.memory_space<vmem>>, vector<1x16x8xbf16>
    %18 = vector.shape_cast %17 : vector<1x16x8xbf16> to vector<16x8xbf16>
    %19 = vector.shape_cast %16 : vector<16x8xbf16> to vector<1x16x8xbf16>
    tpu.vector_store %arg10[%c0_15, %c0_16, %c0_17], %19 {strides = array<i32>} : memref<2x16x128xbf16, #tpu.memory_space<vmem>>, vector<1x16x8xbf16>,
    %c0_18 = arith.constant 0 : index
    %c1 = arith.constant 1 : index
    %c0_19 = arith.constant 0 : index
    %20 = vector.load %arg9[%c0_18, %c1, %c0_19] : memref<8x8x8xf32, #tpu.memory_space<vmem>>, vector<4x4x8xf32>
    %21 = vector.shape_cast %20 : vector<4x4x8xf32> to vector<16x8xf32>
    %22 = arith.truncf %21 : vector<16x8xf32> to vector<16x8xbf16>
    %c0_20 = arith.constant 0 : index
    %c0_21 = arith.constant 0 : index
    %c8 = arith.constant 8 : index
    %23 = vector.load %arg10[%c0_20, %c0_21, %c8] : memref<2x16x128xbf16, #tpu.memory_space<vmem>>, vector<1x16x8xbf16>
    %24 = vector.shape_cast %23 : vector<1x16x8xbf16> to vector<16x8xbf16>
    %25 = vector.shape_cast %22 : vector<16x8xbf16> to vector<1x16x8xbf16>
    tpu.vector_store %arg10[%c0_20, %c0_21, %c8], %25 {strides = array<i32>} : memref<2x16x128xbf16, #tpu.memory_space<vmem>>, vector<1x16x8xbf16>,
    %c0_22 = arith.constant 0 : index
    %c2_23 = arith.constant 2 : index
    %c0_24 = arith.constant 0 : index
    %26 = vector.load %arg9[%c0_22, %c2_23, %c0_24] : memref<8x8x8xf32, #tpu.memory_space<vmem>>, vector<4x4x8xf32>
    %27 = vector.shape_cast %26 : vector<4x4x8xf32> to vector<16x8xf32>
    %28 = arith.truncf %27 : vector<16x8xf32> to vector<16x8xbf16>
    %c0_25 = arith.constant 0 : index
    %c0_26 = arith.constant 0 : index
    %c16 = arith.constant 16 : index
    %29 = vector.load %arg10[%c0_25, %c0_26, %c16] : memref<2x16x128xbf16, #tpu.memory_space<vmem>>, vector<1x16x8xbf16>
    %30 = vector.shape_cast %29 : vector<1x16x8xbf16> to vector<16x8xbf16>
    %31 = vector.shape_cast %28 : vector<16x8xbf16> to vector<1x16x8xbf16>
    tpu.vector_store %arg10[%c0_25, %c0_26, %c16], %31 {strides = array<i32>} : memref<2x16x128xbf16, #tpu.memory_space<vmem>>, vector<1x16x8xbf16>,
    %c0_27 = arith.constant 0 : index
    %c3 = arith.constant 3 : index
    %c0_28 = arith.constant 0 : index
    %32 = vector.load %arg9[%c0_27, %c3, %c0_28] : memref<8x8x8xf32, #tpu.memory_space<vmem>>, vector<4x4x8xf32>
    %33 = vector.shape_cast %32 : vector<4x4x8xf32> to vector<16x8xf32>
    %34 = arith.truncf %33 : vector<16x8xf32> to vector<16x8xbf16>
    %c0_29 = arith.constant 0 : index
    %c0_30 = arith.constant 0 : index
    %c24 = arith.constant 24 : index
    %35 = vector.load %arg10[%c0_29, %c0_30, %c24] : memref<2x16x128xbf16, #tpu.memory_space<vmem>>, vector<1x16x8xbf16>
    %36 = vector.shape_cast %35 : vector<1x16x8xbf16> to vector<16x8xbf16>
    %37 = vector.shape_cast %34 : vector<16x8xbf16> to vector<1x16x8xbf16>
    tpu.vector_store %arg10[%c0_29, %c0_30, %c24], %37 {strides = array<i32>} : memref<2x16x128xbf16, #tpu.memory_space<vmem>>, vector<1x16x8xbf16>,
    %c0_31 = arith.constant 0 : index
    %c4 = arith.constant 4 : index
    %c0_32 = arith.constant 0 : index
    %38 = vector.load %arg9[%c0_31, %c4, %c0_32] : memref<8x8x8xf32, #tpu.memory_space<vmem>>, vector<4x4x8xf32>
    %39 = vector.shape_cast %38 : vector<4x4x8xf32> to vector<16x8xf32>
    %40 = arith.truncf %39 : vector<16x8xf32> to vector<16x8xbf16>
    %c0_33 = arith.constant 0 : index
    %c0_34 = arith.constant 0 : index
    %c32 = arith.constant 32 : index
    %41 = vector.load %arg10[%c0_33, %c0_34, %c32] : memref<2x16x128xbf16, #tpu.memory_space<vmem>>, vector<1x16x8xbf16>
    %42 = vector.shape_cast %41 : vector<1x16x8xbf16> to vector<16x8xbf16>
    %43 = vector.shape_cast %40 : vector<16x8xbf16> to vector<1x16x8xbf16>
    tpu.vector_store %arg10[%c0_33, %c0_34, %c32], %43 {strides = array<i32>} : memref<2x16x128xbf16, #tpu.memory_space<vmem>>, vector<1x16x8xbf16>,
    %c0_35 = arith.constant 0 : index
    %c0_36 = arith.constant 0 : index
    %c0_37 = arith.constant 0 : index
    %44 = vector.load %arg10[%c0_35, %c0_36, %c0_37] : memref<2x16x128xbf16, #tpu.memory_space<vmem>>, vector<1x16x128xbf16>
    %45 = vector.shape_cast %44 : vector<1x16x128xbf16> to vector<16x128xbf16>
    %c0_38 = arith.constant 0 : index
    %c0_39 = arith.constant 0 : index
    %c0_40 = arith.constant 0 : index
    %46 = vector.load %arg4[%c0_38, %c0_39, %c0_40] : memref<5x128x8xbf16, #tpu.memory_space<vmem>>, vector<1x128x8xbf16>
    %47 = vector.shape_cast %46 : vector<1x128x8xbf16> to vector<128x8xbf16>
    %cst_41 = arith.constant dense<0.000000e+00> : vector<16x8xf32>
    %48 = tpu.matmul %45, %47, %cst_41 {dimension_numbers = #tpu.dot_dimension_numbers<[1], [0], [0], [1], [0, 0, 1, 1], [], []>} : vector<16x128xbf16>, vector<128x8xbf16>, vector<16x8xf32> -> vector<16x8xf32>
    %c0_42 = arith.constant 0 : index
    %c0_43 = arith.constant 0 : index
    %49 = vector.load %arg11[%c0_42, %c0_43] : memref<16x8xf32, #tpu.memory_space<vmem>>, vector<16x8xf32>
    tpu.vector_store %arg11[%c0_42, %c0_43], %48 {strides = array<i32>} : memref<16x8xf32, #tpu.memory_space<vmem>>, vector<16x8xf32>,
    %c1_44 = arith.constant 1 : index
    %c0_45 = arith.constant 0 : index
    %c0_46 = arith.constant 0 : index
    %50 = vector.load %arg9[%c1_44, %c0_45, %c0_46] : memref<8x8x8xf32, #tpu.memory_space<vmem>>, vector<4x4x8xf32>
    %51 = vector.shape_cast %50 : vector<4x4x8xf32> to vector<16x8xf32>
    %52 = arith.truncf %51 : vector<16x8xf32> to vector<16x8xbf16>
    %c1_47 = arith.constant 1 : index
    %c0_48 = arith.constant 0 : index
    %c0_49 = arith.constant 0 : index
    %53 = vector.load %arg10[%c1_47, %c0_48, %c0_49] : memref<2x16x128xbf16, #tpu.memory_space<vmem>>, vector<1x16x8xbf16>
    %54 = vector.shape_cast %53 : vector<1x16x8xbf16> to vector<16x8xbf16>
    %55 = vector.shape_cast %52 : vector<16x8xbf16> to vector<1x16x8xbf16>
    tpu.vector_store %arg10[%c1_47, %c0_48, %c0_49], %55 {strides = array<i32>} : memref<2x16x128xbf16, #tpu.memory_space<vmem>>, vector<1x16x8xbf16>,
    %c1_50 = arith.constant 1 : index
    %c1_51 = arith.constant 1 : index
    %c0_52 = arith.constant 0 : index
    %56 = vector.load %arg9[%c1_50, %c1_51, %c0_52] : memref<8x8x8xf32, #tpu.memory_space<vmem>>, vector<4x4x8xf32>
    %57 = vector.shape_cast %56 : vector<4x4x8xf32> to vector<16x8xf32>
    %58 = arith.truncf %57 : vector<16x8xf32> to vector<16x8xbf16>
    %c1_53 = arith.constant 1 : index
    %c0_54 = arith.constant 0 : index
    %c8_55 = arith.constant 8 : index
    %59 = vector.load %arg10[%c1_53, %c0_54, %c8_55] : memref<2x16x128xbf16, #tpu.memory_space<vmem>>, vector<1x16x8xbf16>
    %60 = vector.shape_cast %59 : vector<1x16x8xbf16> to vector<16x8xbf16>
    %61 = vector.shape_cast %58 : vector<16x8xbf16> to vector<1x16x8xbf16>
    tpu.vector_store %arg10[%c1_53, %c0_54, %c8_55], %61 {strides = array<i32>} : memref<2x16x128xbf16, #tpu.memory_space<vmem>>, vector<1x16x8xbf16>,
    %c1_56 = arith.constant 1 : index
    %c2_57 = arith.constant 2 : index
    %c0_58 = arith.constant 0 : index
    %62 = vector.load %arg9[%c1_56, %c2_57, %c0_58] : memref<8x8x8xf32, #tpu.memory_space<vmem>>, vector<4x4x8xf32>
    %63 = vector.shape_cast %62 : vector<4x4x8xf32> to vector<16x8xf32>
    %64 = arith.truncf %63 : vector<16x8xf32> to vector<16x8xbf16>
    %c1_59 = arith.constant 1 : index
    %c0_60 = arith.constant 0 : index
    %c16_61 = arith.constant 16 : index
    %65 = vector.load %arg10[%c1_59, %c0_60, %c16_61] : memref<2x16x128xbf16, #tpu.memory_space<vmem>>, vector<1x16x8xbf16>
    %66 = vector.shape_cast %65 : vector<1x16x8xbf16> to vector<16x8xbf16>
    %67 = vector.shape_cast %64 : vector<16x8xbf16> to vector<1x16x8xbf16>
    tpu.vector_store %arg10[%c1_59, %c0_60, %c16_61], %67 {strides = array<i32>} : memref<2x16x128xbf16, #tpu.memory_space<vmem>>, vector<1x16x8xbf16>,
    %c1_62 = arith.constant 1 : index
    %c3_63 = arith.constant 3 : index
    %c0_64 = arith.constant 0 : index
    %68 = vector.load %arg9[%c1_62, %c3_63, %c0_64] : memref<8x8x8xf32, #tpu.memory_space<vmem>>, vector<4x4x8xf32>
    %69 = vector.shape_cast %68 : vector<4x4x8xf32> to vector<16x8xf32>
    %70 = arith.truncf %69 : vector<16x8xf32> to vector<16x8xbf16>
    %c1_65 = arith.constant 1 : index
    %c0_66 = arith.constant 0 : index
    %c24_67 = arith.constant 24 : index
    %71 = vector.load %arg10[%c1_65, %c0_66, %c24_67] : memref<2x16x128xbf16, #tpu.memory_space<vmem>>, vector<1x16x8xbf16>
    %72 = vector.shape_cast %71 : vector<1x16x8xbf16> to vector<16x8xbf16>
    %73 = vector.shape_cast %70 : vector<16x8xbf16> to vector<1x16x8xbf16>
    tpu.vector_store %arg10[%c1_65, %c0_66, %c24_67], %73 {strides = array<i32>} : memref<2x16x128xbf16, #tpu.memory_space<vmem>>, vector<1x16x8xbf16>,
    %c1_68 = arith.constant 1 : index
    %c4_69 = arith.constant 4 : index
    %c0_70 = arith.constant 0 : index
    %74 = vector.load %arg9[%c1_68, %c4_69, %c0_70] : memref<8x8x8xf32, #tpu.memory_space<vmem>>, vector<4x4x8xf32>
    %75 = vector.shape_cast %74 : vector<4x4x8xf32> to vector<16x8xf32>
    %76 = arith.truncf %75 : vector<16x8xf32> to vector<16x8xbf16>
    %c1_71 = arith.constant 1 : index
    %c0_72 = arith.constant 0 : index
    %c32_73 = arith.constant 32 : index
    %77 = vector.load %arg10[%c1_71, %c0_72, %c32_73] : memref<2x16x128xbf16, #tpu.memory_space<vmem>>, vector<1x16x8xbf16>
    %78 = vector.shape_cast %77 : vector<1x16x8xbf16> to vector<16x8xbf16>
    %79 = vector.shape_cast %76 : vector<16x8xbf16> to vector<1x16x8xbf16>
    tpu.vector_store %arg10[%c1_71, %c0_72, %c32_73], %79 {strides = array<i32>} : memref<2x16x128xbf16, #tpu.memory_space<vmem>>, vector<1x16x8xbf16>,
    %c1_74 = arith.constant 1 : index
    %c0_75 = arith.constant 0 : index
    %c0_76 = arith.constant 0 : index
    %80 = vector.load %arg10[%c1_74, %c0_75, %c0_76] : memref<2x16x128xbf16, #tpu.memory_space<vmem>>, vector<1x16x128xbf16>
    %81 = vector.shape_cast %80 : vector<1x16x128xbf16> to vector<16x128xbf16>
    %c1_77 = arith.constant 1 : index
    %c0_78 = arith.constant 0 : index
    %c0_79 = arith.constant 0 : index
    %82 = vector.load %arg4[%c1_77, %c0_78, %c0_79] : memref<5x128x8xbf16, #tpu.memory_space<vmem>>, vector<1x128x8xbf16>
    %83 = vector.shape_cast %82 : vector<1x128x8xbf16> to vector<128x8xbf16>
    %cst_80 = arith.constant dense<0.000000e+00> : vector<16x8xf32>
    %84 = tpu.matmul %81, %83, %cst_80 {dimension_numbers = #tpu.dot_dimension_numbers<[1], [0], [0], [1], [0, 0, 1, 1], [], []>} : vector<16x128xbf16>, vector<128x8xbf16>, vector<16x8xf32> -> vector<16x8xf32>
    %c0_81 = arith.constant 0 : index
    %c0_82 = arith.constant 0 : index
    %85 = vector.load %arg11[%c0_81, %c0_82] : memref<16x8xf32, #tpu.memory_space<vmem>>, vector<16x8xf32>
    %86 = arith.addf %85, %84 : vector<16x8xf32>
    %c0_83 = arith.constant 0 : index
    %c0_84 = arith.constant 0 : index
    %87 = vector.load %arg11[%c0_83, %c0_84] : memref<16x8xf32, #tpu.memory_space<vmem>>, vector<16x8xf32>
    tpu.vector_store %arg11[%c0_83, %c0_84], %86 {strides = array<i32>} : memref<16x8xf32, #tpu.memory_space<vmem>>, vector<16x8xf32>,
    %c2_85 = arith.constant 2 : index
    %c0_86 = arith.constant 0 : index
    %c0_87 = arith.constant 0 : index
    %88 = vector.load %arg9[%c2_85, %c0_86, %c0_87] : memref<8x8x8xf32, #tpu.memory_space<vmem>>, vector<4x4x8xf32>
    %89 = vector.shape_cast %88 : vector<4x4x8xf32> to vector<16x8xf32>
    %90 = arith.truncf %89 : vector<16x8xf32> to vector<16x8xbf16>
    %c0_88 = arith.constant 0 : index
    %c0_89 = arith.constant 0 : index
    %c0_90 = arith.constant 0 : index
    %91 = vector.load %arg10[%c0_88, %c0_89, %c0_90] : memref<2x16x128xbf16, #tpu.memory_space<vmem>>, vector<1x16x8xbf16>
    %92 = vector.shape_cast %91 : vector<1x16x8xbf16> to vector<16x8xbf16>
    %93 = vector.shape_cast %90 : vector<16x8xbf16> to vector<1x16x8xbf16>
    tpu.vector_store %arg10[%c0_88, %c0_89, %c0_90], %93 {strides = array<i32>} : memref<2x16x128xbf16, #tpu.memory_space<vmem>>, vector<1x16x8xbf16>,
    %c2_91 = arith.constant 2 : index
    %c1_92 = arith.constant 1 : index
    %c0_93 = arith.constant 0 : index
    %94 = vector.load %arg9[%c2_91, %c1_92, %c0_93] : memref<8x8x8xf32, #tpu.memory_space<vmem>>, vector<4x4x8xf32>
    %95 = vector.shape_cast %94 : vector<4x4x8xf32> to vector<16x8xf32>
    %96 = arith.truncf %95 : vector<16x8xf32> to vector<16x8xbf16>
    %c0_94 = arith.constant 0 : index
    %c0_95 = arith.constant 0 : index
    %c8_96 = arith.constant 8 : index
    %97 = vector.load %arg10[%c0_94, %c0_95, %c8_96] : memref<2x16x128xbf16, #tpu.memory_space<vmem>>, vector<1x16x8xbf16>
    %98 = vector.shape_cast %97 : vector<1x16x8xbf16> to vector<16x8xbf16>
    %99 = vector.shape_cast %96 : vector<16x8xbf16> to vector<1x16x8xbf16>
    tpu.vector_store %arg10[%c0_94, %c0_95, %c8_96], %99 {strides = array<i32>} : memref<2x16x128xbf16, #tpu.memory_space<vmem>>, vector<1x16x8xbf16>,
    %c2_97 = arith.constant 2 : index
    %c2_98 = arith.constant 2 : index
    %c0_99 = arith.constant 0 : index
    %100 = vector.load %arg9[%c2_97, %c2_98, %c0_99] : memref<8x8x8xf32, #tpu.memory_space<vmem>>, vector<4x4x8xf32>
    %101 = vector.shape_cast %100 : vector<4x4x8xf32> to vector<16x8xf32>
    %102 = arith.truncf %101 : vector<16x8xf32> to vector<16x8xbf16>
    %c0_100 = arith.constant 0 : index
    %c0_101 = arith.constant 0 : index
    %c16_102 = arith.constant 16 : index
    %103 = vector.load %arg10[%c0_100, %c0_101, %c16_102] : memref<2x16x128xbf16, #tpu.memory_space<vmem>>, vector<1x16x8xbf16>
    %104 = vector.shape_cast %103 : vector<1x16x8xbf16> to vector<16x8xbf16>
    %105 = vector.shape_cast %102 : vector<16x8xbf16> to vector<1x16x8xbf16>
    tpu.vector_store %arg10[%c0_100, %c0_101, %c16_102], %105 {strides = array<i32>} : memref<2x16x128xbf16, #tpu.memory_space<vmem>>, vector<1x16x8xbf16>,
    %c2_103 = arith.constant 2 : index
    %c3_104 = arith.constant 3 : index
    %c0_105 = arith.constant 0 : index
    %106 = vector.load %arg9[%c2_103, %c3_104, %c0_105] : memref<8x8x8xf32, #tpu.memory_space<vmem>>, vector<4x4x8xf32>
    %107 = vector.shape_cast %106 : vector<4x4x8xf32> to vector<16x8xf32>
    %108 = arith.truncf %107 : vector<16x8xf32> to vector<16x8xbf16>
    %c0_106 = arith.constant 0 : index
    %c0_107 = arith.constant 0 : index
    %c24_108 = arith.constant 24 : index
    %109 = vector.load %arg10[%c0_106, %c0_107, %c24_108] : memref<2x16x128xbf16, #tpu.memory_space<vmem>>, vector<1x16x8xbf16>
    %110 = vector.shape_cast %109 : vector<1x16x8xbf16> to vector<16x8xbf16>
    %111 = vector.shape_cast %108 : vector<16x8xbf16> to vector<1x16x8xbf16>
    tpu.vector_store %arg10[%c0_106, %c0_107, %c24_108], %111 {strides = array<i32>} : memref<2x16x128xbf16, #tpu.memory_space<vmem>>, vector<1x16x8xbf16>,
    %c2_109 = arith.constant 2 : index
    %c4_110 = arith.constant 4 : index
    %c0_111 = arith.constant 0 : index
    %112 = vector.load %arg9[%c2_109, %c4_110, %c0_111] : memref<8x8x8xf32, #tpu.memory_space<vmem>>, vector<4x4x8xf32>
    %113 = vector.shape_cast %112 : vector<4x4x8xf32> to vector<16x8xf32>
    %114 = arith.truncf %113 : vector<16x8xf32> to vector<16x8xbf16>
    %c0_112 = arith.constant 0 : index
    %c0_113 = arith.constant 0 : index
    %c32_114 = arith.constant 32 : index
    %115 = vector.load %arg10[%c0_112, %c0_113, %c32_114] : memref<2x16x128xbf16, #tpu.memory_space<vmem>>, vector<1x16x8xbf16>
    %116 = vector.shape_cast %115 : vector<1x16x8xbf16> to vector<16x8xbf16>
    %117 = vector.shape_cast %114 : vector<16x8xbf16> to vector<1x16x8xbf16>
    tpu.vector_store %arg10[%c0_112, %c0_113, %c32_114], %117 {strides = array<i32>} : memref<2x16x128xbf16, #tpu.memory_space<vmem>>, vector<1x16x8xbf16>,
    %c0_115 = arith.constant 0 : index
    %c0_116 = arith.constant 0 : index
    %c0_117 = arith.constant 0 : index
    %118 = vector.load %arg10[%c0_115, %c0_116, %c0_117] : memref<2x16x128xbf16, #tpu.memory_space<vmem>>, vector<1x16x128xbf16>
    %119 = vector.shape_cast %118 : vector<1x16x128xbf16> to vector<16x128xbf16>
    %c2_118 = arith.constant 2 : index
    %c0_119 = arith.constant 0 : index
    %c0_120 = arith.constant 0 : index
    %120 = vector.load %arg4[%c2_118, %c0_119, %c0_120] : memref<5x128x8xbf16, #tpu.memory_space<vmem>>, vector<1x128x8xbf16>
    %121 = vector.shape_cast %120 : vector<1x128x8xbf16> to vector<128x8xbf16>
    %cst_121 = arith.constant dense<0.000000e+00> : vector<16x8xf32>
    %122 = tpu.matmul %119, %121, %cst_121 {dimension_numbers = #tpu.dot_dimension_numbers<[1], [0], [0], [1], [0, 0, 1, 1], [], []>} : vector<16x128xbf16>, vector<128x8xbf16>, vector<16x8xf32> -> vector<16x8xf32>
    %c0_122 = arith.constant 0 : index
    %c0_123 = arith.constant 0 : index
    %123 = vector.load %arg11[%c0_122, %c0_123] : memref<16x8xf32, #tpu.memory_space<vmem>>, vector<16x8xf32>
    %124 = arith.addf %123, %122 : vector<16x8xf32>
    %c0_124 = arith.constant 0 : index
    %c0_125 = arith.constant 0 : index
    %125 = vector.load %arg11[%c0_124, %c0_125] : memref<16x8xf32, #tpu.memory_space<vmem>>, vector<16x8xf32>
    tpu.vector_store %arg11[%c0_124, %c0_125], %124 {strides = array<i32>} : memref<16x8xf32, #tpu.memory_space<vmem>>, vector<16x8xf32>,
    %c3_126 = arith.constant 3 : index
    %c0_127 = arith.constant 0 : index
    %c0_128 = arith.constant 0 : index
    %126 = vector.load %arg9[%c3_126, %c0_127, %c0_128] : memref<8x8x8xf32, #tpu.memory_space<vmem>>, vector<4x4x8xf32>
    %127 = vector.shape_cast %126 : vector<4x4x8xf32> to vector<16x8xf32>
    %128 = arith.truncf %127 : vector<16x8xf32> to vector<16x8xbf16>
    %c1_129 = arith.constant 1 : index
    %c0_130 = arith.constant 0 : index
    %c0_131 = arith.constant 0 : index
    %129 = vector.load %arg10[%c1_129, %c0_130, %c0_131] : memref<2x16x128xbf16, #tpu.memory_space<vmem>>, vector<1x16x8xbf16>
    %130 = vector.shape_cast %129 : vector<1x16x8xbf16> to vector<16x8xbf16>
    %131 = vector.shape_cast %128 : vector<16x8xbf16> to vector<1x16x8xbf16>
    tpu.vector_store %arg10[%c1_129, %c0_130, %c0_131], %131 {strides = array<i32>} : memref<2x16x128xbf16, #tpu.memory_space<vmem>>, vector<1x16x8xbf16>,
    %c3_132 = arith.constant 3 : index
    %c1_133 = arith.constant 1 : index
    %c0_134 = arith.constant 0 : index
    %132 = vector.load %arg9[%c3_132, %c1_133, %c0_134] : memref<8x8x8xf32, #tpu.memory_space<vmem>>, vector<4x4x8xf32>
    %133 = vector.shape_cast %132 : vector<4x4x8xf32> to vector<16x8xf32>
    %134 = arith.truncf %133 : vector<16x8xf32> to vector<16x8xbf16>
    %c1_135 = arith.constant 1 : index
    %c0_136 = arith.constant 0 : index
    %c8_137 = arith.constant 8 : index
    %135 = vector.load %arg10[%c1_135, %c0_136, %c8_137] : memref<2x16x128xbf16, #tpu.memory_space<vmem>>, vector<1x16x8xbf16>
    %136 = vector.shape_cast %135 : vector<1x16x8xbf16> to vector<16x8xbf16>
    %137 = vector.shape_cast %134 : vector<16x8xbf16> to vector<1x16x8xbf16>
    tpu.vector_store %arg10[%c1_135, %c0_136, %c8_137], %137 {strides = array<i32>} : memref<2x16x128xbf16, #tpu.memory_space<vmem>>, vector<1x16x8xbf16>,
    %c3_138 = arith.constant 3 : index
    %c2_139 = arith.constant 2 : index
    %c0_140 = arith.constant 0 : index
    %138 = vector.load %arg9[%c3_138, %c2_139, %c0_140] : memref<8x8x8xf32, #tpu.memory_space<vmem>>, vector<4x4x8xf32>
    %139 = vector.shape_cast %138 : vector<4x4x8xf32> to vector<16x8xf32>
    %140 = arith.truncf %139 : vector<16x8xf32> to vector<16x8xbf16>
    %c1_141 = arith.constant 1 : index
    %c0_142 = arith.constant 0 : index
    %c16_143 = arith.constant 16 : index
    %141 = vector.load %arg10[%c1_141, %c0_142, %c16_143] : memref<2x16x128xbf16, #tpu.memory_space<vmem>>, vector<1x16x8xbf16>
    %142 = vector.shape_cast %141 : vector<1x16x8xbf16> to vector<16x8xbf16>
    %143 = vector.shape_cast %140 : vector<16x8xbf16> to vector<1x16x8xbf16>
    tpu.vector_store %arg10[%c1_141, %c0_142, %c16_143], %143 {strides = array<i32>} : memref<2x16x128xbf16, #tpu.memory_space<vmem>>, vector<1x16x8xbf16>,
    %c3_144 = arith.constant 3 : index
    %c3_145 = arith.constant 3 : index
    %c0_146 = arith.constant 0 : index
    %144 = vector.load %arg9[%c3_144, %c3_145, %c0_146] : memref<8x8x8xf32, #tpu.memory_space<vmem>>, vector<4x4x8xf32>
    %145 = vector.shape_cast %144 : vector<4x4x8xf32> to vector<16x8xf32>
    %146 = arith.truncf %145 : vector<16x8xf32> to vector<16x8xbf16>
    %c1_147 = arith.constant 1 : index
    %c0_148 = arith.constant 0 : index
    %c24_149 = arith.constant 24 : index
    %147 = vector.load %arg10[%c1_147, %c0_148, %c24_149] : memref<2x16x128xbf16, #tpu.memory_space<vmem>>, vector<1x16x8xbf16>
    %148 = vector.shape_cast %147 : vector<1x16x8xbf16> to vector<16x8xbf16>
    %149 = vector.shape_cast %146 : vector<16x8xbf16> to vector<1x16x8xbf16>
    tpu.vector_store %arg10[%c1_147, %c0_148, %c24_149], %149 {strides = array<i32>} : memref<2x16x128xbf16, #tpu.memory_space<vmem>>, vector<1x16x8xbf16>,
    %c3_150 = arith.constant 3 : index
    %c4_151 = arith.constant 4 : index
    %c0_152 = arith.constant 0 : index
    %150 = vector.load %arg9[%c3_150, %c4_151, %c0_152] : memref<8x8x8xf32, #tpu.memory_space<vmem>>, vector<4x4x8xf32>
    %151 = vector.shape_cast %150 : vector<4x4x8xf32> to vector<16x8xf32>
    %152 = arith.truncf %151 : vector<16x8xf32> to vector<16x8xbf16>
    %c1_153 = arith.constant 1 : index
    %c0_154 = arith.constant 0 : index
    %c32_155 = arith.constant 32 : index
    %153 = vector.load %arg10[%c1_153, %c0_154, %c32_155] : memref<2x16x128xbf16, #tpu.memory_space<vmem>>, vector<1x16x8xbf16>
    %154 = vector.shape_cast %153 : vector<1x16x8xbf16> to vector<16x8xbf16>
    %155 = vector.shape_cast %152 : vector<16x8xbf16> to vector<1x16x8xbf16>
    tpu.vector_store %arg10[%c1_153, %c0_154, %c32_155], %155 {strides = array<i32>} : memref<2x16x128xbf16, #tpu.memory_space<vmem>>, vector<1x16x8xbf16>,
    %c1_156 = arith.constant 1 : index
    %c0_157 = arith.constant 0 : index
    %c0_158 = arith.constant 0 : index
    %156 = vector.load %arg10[%c1_156, %c0_157, %c0_158] : memref<2x16x128xbf16, #tpu.memory_space<vmem>>, vector<1x16x128xbf16>
    %157 = vector.shape_cast %156 : vector<1x16x128xbf16> to vector<16x128xbf16>
    %c3_159 = arith.constant 3 : index
    %c0_160 = arith.constant 0 : index
    %c0_161 = arith.constant 0 : index
    %158 = vector.load %arg4[%c3_159, %c0_160, %c0_161] : memref<5x128x8xbf16, #tpu.memory_space<vmem>>, vector<1x128x8xbf16>
    %159 = vector.shape_cast %158 : vector<1x128x8xbf16> to vector<128x8xbf16>
    %cst_162 = arith.constant dense<0.000000e+00> : vector<16x8xf32>
    %160 = tpu.matmul %157, %159, %cst_162 {dimension_numbers = #tpu.dot_dimension_numbers<[1], [0], [0], [1], [0, 0, 1, 1], [], []>} : vector<16x128xbf16>, vector<128x8xbf16>, vector<16x8xf32> -> vector<16x8xf32>
    %c0_163 = arith.constant 0 : index
    %c0_164 = arith.constant 0 : index
    %161 = vector.load %arg11[%c0_163, %c0_164] : memref<16x8xf32, #tpu.memory_space<vmem>>, vector<16x8xf32>
    %162 = arith.addf %161, %160 : vector<16x8xf32>
    %c0_165 = arith.constant 0 : index
    %c0_166 = arith.constant 0 : index
    %163 = vector.load %arg11[%c0_165, %c0_166] : memref<16x8xf32, #tpu.memory_space<vmem>>, vector<16x8xf32>
    tpu.vector_store %arg11[%c0_165, %c0_166], %162 {strides = array<i32>} : memref<16x8xf32, #tpu.memory_space<vmem>>, vector<16x8xf32>,
    %c4_167 = arith.constant 4 : index
    %c0_168 = arith.constant 0 : index
    %c0_169 = arith.constant 0 : index
    %164 = vector.load %arg9[%c4_167, %c0_168, %c0_169] : memref<8x8x8xf32, #tpu.memory_space<vmem>>, vector<4x4x8xf32>
    %165 = vector.shape_cast %164 : vector<4x4x8xf32> to vector<16x8xf32>
    %166 = arith.truncf %165 : vector<16x8xf32> to vector<16x8xbf16>
    %c0_170 = arith.constant 0 : index
    %c0_171 = arith.constant 0 : index
    %c0_172 = arith.constant 0 : index
    %167 = vector.load %arg10[%c0_170, %c0_171, %c0_172] : memref<2x16x128xbf16, #tpu.memory_space<vmem>>, vector<1x16x8xbf16>
    %168 = vector.shape_cast %167 : vector<1x16x8xbf16> to vector<16x8xbf16>
    %169 = vector.shape_cast %166 : vector<16x8xbf16> to vector<1x16x8xbf16>
    tpu.vector_store %arg10[%c0_170, %c0_171, %c0_172], %169 {strides = array<i32>} : memref<2x16x128xbf16, #tpu.memory_space<vmem>>, vector<1x16x8xbf16>,
    %c4_173 = arith.constant 4 : index
    %c1_174 = arith.constant 1 : index
    %c0_175 = arith.constant 0 : index
    %170 = vector.load %arg9[%c4_173, %c1_174, %c0_175] : memref<8x8x8xf32, #tpu.memory_space<vmem>>, vector<4x4x8xf32>
    %171 = vector.shape_cast %170 : vector<4x4x8xf32> to vector<16x8xf32>
    %172 = arith.truncf %171 : vector<16x8xf32> to vector<16x8xbf16>
    %c0_176 = arith.constant 0 : index
    %c0_177 = arith.constant 0 : index
    %c8_178 = arith.constant 8 : index
    %173 = vector.load %arg10[%c0_176, %c0_177, %c8_178] : memref<2x16x128xbf16, #tpu.memory_space<vmem>>, vector<1x16x8xbf16>
    %174 = vector.shape_cast %173 : vector<1x16x8xbf16> to vector<16x8xbf16>
    %175 = vector.shape_cast %172 : vector<16x8xbf16> to vector<1x16x8xbf16>
    tpu.vector_store %arg10[%c0_176, %c0_177, %c8_178], %175 {strides = array<i32>} : memref<2x16x128xbf16, #tpu.memory_space<vmem>>, vector<1x16x8xbf16>,
    %c4_179 = arith.constant 4 : index
    %c2_180 = arith.constant 2 : index
    %c0_181 = arith.constant 0 : index
    %176 = vector.load %arg9[%c4_179, %c2_180, %c0_181] : memref<8x8x8xf32, #tpu.memory_space<vmem>>, vector<4x4x8xf32>
    %177 = vector.shape_cast %176 : vector<4x4x8xf32> to vector<16x8xf32>
    %178 = arith.truncf %177 : vector<16x8xf32> to vector<16x8xbf16>
    %c0_182 = arith.constant 0 : index
    %c0_183 = arith.constant 0 : index
    %c16_184 = arith.constant 16 : index
    %179 = vector.load %arg10[%c0_182, %c0_183, %c16_184] : memref<2x16x128xbf16, #tpu.memory_space<vmem>>, vector<1x16x8xbf16>
    %180 = vector.shape_cast %179 : vector<1x16x8xbf16> to vector<16x8xbf16>
    %181 = vector.shape_cast %178 : vector<16x8xbf16> to vector<1x16x8xbf16>
    tpu.vector_store %arg10[%c0_182, %c0_183, %c16_184], %181 {strides = array<i32>} : memref<2x16x128xbf16, #tpu.memory_space<vmem>>, vector<1x16x8xbf16>,
    %c4_185 = arith.constant 4 : index
    %c3_186 = arith.constant 3 : index
    %c0_187 = arith.constant 0 : index
    %182 = vector.load %arg9[%c4_185, %c3_186, %c0_187] : memref<8x8x8xf32, #tpu.memory_space<vmem>>, vector<4x4x8xf32>
    %183 = vector.shape_cast %182 : vector<4x4x8xf32> to vector<16x8xf32>
    %184 = arith.truncf %183 : vector<16x8xf32> to vector<16x8xbf16>
    %c0_188 = arith.constant 0 : index
    %c0_189 = arith.constant 0 : index
    %c24_190 = arith.constant 24 : index
    %185 = vector.load %arg10[%c0_188, %c0_189, %c24_190] : memref<2x16x128xbf16, #tpu.memory_space<vmem>>, vector<1x16x8xbf16>
    %186 = vector.shape_cast %185 : vector<1x16x8xbf16> to vector<16x8xbf16>
    %187 = vector.shape_cast %184 : vector<16x8xbf16> to vector<1x16x8xbf16>
    tpu.vector_store %arg10[%c0_188, %c0_189, %c24_190], %187 {strides = array<i32>} : memref<2x16x128xbf16, #tpu.memory_space<vmem>>, vector<1x16x8xbf16>,
    %c4_191 = arith.constant 4 : index
    %c4_192 = arith.constant 4 : index
    %c0_193 = arith.constant 0 : index
    %188 = vector.load %arg9[%c4_191, %c4_192, %c0_193] : memref<8x8x8xf32, #tpu.memory_space<vmem>>, vector<4x4x8xf32>
    %189 = vector.shape_cast %188 : vector<4x4x8xf32> to vector<16x8xf32>
    %190 = arith.truncf %189 : vector<16x8xf32> to vector<16x8xbf16>
    %c0_194 = arith.constant 0 : index
    %c0_195 = arith.constant 0 : index
    %c32_196 = arith.constant 32 : index
    %191 = vector.load %arg10[%c0_194, %c0_195, %c32_196] : memref<2x16x128xbf16, #tpu.memory_space<vmem>>, vector<1x16x8xbf16>
    %192 = vector.shape_cast %191 : vector<1x16x8xbf16> to vector<16x8xbf16>
    %193 = vector.shape_cast %190 : vector<16x8xbf16> to vector<1x16x8xbf16>
    tpu.vector_store %arg10[%c0_194, %c0_195, %c32_196], %193 {strides = array<i32>} : memref<2x16x128xbf16, #tpu.memory_space<vmem>>, vector<1x16x8xbf16>,
    %c0_197 = arith.constant 0 : index
    %c0_198 = arith.constant 0 : index
    %c0_199 = arith.constant 0 : index
    %194 = vector.load %arg10[%c0_197, %c0_198, %c0_199] : memref<2x16x128xbf16, #tpu.memory_space<vmem>>, vector<1x16x128xbf16>
    %195 = vector.shape_cast %194 : vector<1x16x128xbf16> to vector<16x128xbf16>
    %c4_200 = arith.constant 4 : index
    %c0_201 = arith.constant 0 : index
    %c0_202 = arith.constant 0 : index
    %196 = vector.load %arg4[%c4_200, %c0_201, %c0_202] : memref<5x128x8xbf16, #tpu.memory_space<vmem>>, vector<1x128x8xbf16>
    %197 = vector.shape_cast %196 : vector<1x128x8xbf16> to vector<128x8xbf16>
    %cst_203 = arith.constant dense<0.000000e+00> : vector<16x8xf32>
    %198 = tpu.matmul %195, %197, %cst_203 {dimension_numbers = #tpu.dot_dimension_numbers<[1], [0], [0], [1], [0, 0, 1, 1], [], []>} : vector<16x128xbf16>, vector<128x8xbf16>, vector<16x8xf32> -> vector<16x8xf32>
    %c0_204 = arith.constant 0 : index
    %c0_205 = arith.constant 0 : index
    %199 = vector.load %arg11[%c0_204, %c0_205] : memref<16x8xf32, #tpu.memory_space<vmem>>, vector<16x8xf32>
    %200 = arith.addf %199, %198 : vector<16x8xf32>
    %c0_206 = arith.constant 0 : index
    %c0_207 = arith.constant 0 : index
    %201 = vector.load %arg11[%c0_206, %c0_207] : memref<16x8xf32, #tpu.memory_space<vmem>>, vector<16x8xf32>
    tpu.vector_store %arg11[%c0_206, %c0_207], %200 {strides = array<i32>} : memref<16x8xf32, #tpu.memory_space<vmem>>, vector<16x8xf32>,
    %c0_208 = arith.constant 0 : index
    %c0_209 = arith.constant 0 : index
    %202 = vector.load %arg11[%c0_208, %c0_209] : memref<16x8xf32, #tpu.memory_space<vmem>>, vector<16x8xf32>
    %c0_210 = arith.constant 0 : index
    %c0_211 = arith.constant 0 : index
    %203 = vector.load %arg5[%c0_210, %c0_211] : memref<1x8xf32, #tpu.memory_space<vmem>>, vector<1x8xf32>
    %204 = vector.broadcast %203 : vector<1x8xf32> to vector<16x8xf32>
    %205 = arith.addf %202, %204 : vector<16x8xf32>
    %206 = vector.shape_cast %205 : vector<16x8xf32> to vector<1x4x4x8xf32>
    %c0_212 = arith.constant 0 : index
    %c0_213 = arith.constant 0 : index
    %c0_214 = arith.constant 0 : index
    %c0_215 = arith.constant 0 : index
    %207 = vector.load %arg6[%c0_212, %c0_213, %c0_214, %c0_215] : memref<1x4x4x8xf32, #tpu.memory_space<vmem>>, vector<1x4x4x8xf32>
    tpu.vector_store %arg6[%c0_212, %c0_213, %c0_214, %c0_215], %206 {strides = array<i32>} : memref<1x4x4x8xf32, #tpu.memory_space<vmem>>, vector<1x4x4x8xf32>,
    %cst_216 = arith.constant dense<0.000000e+00> : vector<8xf32>
    %208 = vector.multi_reduction <add>, %205, %cst_216 [0] : vector<16x8xf32> to vector<8xf32>
    %209 = vector.shape_cast %208 : vector<8xf32> to vector<1x8xf32>
    %210 = vector.shape_cast %209 : vector<1x8xf32> to vector<1x1x8xf32>
    %c0_217 = arith.constant 0 : index
    %c0_218 = arith.constant 0 : index
    %c0_219 = arith.constant 0 : index
    %211 = vector.load %arg7[%c0_217, %c0_218, %c0_219] : memref<1x1x8xf32, #tpu.memory_space<vmem>>, vector<1x1x8xf32>
    tpu.vector_store %arg7[%c0_217, %c0_218, %c0_219], %210 {strides = array<i32>} : memref<1x1x8xf32, #tpu.memory_space<vmem>>, vector<1x1x8xf32>,
    %212 = arith.mulf %205, %205 : vector<16x8xf32>
    %cst_220 = arith.constant dense<0.000000e+00> : vector<8xf32>
    %213 = vector.multi_reduction <add>, %212, %cst_220 [0] : vector<16x8xf32> to vector<8xf32>
    %214 = vector.shape_cast %213 : vector<8xf32> to vector<1x8xf32>
    %215 = vector.shape_cast %214 : vector<1x8xf32> to vector<1x1x8xf32>
    %c0_221 = arith.constant 0 : index
    %c0_222 = arith.constant 0 : index
    %c0_223 = arith.constant 0 : index
    %216 = vector.load %arg8[%c0_221, %c0_222, %c0_223] : memref<1x1x8xf32, #tpu.memory_space<vmem>>, vector<1x1x8xf32>
    tpu.vector_store %arg8[%c0_221, %c0_222, %c0_223], %215 {strides = array<i32>} : memref<1x1x8xf32, #tpu.memory_space<vmem>>, vector<1x1x8xf32>,
    return
  }
  func.func @transform_0(%arg0: i32) -> (i32, i32, i32, i32) {
    %c0_i32 = arith.constant 0 : i32
    %c0_i32_0 = arith.constant 0 : i32
    %c0_i32_1 = arith.constant 0 : i32
    %c0_i32_2 = arith.constant 0 : i32
    return %arg0, %c0_i32, %c0_i32_0, %c0_i32_1 : i32, i32, i32, i32
  }
  func.func @transform_1(%arg0: i32) -> (i32, i32, i32) {
    %c0_i32 = arith.constant 0 : i32
    %c0_i32_0 = arith.constant 0 : i32
    %c0_i32_1 = arith.constant 0 : i32
    %c0_i32_2 = arith.constant 0 : i32
    return %c0_i32, %c0_i32_0, %c0_i32_1 : i32, i32, i32
  }
  func.func @transform_2(%arg0: i32) -> (i32, i32, i32) {
    %c0_i32 = arith.constant 0 : i32
    %c0_i32_0 = arith.constant 0 : i32
    %c0_i32_1 = arith.constant 0 : i32
    %c0_i32_2 = arith.constant 0 : i32
    return %c0_i32, %c0_i32_0, %c0_i32_1 : i32, i32, i32
  }
  func.func @transform_3(%arg0: i32) -> (i32, i32, i32) {
    %c0_i32 = arith.constant 0 : i32
    %c0_i32_0 = arith.constant 0 : i32
    %c0_i32_1 = arith.constant 0 : i32
    %c0_i32_2 = arith.constant 0 : i32
    return %c0_i32, %c0_i32_0, %c0_i32_1 : i32, i32, i32
  }
  func.func @transform_4(%arg0: i32) -> (i32, i32) {
    %c0_i32 = arith.constant 0 : i32
    %c0_i32_0 = arith.constant 0 : i32
    %c0_i32_1 = arith.constant 0 : i32
    return %c0_i32, %c0_i32_0 : i32, i32
  }
  func.func @transform_5(%arg0: i32) -> (i32, i32, i32, i32) {
    %c0_i32 = arith.constant 0 : i32
    %c0_i32_0 = arith.constant 0 : i32
    %c0_i32_1 = arith.constant 0 : i32
    %c0_i32_2 = arith.constant 0 : i32
    return %arg0, %c0_i32, %c0_i32_0, %c0_i32_1 : i32, i32, i32, i32
  }
  func.func @transform_6(%arg0: i32) -> (i32, i32, i32) {
    %c0_i32 = arith.constant 0 : i32
    %c0_i32_0 = arith.constant 0 : i32
    %c0_i32_1 = arith.constant 0 : i32
    return %arg0, %c0_i32, %c0_i32_0 : i32, i32, i32
  }
  func.func @transform_7(%arg0: i32) -> (i32, i32, i32) {
    %c0_i32 = arith.constant 0 : i32
    %c0_i32_0 = arith.constant 0 : i32
    %c0_i32_1 = arith.constant 0 : i32
    return %arg0, %c0_i32, %c0_i32_0 : i32, i32, i32
  }
}

</mosaic_0001>

<bundles_post_ra>
// kernel: tile.13
= control target key start
LH: loop header
LB: loop body
LE: loop exit
PB: predicated region body
PF: predicated region fallthrough
CT: control target
= control target key end

     0   :  { %s22_s0 = inlined_call_operand.vmem [shape: f32[8], index: 0, kind: input, shape index: {}]   ;;  %s23_s1 = inlined_call_operand.vmem [shape: f32[4,8], index: 1, kind: output, shape index: {}]  }
   0x1   :  { %v4_v0 = vld [vmem:[%s22_s0] ss:$0 sm:$0xff] }
   0x2   :  { %5 = vst [vmem:[%s23_s1] sm:$0xf] %v4_v0 }

// kernel: tile.14
= control target key start
LH: loop header
LB: loop body
LE: loop exit
PB: predicated region body
PF: predicated region fallthrough
CT: control target
= control target key end

     0   :  { %vm7_vm0 = vcmask 64512   ;;  %s37_s8 = smov 8   ;;  %s38_s9 = smov 16   ;;  %vm13_vm1 = vcmask 261312   ;;  %vm19_vm2 = vcmask 195712   ;;  %vm25_vm3 = vcmask 130112   ;;  %s55_s0 = inlined_call_operand.vmem [shape: f32[4,8], index: 0, kind: input, shape index: {}]   ;;  %s56_s1 = inlined_call_operand.vmem [shape: f32[1,1,32], index: 1, kind: output, shape index: {}]  }
   0x1   :  { %v4_v0 = vld [vmem:[%s55_s0] sm:$0xf]  ;;  %s36_s0 = smov 24  }
   0x2   :  { %5 = vst [vmem:[#allocation1] sm:$0xf] %v4_v0 }
   0x9   :  { %v10_v1 = vld [vmem:[#allocation1 + $0x3] sm:$0x1]   ;;  %v22_v2 = vld [vmem:[#allocation1 + $0x1] sm:$0x1]   ;;  %v6_v3 = vld [vmem:[#allocation1] sm:$0x1]  }
   0xa   :  { %11 = vrot.lane.b32.xlu0 %v10_v1, %s36_s0  ;;  %23 = vrot.lane.b32.xlu1 %v22_v2, %s37_s8  ;;  %v16_v4 = vld [vmem:[#allocation1 + $0x2] sm:$0x1]   ;;  %8 = vst.msk [vmem:[#allocation0] sm:$0x1] %vm7_vm0, %v6_v3  }
   0xe   :  { %17 = vrot.lane.b32.xlu0 %v16_v4, %s38_s9 }
  0x7c   :  { %v12_v5 = vpop.permute.xlu0 %11   ;;  %v24_v6 = vpop.permute.xlu1 %23  }
  0x7d   :  { %14 = vst.msk [vmem:[#allocation0] sm:$0x1] %vm13_vm1, %v12_v5  }
  0x80   :  { %v18_v7 = vpop.permute.xlu0 %17  }
  0x81   :  { %20 = vst.msk [vmem:[#allocation0] sm:$0x1] %vm19_vm2, %v18_v7  }
  0x82   :  { %26 = vst.msk [vmem:[#allocation0] sm:$0x1] %vm25_vm3, %v24_v6  }
  0x89   :  { %v30_v8 = vld [vmem:[#allocation0] sm:$0x1] }
  0x8a   :  { %32 = vst [vmem:[%s56_s1] sm:$0x1] %v30_v8 }

// kernel: double_conv_forward.7
= control target key start
LH: loop header
LB: loop body
LE: loop exit
PB: predicated region body
PF: predicated region fallthrough
CT: control target
= control target key end

     0   :  { %8 = vsyncpa [#allocation3], 0  ;;  %s632_s0 = inlined_call_operand.vmem [shape: f32[2,4,4,8], index: 0, kind: input, shape index: {}]   ;;  %s633_s1 = inlined_call_operand.vmem [shape: f32[1,1,1,8], index: 1, kind: input, shape index: {}]   ;;  %s634_s2 = inlined_call_operand.vmem [shape: f32[1,1,1,8], index: 2, kind: input, shape index: {}]   ;;  %s635_s3 = inlined_call_operand.hbm [shape: f32[2,4,4,8], index: 3, kind: output, shape index: {}]  }
   0x1   :  { %10 = vsyncpa [#allocation3 + $0x1], 0  ;;  %s507_s12 = smov 0   ;;  %s509_s13 = smov 0  }
   0x2   :  { %s511_s14 = smov 0   ;;  %s513_s15 = smov 0  }
   0x3   :  { %s515_s16 = smov 0   ;;  %s517_s17 = smov 0  }
   0x4 LB: > { %s330_s18 = sadd.s32 4294967295, %s482_s17   ;;  %s331_s19 = sadd.s32 4294967294, %s482_s17   ;;  %s482_s17 = sphi %s517_s17, %s16_s17   ;;  %s478_s16 = sphi %s515_s16, %s642_s16   ;;  %s474_s15 = sphi %s513_s15, %s641_s15   ;;  %s470_s14 = sphi %s511_s14, %s640_s14   ;;  %s466_s13 = sphi %s509_s13, %s639_s13   ;;  %s462_s12 = sphi %s507_s12, %s638_s12  }
   0x5   : > { %s28_s20 = sadd.s32 1, %s478_s16  ;;  %s107_s21 = sadd.s32 1, %s470_s14 }
   0x6   : > { %p30_p0 = scmp.ge.s32.totalorder %s28_s20, 2  ;;  %p117_p1 = scmp.ne.s32.totalorder %s470_s14, %s466_s13 }
   0x7   : > { %p118_p2 = scmp.eq.s32.totalorder %s330_s18, 1  ;;  %p123_p3 = scmp.ne.s32.totalorder %s466_s13, %s462_s12 }
   0x8   : > { %s644_s20 = smov (%p30_p0, %s28_s20), 0  ;;  %p124_p5 = scmp.eq.s32.totalorder %s331_s19, 1 }
   0x9   : > { %p547_p4 = por %p118_p2, %p117_p1  ;;  %s102_s23 = ssub.s32 %s478_s16, %s644_s20 }
   0xa   : > { %p334_p6 = scmp.ge.s32.totalorder %s482_s17, 1  ;;  %p105_p7 = scmp.eq.s32.totalorder %s102_s23, 0 }
   0xb   : > { %p554_p8 = por %p124_p5, %p123_p3  ;;  %p161_p9 = scmp.lt.s32.totalorder %s482_s17, 3 }
   0xc   : > { %s560_s25 = scalar_select %p105_p7, %s470_s14, %s107_s21  }
   0xd   : > { %p162_p10 = pnand %p334_p6, %p161_p9 }
   0xe   : > { %s186_s26 = sand.u32 (!%p162_p10), 1, %s466_s13   ;;  %p190_p11 = scmp.lt.s32.totalorder (!%p162_p10), %s474_s15, 1  ;;  %v338_v0 = vld [vmem:[%s633_s1] ss:$0 sm:$0xff] (!%p162_p10)  ;;  %vm230_vm0 = vcmask (!%p162_p10), 60416  }
   0xf   : > { %165 = sbr.rel (%p162_p10) target bundleno = 49 (0x31), region = 32  ;;  %s335_s27 = sshll.u32 (!%p162_p10), %s186_s26, 4  ;;  %v339_v1 = vld [vmem:[%s634_s2] ss:$0 sm:$0xff] (!%p162_p10) }
  0x10   : > { %s188_s10 = scalar_lea.vmem (!%p162_p10), [#allocation2], %s335_s27  ;;  %s346_s18 = sshll.u32 (!%p162_p10), %s474_s15, 8 }
  0x11   : > { %s251_s11 = sshll.u32 (!%p162_p10), %s188_s10, 4  ;;  %s582_s23 = scalar_lea.hbm (!%p162_p10), %s635_s3, %s346_s18  ;;  %s577_s11 = int_to_ptr.vmem [resolvable:$true] %s251_s11 }
  0x12   : > { %s404_s27 = scalar_lea.vmem (!%p162_p10), %s577_s11, 256 }
  0x13   : > { %p405_p12 = scmp.ne.s32.totalorder (!%p162_p10), %s577_s11, %s404_s27 }
  0x15   : > { %p406_p13 = pnand (!%p162_p10), %p405_p12, %p547_p4 }
  0x16   : > { %s191_s28 = scalar_select %p190_p11, %s474_s15, 1 }
  0x17   : > { %s586_s15 = scalar_lea.sflag [#allocation3], %s186_s26  ;;  %p407_p0 = pneg %p406_p13 }
  0x18   : > { %s345_s29 = sshll.u32 %s191_s28, 4  ;;  %s484_s28 = smov [#allocation2]  }
  0x19   : > { %s197_s7 = scalar_lea.vmem %s632_s0, %s345_s29  ;;  %s408_s29 = sshll.u32 %s484_s28, 4  ;;  %s409_s29 = int_to_ptr.vmem [resolvable:$false] %s408_s29 }
  0x1a   : > { %v200_v2 = vld [vmem:[%s197_s7] sm:$0xf]  ;;  %v201_v3 = vld [vmem:[%s197_s7 + $0x4] sm:$0xf]  ;;  %v202_v4 = vld [vmem:[%s197_s7 + $0x8] sm:$0xf]  ;;  %p411_p1 = scmp.lt.s32.totalorder %s577_s11, %s409_s29 }
  0x1b   : > { %v211_v5 = vmul.f32 %v338_v0, %v200_v2  ;;  %v212_v6 = vmul.f32 %v338_v0, %v201_v3  ;;  %v213_v7 = vmul.f32 %v338_v0, %v202_v4  ;;  %v203_v8 = vld [vmem:[%s197_s7 + $0xc] sm:$0xf]  ;;  %s410_s30 = scalar_lea.vmem %s409_s29, 512 }
  0x1c   : > { %v214_v9 = vmul.f32 %v338_v0, %v203_v8  ;;  %p412_p2 = scmp.lt.s32.totalorder %s410_s30, %s404_s27 }
  0x1d   : > { %v222_v10 = vadd.f32 %v339_v1, %v211_v5  ;;  %v223_v11 = vadd.f32 %v339_v1, %v212_v6  ;;  %v224_v12 = vadd.f32 %v339_v1, %v213_v7 }
  0x1e   : > { %v225_v13 = vadd.f32 %v339_v1, %v214_v9  ;;  %p413_p3 = por %p412_p2, %p411_p1 }
  0x1f   : > { %v226_v14 = vmax.f32 %v222_v10, 0.0  ;;  %v227_v15 = vmax.f32 %v223_v11, 0.0  ;;  %v228_v16 = vmax.f32 %v224_v12, 0.0 }
  0x20   : > { %v229_v17 = vmax.f32 %v225_v13, 0.0  ;;  %p414_p5 = pnand %p413_p3, %p407_p0 }
  0x21   : > { %231 = vst.msk [vmem:[%s188_s10] sm:$0xf] %vm230_vm0, %v226_v14  ;;  %232 = vst.msk [vmem:[%s188_s10 + $0x4] sm:$0xf] %vm230_vm0, %v227_v15 }
  0x22   : > { %233 = vst.msk [vmem:[%s188_s10 + $0x8] sm:$0xf] %vm230_vm0, %v228_v16  ;;  %234 = vst.msk [vmem:[%s188_s10 + $0xc] sm:$0xf] %vm230_vm0, %v229_v17 }
  0x23   : > { %417 = shalt.err (!%p414_p5)
}
  0x24   : > { %s418_s26 = scalar_lea.hbm %s582_s23, 256  ;;  %s422_s6 = scalar_lea.hbm %s635_s3, 512 }
  0x25   : > { %p419_p6 = scmp.ne.s32.totalorder %s582_s23, %s418_s26  ;;  %p423_p10 = scmp.lt.u32.totalorder %s582_s23, %s635_s3 }
  0x26   : > { %p424_p11 = scmp.lt.u32.totalorder %s422_s6, %s418_s26  ;;  %p426_p13 = scmp.lt.u32.totalorder %s418_s26, %s582_s23 }
  0x27   : > { %p420_p7 = pnand %p419_p6, %p547_p4 }
  0x28   : > { %p425_p12 = por %p424_p11, %p423_p10 }
  0x29   : > { %p421_p9 = pneg %p420_p7 }
  0x2a   : > { %p427_p0 = por %p426_p13, %p425_p12 }
  0x2c   : > { %p428_p1 = pnand %p427_p0, %p421_p9 }
  0x2e   : > { %431 = shalt.err (!%p428_p1)
}
  0x2f   : > { %s485_s9 = smov 64   ;;  %s486_s10 = smov 4  }
  0x30   : > { %347 = dma.vmem_to_hbm [thread:$0]  (%p547_p4), %s577_s11, 256, %s582_s23, %s586_s15, %s485_s9, %s485_s9, %s486_s10  }
  0x31 PF: > { %p353_p2 = scmp.ge.s32.totalorder %s482_s17, 2  ;;  %s266_s18 = sand.u32 1, %s462_s12  }
  0x32   : > { %s267_s19 = scalar_lea.sflag [#allocation3], %s266_s18 }
  0x33   : > { %p350_p3 = pnand %p353_p2, %p554_p8 }
  0x35   : > { %457 = dma.done.wait (!%p350_p3), %s267_s19, 256  }
  0x36   : > { %459 = vsyncadd (!%p350_p3), %s267_s19, 4294967040  ;;  %s16_s17 = sadd.s32 1, %s482_s17   ;;  %s638_s12 = smov %s466_s13 }
  0x37   : > { %p13_p5 = scmp.ge.s32.totalorder %s16_s17, 4   ;;  %s639_s13 = smov %s470_s14 }
  0x38   : > { %s640_s14 = smov %s560_s25  ;;  %s641_s15 = smov %s478_s16 }
  0x39   : > { %s642_s16 = smov %s644_s20  ;;  %15 = sbr.rel (!%p13_p5) target bundleno = 4 (0x4), region = 67 }
  0x40   :  { %272 = vsyncpa [#allocation3], 1 }
  0x41   :  { %274 = vsyncpa [#allocation3 + $0x1], 1 }

// kernel: double_conv_forward.5
= control target key start
LH: loop header
LB: loop body
LE: loop exit
PB: predicated region body
PF: predicated region fallthrough
CT: control target
= control target key end

     0   :  { %s1248_s24 = smov 0   ;;  %s1419_s0 = inlined_call_operand.vmem [shape: f32[2,4,4,32], index: 0, kind: input, shape index: {}]   ;;  %s1420_s1 = inlined_call_operand.vmem [shape: f32[1,1,32], index: 1, kind: input, shape index: {}]   ;;  %s1421_s2 = inlined_call_operand.vmem [shape: f32[1,1,32], index: 2, kind: input, shape index: {}]   ;;  %s1422_s3 = inlined_call_operand.vmem [shape: bf16[3,128,8], index: 3, kind: input, shape index: {}]   ;;  %s1423_s4 = inlined_call_operand.vmem [shape: f32[1,8], index: 4, kind: input, shape index: {}]   ;;  %s1424_s5 = inlined_call_operand.vmem [shape: f32[2,4,4,8], index: 5, kind: output, shape index: {0}]   ;;  %s1425_s6 = inlined_call_operand.vmem [shape: f32[2,1,8], index: 6, kind: output, shape index: {1}]   ;;  %s1426_s7 = inlined_call_operand.vmem [shape: f32[2,1,8], index: 7, kind: output, shape index: {2}]  }
   0x1 LB: > { %s977_s4 = sadd.s32 4294967295, %s1200_s24   ;;  %p981_p0 = scmp.ge.s32.totalorder %s1200_s24, 1  ;;  %s1200_s24 = sphi %s1248_s24, %s18_s24  }
   0x2   : > { %p242_p1 = scmp.lt.s32.totalorder %s1200_s24, 3 }
   0x4   : > { %p243_p2 = pnand %p981_p0, %p242_p1 }
   0x5   : > { %p280_p3 = scmp.lt.s32.totalorder (!%p243_p2), %s977_s4, 1  ;;  %p986_p4 = scmp.ne.s32.totalorder (!%p243_p2), %s977_s4, 0 }
   0x6   : > { %246 = sbr.rel (%p243_p2) target bundleno = 441 (0x1b9), region = 40 }
   0xd   : > { %s1256_s25 = scalar_select %p280_p3, %s977_s4, 1 }
   0xe   : > { %300 = sbr.rel (%p986_p4) target bundleno = 21 (0x15), region = 44  ;;  %vm301_vm0 = vcmask (!%p986_p4), 259072   ;;  %v1202_v0 = vmov (!%p986_p4), 0.0   ;;  %v1203_v1 = vmov (!%p986_p4), 0  }
   0xf   : > { %s1047_s26 = sshll.u32 %s1256_s25, 4  ;;  %s292_s29 = scalar_lea.vmem %s1425_s6, %s1256_s25  ;;  %302 = vst.msk [vmem:[#allocation2] sm:$0x3f] (!%p986_p4), %vm301_vm0, %v1202_v0  ;;  %303 = vst.msk [vmem:[#allocation2 + $0x8] sm:$0x3f] (!%p986_p4), %vm301_vm0, %v1202_v0 }
  0x10   : > { %s284_s9 = scalar_lea.vmem %s1419_s0, %s1047_s26  ;;  %s1269_s12 = scalar_lea.vmem %s1424_s5, %s1047_s26  ;;  %304 = vst.msk [vmem:[#allocation2 + $0x10] sm:$0x3f] (!%p986_p4), %vm301_vm0, %v1202_v0  ;;  %305 = vst.msk [vmem:[#allocation2 + $0x18] sm:$0x3f] (!%p986_p4), %vm301_vm0, %v1202_v0 }
  0x11   : > { %s295_s15 = scalar_lea.vmem %s1426_s7, %s1256_s25  ;;  %306 = vst.msk [vmem:[#allocation2 + $0x20] sm:$0x3f] (!%p986_p4), %vm301_vm0, %v1202_v0  ;;  %307 = vst.msk [vmem:[#allocation2 + $0x28] sm:$0x3f] (!%p986_p4), %vm301_vm0, %v1202_v0 }
  0x12   : > { %308 = vst [vmem:[#allocation3] sm:$0xff] (!%p986_p4), %v1203_v1  ;;  %309 = vst [vmem:[#allocation3 + $0x8] sm:$0xff] (!%p986_p4), %v1203_v1 }
  0x15 PF: > { %v310_v2 = vld [vmem:[%s284_s9] sm:$0xf]  ;;  %v311_v3 = vld [vmem:[%s284_s9 + $0x4] sm:$0xf]  ;;  %v312_v4 = vld [vmem:[%s284_s9 + $0x8] sm:$0xf] }
  0x16   : > { %v987_v5 = vld [vmem:[%s1420_s1] ss:$0 sm:$0xff]  ;;  %v313_v10 = vld [vmem:[%s284_s9 + $0xc] sm:$0xf]  ;;  %v1204_v11 = vmov 0.0   ;;  %vm341_vm1 = vcmask 257024  }
  0x17   : > { %v988_v6 = vld [vmem:[%s1421_s2] ss:$0 sm:$0xff]  ;;  %v321_v7 = vmul.f32 %v987_v5, %v310_v2  ;;  %v322_v8 = vmul.f32 %v987_v5, %v311_v3  ;;  %v323_v9 = vmul.f32 %v987_v5, %v312_v4  ;;  %1076 = vmatprep.subr.bf16.mxu0 %v1204_v11  ;;  %1096 = vmatprep.subr.bf16.mxu1 %v1204_v11  ;;  %v1163_v21 = vld [vmem:[%s1422_s3 + $0x8] sm:$0xff]   ;;  %v1164_v24 = vld [vmem:[%s1422_s3 + $0x10] sm:$0xff]   ;;  %vm1205_vm2 = vmmov 0   ;;  %s1206_s19 = smov 32  }
  0x18   : > { %v324_v15 = vmul.f32 %v987_v5, %v313_v10  ;;  %v1162_v16 = vld [vmem:[%s1422_s3] sm:$0xff]   ;;  %v1167_v25 = vld [vmem:[%s1422_s3 + $0x48] sm:$0xff]   ;;  %1092 = vmatprep.mubr.msk.bf16.mxu0 %vm1205_vm2, %v1204_v11  ;;  %1112 = vmatprep.mubr.msk.bf16.mxu1 %vm1205_vm2, %v1204_v11  ;;  %v1166_v26 = vld [vmem:[%s1422_s3 + $0x18] sm:$0xff]   ;;  %s1207_s22 = smov 64   ;;  %vm359_vm3 = vcmask 261120   ;;  %vm378_vm4 = vcmask 523520  }
  0x19   : > { %v332_v12 = vadd.f32 %v988_v6, %v321_v7  ;;  %v333_v13 = vadd.f32 %v988_v6, %v322_v8  ;;  %v334_v14 = vadd.f32 %v988_v6, %v323_v9  ;;  %1077 = vmatpush3.bf16.msra.mxu0 %v1162_v16  ;;  %v1165_v23 = vld [vmem:[%s1422_s3 + $0x40] sm:$0xff]   ;;  %v1169_v27 = vld [vmem:[%s1422_s3 + $0x50] sm:$0xff]   ;;  %v1173_v31 = vld [vmem:[%s1422_s3 + $0x58] sm:$0xff]   ;;  %vm397_vm5 = vcmask 785920  }
  0x1a   : > { %v335_v20 = vadd.f32 %v988_v6, %v324_v15  ;;  %1078 = vmatprep.subr.bf16.mxu0 %v1204_v11  ;;  %1097 = vmatpush3.bf16.msra.mxu1 %v1165_v23  ;;  %v1168_v30 = vld [vmem:[%s1422_s3 + $0x20] sm:$0xff]   ;;  %v1172_v38 = vld [vmem:[%s1422_s3 + $0x28] sm:$0xff]   ;;  %v1174_v50 = vld [vmem:[%s1422_s3 + $0x30] sm:$0xff]   ;;  %vm505_vm6 = vcmask 64512   ;;  %vm844_vm7 = vcmask 60416   ;;  %vm858_vm8 = vcmask 57344  }
  0x1b   : > { %v336_v17 = vmax.f32 %v332_v12, 0.0  ;;  %v337_v18 = vmax.f32 %v333_v13, 0.0  ;;  %v338_v19 = vmax.f32 %v334_v14, 0.0  ;;  %1098 = vmatprep.subr.bf16.mxu1 %v1204_v11  ;;  %v1175_v53 = vld [vmem:[%s1422_s3 + $0x60] sm:$0xff]   ;;  %v1178_v56 = vld [vmem:[%s1422_s3 + $0x38] sm:$0xff]   ;;  %v1179_v58 = vld [vmem:[%s1422_s3 + $0x68] sm:$0xff]  }
  0x1c   : > { %v339_v22 = vmax.f32 %v335_v20, 0.0  ;;  %v1181_v59 = vld [vmem:[%s1422_s3 + $0x70] sm:$0xff]   ;;  %v1183_v60 = vld [vmem:[%s1422_s3 + $0x78] sm:$0xff]   ;;  %v1180_v4 = vld [vmem:[%s1422_s3 + $0x80] sm:$0xff]  }
  0x1d   : > { %342 = vst.msk [vmem:[#allocation2 + $0x9] sm:$0xf] %vm341_vm1, %v336_v17  ;;  %343 = vst.msk [vmem:[#allocation2 + $0x11] sm:$0xf] %vm341_vm1, %v337_v18  ;;  %1079 = vmatpush3.bf16.msra.mxu0 %v1163_v21  ;;  %v1182_v8 = vld [vmem:[%s1422_s3 + $0x88] sm:$0xff]   ;;  %v1184_v10 = vld [vmem:[%s1422_s3 + $0x90] sm:$0xff]  }
  0x1e   : > { %344 = vst.msk [vmem:[#allocation2 + $0x19] sm:$0xf] %vm341_vm1, %v338_v19  ;;  %345 = vst.msk [vmem:[#allocation2 + $0x21] sm:$0xf] %vm341_vm1, %v339_v22  ;;  %1080 = vmatprep.subr.bf16.mxu0 %v1204_v11  ;;  %1099 = vmatpush3.bf16.msra.mxu1 %v1167_v25  ;;  %v1185_v12 = vld [vmem:[%s1422_s3 + $0x98] sm:$0xff]   ;;  %v1186_v13 = vld [vmem:[%s1422_s3 + $0xa0] sm:$0xff]  }
  0x1f   : > { %1100 = vmatprep.subr.bf16.mxu1 %v1204_v11  ;;  %v1187_v14 = vld [vmem:[%s1422_s3 + $0xa8] sm:$0xff]   ;;  %v1190_v15 = vld [vmem:[%s1422_s3 + $0xb0] sm:$0xff]   ;;  %v1191_v16 = vld [vmem:[%s1422_s3 + $0xb8] sm:$0xff]  }
  0x21   : > { %1081 = vmatpush3.bf16.msra.mxu0 %v1164_v24 }
  0x22   : > { %1082 = vmatprep.subr.bf16.mxu0 %v1204_v11  ;;  %1101 = vmatpush3.bf16.msra.mxu1 %v1169_v27 }
  0x23   : > { %1102 = vmatprep.subr.bf16.mxu1 %v1204_v11 }
  0x24   : > { %v1150_v28 = vld [vmem:[#allocation2 + $0x1] ss:$8 sps:$4 sm:$0xff]  }
  0x25   : > { %v1151_v29 = vld [vmem:[#allocation2 + $0x11] ss:$8 sps:$4 sm:$0xff]   ;;  %v1152_v32 = vld [vmem:[#allocation2 + $0x2] ss:$8 sps:$4 sm:$0xff]   ;;  %1083 = vmatpush3.bf16.msra.mxu0 %v1166_v26 }
  0x26   : > { %v373_v33 = vpack.c.bf16 %v1151_v29, %v1150_v28  ;;  %v1153_v34 = vld [vmem:[#allocation2 + $0x12] ss:$8 sps:$4 sm:$0xff]   ;;  %1084 = vmatprep.subr.bf16.mxu0 %v1204_v11  ;;  %1103 = vmatpush3.bf16.msra.mxu1 %v1173_v31  ;;  %v1159_v43 = vld [vmem:[#allocation2 + $0x21] ss:$8 sps:$4 sm:$0xff]  }
  0x27   : > { %v1154_v35 = vld [vmem:[#allocation2 + $0x9] ss:$8 sps:$4 sm:$0xff]   ;;  %v392_v36 = vpack.c.bf16 %v1153_v34, %v1152_v32  ;;  %v1155_v37 = vld [vmem:[#allocation2 + $0x19] ss:$8 sps:$4 sm:$0xff]   ;;  %1104 = vmatprep.subr.bf16.mxu1 %v1204_v11 }
  0x28   : > { %375 = vrot.lane.b32.xlu0 %v373_v33, %s1206_s19  ;;  %v1156_v39 = vld [vmem:[#allocation2 + $0xa] ss:$8 sps:$4 sm:$0xff]   ;;  %v535_v40 = vpack.c.bf16 %v1155_v37, %v1154_v35  ;;  %v1157_v41 = vld [vmem:[#allocation2 + $0x1a] ss:$8 sps:$4 sm:$0xff]  }
  0x29   : > { %1085 = vmatpush3.bf16.msra.mxu0 %v1168_v30  ;;  %v1158_v42 = vld [vmem:[#allocation2 + $0x11] ss:$8 sps:$4 sm:$0xff]   ;;  %v553_v44 = vpack.c.bf16 %v1157_v41, %v1156_v39  ;;  %v1161_v47 = vld [vmem:[#allocation2 + $0x22] ss:$8 sps:$4 sm:$0xff]  }
  0x2a   : > { %1086 = vmatprep.subr.bf16.mxu0 %v1204_v11  ;;  %537 = vrot.lane.b32.xlu1 %v535_v40, %s1206_s19  ;;  %v699_v45 = vpack.c.bf16 %v1159_v43, %v1158_v42  ;;  %v1160_v46 = vld [vmem:[#allocation2 + $0x12] ss:$8 sps:$4 sm:$0xff]   ;;  %v1171_v49 = vld [vmem:[#allocation2] ss:$8 sps:$4 sm:$0xff]  }
  0x2b   : > { %v1170_v48 = vld [vmem:[#allocation2 + $0x10] ss:$8 sps:$4 sm:$0xff]   ;;  %v717_v51 = vpack.c.bf16 %v1161_v47, %v1160_v46  ;;  %1105 = vmatpush3.bf16.msra.mxu1 %v1175_v53  ;;  %v1189_v1 = vld [vmem:[#allocation2 + $0x20] ss:$8 sps:$4 sm:$0xff]  }
  0x2c   : > { %394 = vrot.lane.b32.xlu0 %v392_v36, %s1207_s22  ;;  %v358_v52 = vpack.c.bf16 %v1170_v48, %v1171_v49  ;;  %v1176_v54 = vld [vmem:[#allocation2 + $0x18] ss:$8 sps:$4 sm:$0xff]   ;;  %v1177_v55 = vld [vmem:[#allocation2 + $0x8] ss:$8 sps:$4 sm:$0xff]   ;;  %1106 = vmatprep.subr.bf16.mxu1 %v1204_v11 }
  0x2d   : > { %1087 = vmatpush3.bf16.msra.mxu0 %v1172_v38  ;;  %v520_v57 = vpack.c.bf16 %v1176_v54, %v1177_v55  ;;  %v1188_v0 = vld [vmem:[#allocation2 + $0x10] ss:$8 sps:$4 sm:$0xff]  }
  0x2e   : > { %1088 = vmatprep.subr.bf16.mxu0 %v1204_v11  ;;  %555 = vrot.lane.b32.xlu1 %v553_v44, %s1207_s22  ;;  %360 = vst.msk [vmem:[#allocation3] sm:$0xff] %vm359_vm3, %v358_v52  ;;  %v685_v3 = vpack.c.bf16 %v1189_v1, %v1188_v0 }
  0x2f   : > { %522 = vst.msk [vmem:[#allocation3 + $0x8] sm:$0xff] %vm359_vm3, %v520_v57  ;;  %1107 = vmatpush3.bf16.msra.mxu1 %v1179_v58 }
  0x30   : > { %701 = vrot.lane.b32.xlu0 %v699_v45, %s1206_s19  ;;  %1108 = vmatprep.subr.bf16.mxu1 %v1204_v11 }
  0x31   : > { %1089 = vmatpush3.bf16.msra.mxu0 %v1174_v50 }
  0x32   : > { %1090 = vmatprep.subr.bf16.mxu0 %v1204_v11  ;;  %719 = vrot.lane.b32.xlu1 %v717_v51, %s1207_s22 }
  0x33   : > { %1109 = vmatpush3.bf16.msra.mxu1 %v1181_v59 }
  0x34   : > { %1110 = vmatprep.subr.bf16.mxu1 %v1204_v11 }
  0x35   : > { %1091 = vmatpush3.bf16.msra.mxu0 %v1178_v56 }
  0x36   : > { %1116 = vmatprep.subr.bf16.mxu0 %v1204_v11 }
  0x37   : > { %1111 = vmatpush3.bf16.msra.mxu1 %v1183_v60 }
  0x9a   : > { %v376_v61 = vpop.permute.xlu0 %375 }
  0x9b   : > { %379 = vst.msk [vmem:[#allocation3] sm:$0xff] %vm378_vm4, %v376_v61 }
  0x9c   : > { %v538_v63 = vpop.permute.xlu1 %537 }
  0x9d   : > { %540 = vst.msk [vmem:[#allocation3 + $0x8] sm:$0xff] %vm378_vm4, %v538_v63 }
  0x9e   : > { %v395_v62 = vpop.permute.xlu0 %394 }
  0x9f   : > { %398 = vst.msk [vmem:[#allocation3] sm:$0xff] %vm397_vm5, %v395_v62 }
  0xa0   : > { %v556_v2 = vpop.permute.xlu1 %555 }
  0xa1   : > { %558 = vst.msk [vmem:[#allocation3 + $0x8] sm:$0xff] %vm397_vm5, %v556_v2 }
  0xa2   : > { %v702_v5 = vpop.permute.xlu0 %701 }
  0xa4   : > { %v720_v7 = vpop.permute.xlu1 %719 }
  0xa6   : > { %v399_v6 = vld [vmem:[#allocation3] sm:$0xff] }
  0xa7   : > { %1093 = vmatmul.mubr.bf16.vlgmr.msra.gmra.mrb[0].mxu0 %v399_v6  ;;  %686 = vst.msk [vmem:[#allocation3] sm:$0xff] %vm359_vm3, %v685_v3 }
  0xa8   : > { %1117 = vmatpush3.bf16.msra.mxu0 %v1180_v4  ;;  %704 = vst.msk [vmem:[#allocation3] sm:$0xff] %vm378_vm4, %v702_v5  ;;  %1132 = vmatprep.mubr.msk.bf16.mxu0 %vm1205_vm2, %v1204_v11  ;;  %v559_v9 = vld [vmem:[#allocation3 + $0x8] sm:$0xff] }
  0xa9   : > { %1118 = vmatprep.subr.bf16.mxu0 %v1204_v11  ;;  %722 = vst.msk [vmem:[#allocation3] sm:$0xff] %vm397_vm5, %v720_v7  ;;  %1113 = vmatmul.mubr.bf16.vlgmr.msra.gmra.mrb[0].mxu1 %v559_v9 }
  0xac   : > { %1119 = vmatpush3.bf16.msra.mxu0 %v1182_v8 }
  0xad   : > { %1120 = vmatprep.subr.bf16.mxu0 %v1204_v11 }
  0xb0   : > { %1121 = vmatpush3.bf16.msra.mxu0 %v1184_v10  ;;  %v723_v17 = vld [vmem:[#allocation3] sm:$0xff] }
  0xb1   : > { %1122 = vmatprep.subr.bf16.mxu0 %v1204_v11 }
  0xb4   : > { %1123 = vmatpush3.bf16.msra.mxu0 %v1185_v12 }
  0xb5   : > { %1124 = vmatprep.subr.bf16.mxu0 %v1204_v11 }
  0xb8   : > { %1125 = vmatpush3.bf16.msra.mxu0 %v1186_v13 }
  0xb9   : > { %1126 = vmatprep.subr.bf16.mxu0 %v1204_v11 }
  0xbc   : > { %1127 = vmatpush3.bf16.msra.mxu0 %v1187_v14 }
  0xbd   : > { %1128 = vmatprep.subr.bf16.mxu0 %v1204_v11 }
  0xc0   : > { %1129 = vmatpush3.bf16.msra.mxu0 %v1190_v15 }
  0xc1   : > { %1130 = vmatprep.subr.bf16.mxu0 %v1204_v11 }
  0xc4   : > { %1131 = vmatpush3.bf16.msra.mxu0 %v1191_v16 }
  0xc7   : > { %1133 = vmatmul.mubr.bf16.vlgmr.msra.gmra.mrb[4].mxu0 %v723_v17 }
 0x17a   : > { %v498_v18 = vpop.f32.mrb[0].mxu0 }
 0x17b   : > { %506 = vst.msk [vmem:[#allocation4] sm:$0xff] %vm505_vm6, %v498_v18  ;;  %v1094_v19 = vpop.f32.mrb[1].mxu0 }
 0x17c   : > { %v501_v20 = vpop.f32.mrb[2].mxu0  ;;  %v659_v22 = vpop.f32.mrb[0].mxu1 }
 0x17d   : > { %507 = vst.msk [vmem:[#allocation4 + $0x8] sm:$0xff] %vm505_vm6, %v501_v20  ;;  %v1095_v21 = vpop.f32.mrb[3].mxu0  ;;  %v1114_v23 = vpop.f32.mrb[1].mxu1 }
 0x17e   : > { %v662_v24 = vpop.f32.mrb[2].mxu1 }
 0x17f   : > { %v1115_v25 = vpop.f32.mrb[3].mxu1 }
 0x182   : > { %v666_v26 = vld [vmem:[#allocation4] sm:$0xff] }
 0x183   : > { %v668_v27 = vadd.f32 %v666_v26, %v659_v22 }
 0x184   : > { %v667_v28 = vld [vmem:[#allocation4 + $0x8] sm:$0xff] }
 0x185   : > { %670 = vst.msk [vmem:[#allocation4] sm:$0xff] %vm505_vm6, %v668_v27  ;;  %v669_v11 = vadd.f32 %v667_v28, %v662_v24 }
 0x187   : > { %671 = vst.msk [vmem:[#allocation4 + $0x8] sm:$0xff] %vm505_vm6, %v669_v11 }
 0x18c   : > { %v830_v30 = vld [vmem:[#allocation4] sm:$0xff] }
 0x18e   : > { %v831_v34 = vld [vmem:[#allocation4 + $0x8] sm:$0xff] }
 0x19a   : > { %v823_v29 = vpop.f32.mrb[4].mxu0 }
 0x19b   : > { %v832_v31 = vadd.f32 %v830_v30, %v823_v29  ;;  %v1134_v32 = vpop.f32.mrb[5].mxu0 }
 0x19c   : > { %v826_v33 = vpop.f32.mrb[6].mxu0 }
 0x19d   : > { %834 = vst.msk [vmem:[#allocation4] sm:$0xff] %vm505_vm6, %v832_v31  ;;  %v833_v35 = vadd.f32 %v831_v34, %v826_v33  ;;  %v1135_v36 = vpop.f32.mrb[7].mxu0 }
 0x19f   : > { %835 = vst.msk [vmem:[#allocation4 + $0x8] sm:$0xff] %vm505_vm6, %v833_v35 }
 0x1a4   : > { %v836_v37 = vld [vmem:[#allocation4] sm:$0xff] }
 0x1a5   : > { %v840_v38 = vcombine.high %v836_v37, %v836_v37  ;;  %845 = vst.msk [vmem:[%s1269_s12] sm:$0xf] %vm844_vm7, %v836_v37  ;;  %v860_v39 = vmul.f32 %v836_v37, %v836_v37  ;;  %v849_v41 = vsel %vm505_vm6, %v836_v37, 0.0 }
 0x1a6   : > { %v837_v40 = vld [vmem:[#allocation4 + $0x8] sm:$0xff] }
 0x1a7   : > { %846 = vst.msk [vmem:[%s1269_s12 + $0x4] sm:$0xf] %vm844_vm7, %v840_v38  ;;  %v841_v42 = vcombine.high %v837_v40, %v837_v40  ;;  %847 = vst.msk [vmem:[%s1269_s12 + $0x8] sm:$0xf] %vm844_vm7, %v837_v40  ;;  %v850_v43 = vsel %vm505_vm6, %v837_v40, 0.0  ;;  %v861_v44 = vmul.f32 %v837_v40, %v837_v40  ;;  %v862_v46 = vsel %vm505_vm6, %v860_v39, 0.0 }
 0x1a8   : > { %v851_v45 = vadd.f32 %v850_v43, %v849_v41 }
 0x1a9   : > { %848 = vst.msk [vmem:[%s1269_s12 + $0xc] sm:$0xf] %vm844_vm7, %v841_v42  ;;  %v863_v47 = vsel %vm505_vm6, %v861_v44, 0.0 }
 0x1aa   : > { %v852_v48 = vrot.slane %v851_v45, 4  ;;  %v864_v49 = vadd.f32 %v863_v47, %v862_v46 }
 0x1ac   : > { %v853_v50 = vadd.f32 %v852_v48, %v851_v45  ;;  %v865_v51 = vrot.slane %v864_v49, 4 }
 0x1ae   : > { %v854_v52 = vrot.slane %v853_v50, 2  ;;  %v866_v53 = vadd.f32 %v865_v51, %v864_v49 }
 0x1b0   : > { %v855_v54 = vadd.f32 %v854_v52, %v853_v50  ;;  %v867_v55 = vrot.slane %v866_v53, 2 }
 0x1b2   : > { %v856_v56 = vrot.slane %v855_v54, 1  ;;  %v868_v57 = vadd.f32 %v867_v55, %v866_v53 }
 0x1b4   : > { %v857_v58 = vadd.f32 %v856_v56, %v855_v54  ;;  %v869_v59 = vrot.slane %v868_v57, 1 }
 0x1b6   : > { %859 = vst.msk [vmem:[%s292_s29] sm:$0x1] %vm858_vm8, %v857_v58  ;;  %v870_v60 = vadd.f32 %v869_v59, %v868_v57 }
 0x1b8   : > { %871 = vst.msk [vmem:[%s295_s15] sm:$0x1] %vm858_vm8, %v870_v60 }
 0x1b9 PF: > { %s18_s24 = sadd.s32 1, %s1200_s24  }
 0x1ba   : > { %p15_p5 = scmp.ge.s32.totalorder %s18_s24, 4  }
 0x1bc   :  { %17 = sbr.rel (!%p15_p5) target bundleno = 1 (0x1), region = 103 }

// kernel: double_conv_forward.4
= control target key start
LH: loop header
LB: loop body
LE: loop exit
PB: predicated region body
PF: predicated region fallthrough
CT: control target
= control target key end

     0   :  { %s1507_s24 = smov 0   ;;  %s1809_s0 = inlined_call_operand.vmem [shape: f32[2,8,8,16], index: 0, kind: input, shape index: {}]   ;;  %s1810_s1 = inlined_call_operand.vmem [shape: f32[1,1,16], index: 1, kind: input, shape index: {}, may-alias: {1,2}]   ;;  %s1811_s2 = inlined_call_operand.vmem [shape: f32[1,1,16], index: 2, kind: input, shape index: {}, may-alias: {1,2}]   ;;  %s1812_s3 = inlined_call_operand.vmem [shape: bf16[3,128,8], index: 3, kind: input, shape index: {}]   ;;  %s1813_s4 = inlined_call_operand.vmem [shape: f32[1,8], index: 4, kind: input, shape index: {}]   ;;  %s1814_s5 = inlined_call_operand.vmem [shape: f32[2,8,8,8], index: 5, kind: output, shape index: {0}]   ;;  %s1815_s6 = inlined_call_operand.vmem [shape: f32[2,1,8], index: 6, kind: output, shape index: {1}]   ;;  %s1816_s7 = inlined_call_operand.vmem [shape: f32[2,1,8], index: 7, kind: output, shape index: {2}]  }
   0x1 LB: > { %s1225_s1 = sadd.s32 4294967295, %s1461_s24   ;;  %p1229_p0 = scmp.ge.s32.totalorder %s1461_s24, 1  ;;  %s1461_s24 = sphi %s1507_s24, %s18_s24  }
   0x2   : > { %p242_p1 = scmp.lt.s32.totalorder %s1461_s24, 3 }
   0x4   : > { %p243_p2 = pnand %p1229_p0, %p242_p1 }
   0x5   : > { %p280_p3 = scmp.lt.s32.totalorder (!%p243_p2), %s1225_s1, 1  ;;  %p1234_p4 = scmp.ne.s32.totalorder (!%p243_p2), %s1225_s1, 0 }
   0x6   : > { %246 = sbr.rel (%p243_p2) target bundleno = 455 (0x1c7), region = 40 }
   0xd   : > { %s1515_s2 = scalar_select %p280_p3, %s1225_s1, 1 }
   0xe   : > { %300 = sbr.rel (%p1234_p4) target bundleno = 29 (0x1d), region = 44  ;;  %vm301_vm0 = vcmask (!%p1234_p4), 130048   ;;  %vm303_vm1 = vcmask (!%p1234_p4), 123904   ;;  %v1463_v0 = vmov (!%p1234_p4), 0.0   ;;  %v1464_v1 = vmov (!%p1234_p4), 0  }
   0xf   : > { %s1293_s4 = sshll.u32 %s1515_s2, 6  ;;  %s292_s27 = scalar_lea.vmem %s1815_s6, %s1515_s2  ;;  %302 = vst.msk [vmem:[#allocation2] sm:$0xff] (!%p1234_p4), %vm301_vm0, %v1463_v0  ;;  %305 = vst.msk [vmem:[#allocation2 + $0x10] sm:$0xff] (!%p1234_p4), %vm301_vm0, %v1463_v0 }
  0x10   : > { %s1525_s30 = scalar_lea.vmem %s1809_s0, %s1293_s4  ;;  %s1530_s10 = scalar_lea.vmem %s1814_s5, %s1293_s4  ;;  %307 = vst.msk [vmem:[#allocation2 + $0x20] sm:$0xff] (!%p1234_p4), %vm301_vm0, %v1463_v0  ;;  %309 = vst.msk [vmem:[#allocation2 + $0x30] sm:$0xff] (!%p1234_p4), %vm301_vm0, %v1463_v0 }
  0x11   : > { %s295_s13 = scalar_lea.vmem %s1816_s7, %s1515_s2  ;;  %311 = vst.msk [vmem:[#allocation2 + $0x40] sm:$0xff] (!%p1234_p4), %vm301_vm0, %v1463_v0  ;;  %313 = vst.msk [vmem:[#allocation2 + $0x50] sm:$0xff] (!%p1234_p4), %vm301_vm0, %v1463_v0 }
  0x12   : > { %315 = vst.msk [vmem:[#allocation2 + $0x60] sm:$0xff] (!%p1234_p4), %vm301_vm0, %v1463_v0  ;;  %317 = vst.msk [vmem:[#allocation2 + $0x70] sm:$0xff] (!%p1234_p4), %vm301_vm0, %v1463_v0 }
  0x13   : > { %319 = vst.msk [vmem:[#allocation2 + $0x80] sm:$0xff] (!%p1234_p4), %vm301_vm0, %v1463_v0  ;;  %321 = vst.msk [vmem:[#allocation2 + $0x90] sm:$0xff] (!%p1234_p4), %vm301_vm0, %v1463_v0 }
  0x14   : > { %304 = vst.msk [vmem:[#allocation2 + $0x8] sm:$0x3] (!%p1234_p4), %vm303_vm1, %v1463_v0  ;;  %306 = vst.msk [vmem:[#allocation2 + $0x18] sm:$0x3] (!%p1234_p4), %vm303_vm1, %v1463_v0 }
  0x15   : > { %308 = vst.msk [vmem:[#allocation2 + $0x28] sm:$0x3] %vm303_vm1, %v1463_v0  ;;  %310 = vst.msk [vmem:[#allocation2 + $0x38] sm:$0x3] %vm303_vm1, %v1463_v0 }
  0x16   : > { %312 = vst.msk [vmem:[#allocation2 + $0x48] sm:$0x3] %vm303_vm1, %v1463_v0  ;;  %314 = vst.msk [vmem:[#allocation2 + $0x58] sm:$0x3] %vm303_vm1, %v1463_v0 }
  0x17   : > { %316 = vst.msk [vmem:[#allocation2 + $0x68] sm:$0x3] %vm303_vm1, %v1463_v0  ;;  %318 = vst.msk [vmem:[#allocation2 + $0x78] sm:$0x3] %vm303_vm1, %v1463_v0 }
  0x18   : > { %320 = vst.msk [vmem:[#allocation2 + $0x88] sm:$0x3] %vm303_vm1, %v1463_v0  ;;  %322 = vst.msk [vmem:[#allocation2 + $0x98] sm:$0x3] %vm303_vm1, %v1463_v0 }
  0x19   : > { %323 = vst [vmem:[#allocation3] sm:$0xff] %v1464_v1  ;;  %324 = vst [vmem:[#allocation3 + $0x8] sm:$0xff] %v1464_v1 }
  0x1a   : > { %325 = vst [vmem:[#allocation3 + $0x10] sm:$0xff] %v1464_v1  ;;  %326 = vst [vmem:[#allocation3 + $0x18] sm:$0xff] %v1464_v1 }
  0x1b   : > { %327 = vst [vmem:[#allocation3 + $0x20] sm:$0xff] %v1464_v1  ;;  %328 = vst [vmem:[#allocation3 + $0x28] sm:$0xff] %v1464_v1 }
  0x1c   : > { %329 = vst [vmem:[#allocation3 + $0x30] sm:$0xff] %v1464_v1  ;;  %330 = vst [vmem:[#allocation3 + $0x38] sm:$0xff] %v1464_v1 }
  0x1d PF: > { %v331_v2 = vld [vmem:[%s1525_s30] sm:$0xff]  ;;  %vm340_vm2 = vcmask 130048   ;;  %v332_v3 = vld [vmem:[%s1525_s30 + $0x8] sm:$0xff]  ;;  %v333_v4 = vld [vmem:[%s1525_s30 + $0x10] sm:$0xff]  ;;  %s1465_s22 = smov 16   ;;  %s1466_s23 = smov 32  }
  0x1e   : > { %341 = vst.msk [vmem:[#allocation2 + $0x11] sm:$0xff] %vm340_vm2, %v331_v2  ;;  %v334_v5 = vld [vmem:[%s1525_s30 + $0x18] sm:$0xff]  ;;  %342 = vst.msk [vmem:[#allocation2 + $0x21] sm:$0xff] %vm340_vm2, %v332_v3  ;;  %v335_v6 = vld [vmem:[%s1525_s30 + $0x20] sm:$0xff]  ;;  %vm393_vm3 = vcmask 261248   ;;  %vm426_vm4 = vcmask 392448  }
  0x1f   : > { %343 = vst.msk [vmem:[#allocation2 + $0x31] sm:$0xff] %vm340_vm2, %v333_v4  ;;  %344 = vst.msk [vmem:[#allocation2 + $0x41] sm:$0xff] %vm340_vm2, %v334_v5  ;;  %v336_v7 = vld [vmem:[%s1525_s30 + $0x28] sm:$0xff]  ;;  %v337_v8 = vld [vmem:[%s1525_s30 + $0x30] sm:$0xff]  ;;  %vm564_vm5 = vcmask 64512   ;;  %vm1088_vm6 = vcmask 57344  }
  0x20   : > { %345 = vst.msk [vmem:[#allocation2 + $0x51] sm:$0xff] %vm340_vm2, %v335_v6  ;;  %346 = vst.msk [vmem:[#allocation2 + $0x61] sm:$0xff] %vm340_vm2, %v336_v7  ;;  %v338_v9 = vld [vmem:[%s1525_s30 + $0x38] sm:$0xff]  ;;  %v1431_v11 = vld [vmem:[%s1812_s3] sm:$0xff]  }
  0x21   : > { %347 = vst.msk [vmem:[#allocation2 + $0x71] sm:$0xff] %vm340_vm2, %v337_v8  ;;  %348 = vst.msk [vmem:[#allocation2 + $0x81] sm:$0xff] %vm340_vm2, %v338_v9  ;;  %v1432_v12 = vld [vmem:[%s1812_s3 + $0x8] sm:$0xff]   ;;  %1331 = vmatprep.subr.bf16.mxu0 %v1431_v11  ;;  %v1433_v14 = vld [vmem:[%s1812_s3 + $0x10] sm:$0xff]  }
  0x22   : > { %1332 = vmatpush3.bf16.msra.mxu0 %v1431_v11  ;;  %v1434_v15 = vld [vmem:[%s1812_s3 + $0x40] sm:$0xff]   ;;  %v1435_v28 = vld [vmem:[%s1812_s3 + $0x18] sm:$0xff]   ;;  %v1436_v31 = vld [vmem:[%s1812_s3 + $0x48] sm:$0xff]  }
  0x23   : > { %v365_v10 = vld [vmem:[#allocation2 + $0x1] sm:$0xff]  ;;  %1333 = vmatprep.subr.bf16.mxu0 %v1432_v12  ;;  %1355 = vmatprep.subr.bf16.mxu1 %v1434_v15  ;;  %v1438_v34 = vld [vmem:[%s1812_s3 + $0x50] sm:$0xff]   ;;  %v1440_v43 = vld [vmem:[%s1812_s3 + $0x58] sm:$0xff]  }
  0x24   : > { %v398_v13 = vld [vmem:[#allocation2 + $0x2] sm:$0xff]  ;;  %1356 = vmatpush3.bf16.msra.mxu1 %v1434_v15  ;;  %v1441_v58 = vld [vmem:[%s1812_s3 + $0x30] sm:$0xff]   ;;  %v1443_v3 = vld [vmem:[%s1812_s3 + $0x38] sm:$0xff]  }
  0x25   : > { %v366_v16 = vld [vmem:[#allocation2 + $0x11] sm:$0xff]  ;;  %v367_v20 = vld [vmem:[#allocation2 + $0x21] sm:$0xff]  ;;  %1357 = vmatprep.subr.bf16.mxu1 %v1436_v31 }
  0x26   : > { %v399_v17 = vld [vmem:[#allocation2 + $0x12] sm:$0xff]  ;;  %v373_v18 = vpack.c.bf16 %v366_v16, %v365_v10  ;;  %v400_v22 = vld [vmem:[#allocation2 + $0x22] sm:$0xff]  ;;  %1334 = vmatpush3.bf16.msra.mxu0 %v1432_v12  ;;  %v598_v29 = vpack.c.bf16 %v367_v20, %v366_v16 }
  0x27   : > { %v406_v19 = vpack.c.bf16 %v399_v17, %v398_v13  ;;  %v368_v21 = vld [vmem:[#allocation2 + $0x31] sm:$0xff]  ;;  %v593_v26 = vld [vmem:[#allocation2 + $0x41] sm:$0xff]  ;;  %1335 = vmatprep.subr.bf16.mxu0 %v1433_v14  ;;  %v630_v40 = vpack.c.bf16 %v400_v22, %v399_v17 }
  0x28   : > { %v401_v23 = vld [vmem:[#allocation2 + $0x32] sm:$0xff]  ;;  %381 = vrot.lane.b32.xlu0 %v373_v18, %s1465_s22  ;;  %v1576_v24 = vpack.c.bf16 %v368_v21, %v367_v20  ;;  %v625_v27 = vld [vmem:[#allocation2 + $0x42] sm:$0xff]  ;;  %v599_v30 = vpack.c.bf16 %v593_v26, %v368_v21  ;;  %1358 = vmatpush3.bf16.msra.mxu1 %v1436_v31 }
  0x29   : > { %414 = vrot.lane.b32.xlu1 %v406_v19, %s1466_s23  ;;  %v1578_v25 = vpack.c.bf16 %v401_v23, %v400_v22  ;;  %v349_v32 = vld [vmem:[#allocation2] sm:$0xff]  ;;  %v350_v35 = vld [vmem:[#allocation2 + $0x10] sm:$0xff]  ;;  %v631_v41 = vpack.c.bf16 %v625_v27, %v401_v23  ;;  %1359 = vmatprep.subr.bf16.mxu1 %v1438_v34  ;;  %v1439_v46 = vld [vmem:[%s1812_s3 + $0x28] sm:$0xff]  }
  0x2a   : > { %1336 = vmatpush3.bf16.msra.mxu0 %v1433_v14  ;;  %v1437_v33 = vld [vmem:[%s1812_s3 + $0x20] sm:$0xff]   ;;  %v1596_v36 = vld [vmem:[#allocation2 + $0x51] sm:$0xff]  ;;  %v357_v39 = vpack.c.bf16 %v350_v35, %v349_v32  ;;  %v1444_v0 = vld [vmem:[%s1812_s3 + $0x68] sm:$0xff]  }
  0x2b   : > { %1337 = vmatprep.subr.bf16.mxu0 %v1435_v28  ;;  %v1598_v37 = vld [vmem:[#allocation2 + $0x61] sm:$0xff]  ;;  %v1600_v38 = vld [vmem:[#allocation2 + $0x71] sm:$0xff]  ;;  %v375_v52 = vpack.c.bf16 %v1596_v36, %v593_v26 }
  0x2c   : > { %383 = vrot.lane.b32.xlu0 %v1576_v24, %s1465_s22  ;;  %v351_v42 = vld [vmem:[#allocation2 + $0x20] sm:$0xff]  ;;  %361 = vst.msk [vmem:[#allocation3] sm:$0xff] %vm340_vm2, %v357_v39  ;;  %v352_v44 = vld [vmem:[#allocation2 + $0x30] sm:$0xff]  ;;  %1360 = vmatpush3.bf16.msra.mxu1 %v1438_v34  ;;  %v1619_v53 = vpack.c.bf16 %v1600_v38, %v1598_v37  ;;  %v600_v5 = vpack.c.bf16 %v1598_v37, %v1596_v36  ;;  %v1447_v13 = vld [vmem:[%s1812_s3 + $0x78] sm:$0xff]  }
  0x2d   : > { %416 = vrot.lane.b32.xlu1 %v1578_v25, %s1466_s23  ;;  %v581_v45 = vpack.c.bf16 %v351_v42, %v350_v35  ;;  %v1611_v47 = vpack.c.bf16 %v352_v44, %v351_v42  ;;  %v403_v48 = vld [vmem:[#allocation2 + $0x52] sm:$0xff]  ;;  %v404_v49 = vld [vmem:[#allocation2 + $0x62] sm:$0xff]  ;;  %1361 = vmatprep.subr.bf16.mxu1 %v1440_v43 }
  0x2e   : > { %1338 = vmatpush3.bf16.msra.mxu0 %v1435_v28  ;;  %v405_v50 = vld [vmem:[#allocation2 + $0x72] sm:$0xff]  ;;  %v576_v51 = vld [vmem:[#allocation2 + $0x40] sm:$0xff]  ;;  %v408_v59 = vpack.c.bf16 %v403_v48, %v625_v27  ;;  %v632_v11 = vpack.c.bf16 %v404_v49, %v403_v48  ;;  %v1448_v27 = vld [vmem:[%s1812_s3 + $0x88] sm:$0xff]  }
  0x2f   : > { %1339 = vmatprep.subr.bf16.mxu0 %v1437_v33  ;;  %586 = vst.msk [vmem:[#allocation3 + $0x20] sm:$0xff] %vm340_vm2, %v581_v45  ;;  %362 = vst.msk [vmem:[#allocation3 + $0x8] sm:$0xff] %vm340_vm2, %v1611_v47  ;;  %v582_v54 = vpack.c.bf16 %v576_v51, %v352_v44  ;;  %v354_v55 = vld [vmem:[#allocation2 + $0x50] sm:$0xff]  ;;  %v1442_v56 = vld [vmem:[%s1812_s3 + $0x60] sm:$0xff]   ;;  %v409_v60 = vpack.c.bf16 %v405_v50, %v404_v49 }
  0x30   : > { %606 = vrot.lane.b32.xlu0 %v598_v29, %s1465_s22  ;;  %v1626_v57 = vpack.c.bf16 %v354_v55, %v576_v51  ;;  %1362 = vmatpush3.bf16.msra.mxu1 %v1440_v43  ;;  %v597_v61 = vld [vmem:[#allocation2 + $0x81] sm:$0xff]  ;;  %v356_v63 = vld [vmem:[#allocation2 + $0x70] sm:$0xff]  ;;  %v1450_v36 = vld [vmem:[%s1812_s3 + $0x98] sm:$0xff]  }
  0x31   : > { %608 = vrot.lane.b32.xlu1 %v599_v30, %s1465_s22  ;;  %587 = vst.msk [vmem:[#allocation3 + $0x28] sm:$0xff] %vm340_vm2, %v582_v54  ;;  %v355_v62 = vld [vmem:[#allocation2 + $0x60] sm:$0xff]  ;;  %1363 = vmatprep.subr.bf16.mxu1 %v1442_v56  ;;  %v601_v6 = vpack.c.bf16 %v597_v61, %v1600_v38  ;;  %v1445_v8 = vld [vmem:[%s1812_s3 + $0x70] sm:$0xff]   ;;  %v1454_v54 = vld [vmem:[%s1812_s3 + $0xb8] sm:$0xff]  }
  0x32   : > { %1340 = vmatpush3.bf16.msra.mxu0 %v1437_v33  ;;  %363 = vst.msk [vmem:[#allocation3 + $0x10] sm:$0xff] %vm340_vm2, %v1626_v57  ;;  %v1640_v1 = vpack.c.bf16 %v356_v63, %v355_v62  ;;  %v583_v2 = vpack.c.bf16 %v355_v62, %v354_v55  ;;  %v629_v4 = vld [vmem:[#allocation2 + $0x82] sm:$0xff]  ;;  %v836_v14 = vld [vmem:[#allocation2 + $0x91] sm:$0xff] }
  0x33   : > { %1341 = vmatprep.subr.bf16.mxu0 %v1439_v46  ;;  %v1653_v7 = vld [vmem:[#allocation2 + $0x80] sm:$0xff]  ;;  %v633_v12 = vpack.c.bf16 %v629_v4, %v405_v50  ;;  %v840_v15 = vpack.c.bf16 %v836_v14, %v597_v61  ;;  %v868_v16 = vld [vmem:[#allocation2 + $0x92] sm:$0xff] }
  0x34   : > { %638 = vrot.lane.b32.xlu0 %v630_v40, %s1466_s23  ;;  %1364 = vmatpush3.bf16.msra.mxu1 %v1442_v56  ;;  %364 = vst.msk [vmem:[#allocation3 + $0x18] sm:$0xff] %vm340_vm2, %v1640_v1  ;;  %588 = vst.msk [vmem:[#allocation3 + $0x30] sm:$0xff] %vm340_vm2, %v583_v2  ;;  %v584_v9 = vpack.c.bf16 %v1653_v7, %v356_v63  ;;  %v1662_v10 = vld [vmem:[%s1812_s3 + $0x80] sm:$0xff]   ;;  %v872_v17 = vpack.c.bf16 %v868_v16, %v629_v4  ;;  %v1449_v31 = vld [vmem:[%s1812_s3 + $0x90] sm:$0xff]  }
  0x35   : > { %640 = vrot.lane.b32.xlu1 %v631_v41, %s1466_s23  ;;  %1365 = vmatprep.subr.bf16.mxu1 %v1444_v0  ;;  %v820_v37 = vld [vmem:[#allocation2 + $0x90] sm:$0xff]  ;;  %v1451_v40 = vld [vmem:[%s1812_s3 + $0xa0] sm:$0xff]  }
  0x36   : > { %1342 = vmatpush3.bf16.msra.mxu0 %v1439_v46  ;;  %589 = vst.msk [vmem:[#allocation3 + $0x38] sm:$0xff] %vm340_vm2, %v584_v9  ;;  %v824_v41 = vpack.c.bf16 %v820_v37, %v1653_v7  ;;  %v1452_v46 = vld [vmem:[%s1812_s3 + $0xa8] sm:$0xff]   ;;  %v1453_v49 = vld [vmem:[%s1812_s3 + $0xb0] sm:$0xff]  }
  0x37   : > { %1343 = vmatprep.subr.bf16.mxu0 %v1441_v58 }
  0x38   : > { %385 = vrot.lane.b32.xlu0 %v375_v52, %s1465_s22  ;;  %1366 = vmatpush3.bf16.msra.mxu1 %v1444_v0 }
  0x39   : > { %387 = vrot.lane.b32.xlu1 %v1619_v53, %s1465_s22  ;;  %1367 = vmatprep.subr.bf16.mxu1 %v1445_v8 }
  0x3a   : > { %1344 = vmatpush3.bf16.msra.mxu0 %v1441_v58 }
  0x3b   : > { %1345 = vmatprep.subr.bf16.mxu0 %v1443_v3 }
  0x3c   : > { %418 = vrot.lane.b32.xlu0 %v408_v59, %s1466_s23  ;;  %1368 = vmatpush3.bf16.msra.mxu1 %v1445_v8 }
  0x3d   : > { %420 = vrot.lane.b32.xlu1 %v409_v60, %s1466_s23  ;;  %1369 = vmatprep.subr.bf16.mxu1 %v1447_v13 }
  0x3e   : > { %1346 = vmatpush3.bf16.msra.mxu0 %v1443_v3 }
  0x3f   : > { %1379 = vmatprep.subr.bf16.mxu0 %v1662_v10 }
  0x40   : > { %610 = vrot.lane.b32.xlu0 %v600_v5, %s1465_s22  ;;  %1370 = vmatpush3.bf16.msra.mxu1 %v1447_v13 }
  0x41   : > { %612 = vrot.lane.b32.xlu1 %v601_v6, %s1465_s22  ;;  %1403 = vmatprep.subr.bf16.mxu1 %v1662_v10 }
  0x44   : > { %642 = vrot.lane.b32.xlu0 %v632_v11, %s1466_s23 }
  0x45   : > { %644 = vrot.lane.b32.xlu1 %v633_v12, %s1466_s23 }
  0x48   : > { %845 = vrot.lane.b32.xlu0 %v1576_v24, %s1465_s22 }
  0x49   : > { %847 = vrot.lane.b32.xlu1 %v375_v52, %s1465_s22 }
  0x4c   : > { %877 = vrot.lane.b32.xlu0 %v1578_v25, %s1466_s23 }
  0x4d   : > { %879 = vrot.lane.b32.xlu1 %v408_v59, %s1466_s23 }
  0x50   : > { %849 = vrot.lane.b32.xlu0 %v1619_v53, %s1465_s22 }
  0x51   : > { %851 = vrot.lane.b32.xlu1 %v840_v15, %s1465_s22 }
  0x54   : > { %881 = vrot.lane.b32.xlu0 %v409_v60, %s1466_s23 }
  0x55   : > { %883 = vrot.lane.b32.xlu1 %v872_v17, %s1466_s23 }
  0x9a   : > { %v382_v18 = vpop.permute.xlu0 %381 }
  0x9b   : > { %v415_v19 = vpop.permute.xlu1 %414  ;;  %394 = vst.msk [vmem:[#allocation3] sm:$0xff] %vm393_vm3, %v382_v18 }
  0x9c   : > { %427 = vst.msk [vmem:[#allocation3] sm:$0xff] %vm426_vm4, %v415_v19 }
  0x9e   : > { %v384_v20 = vpop.permute.xlu0 %383 }
  0x9f   : > { %v417_v21 = vpop.permute.xlu1 %416  ;;  %395 = vst.msk [vmem:[#allocation3 + $0x8] sm:$0xff] %vm393_vm3, %v384_v20 }
  0xa0   : > { %428 = vst.msk [vmem:[#allocation3 + $0x8] sm:$0xff] %vm426_vm4, %v417_v21 }
  0xa2   : > { %v607_v22 = vpop.permute.xlu0 %606 }
  0xa3   : > { %v609_v23 = vpop.permute.xlu1 %608  ;;  %618 = vst.msk [vmem:[#allocation3 + $0x20] sm:$0xff] %vm393_vm3, %v607_v22  ;;  %v431_v24 = vld [vmem:[#allocation3] sm:$0xff] }
  0xa4   : > { %619 = vst.msk [vmem:[#allocation3 + $0x28] sm:$0xff] %vm393_vm3, %v609_v23  ;;  %1347 = vmatprep.mubr.bf16.mxu0 %v431_v24 }
  0xa5   : > { %825 = vst.msk [vmem:[#allocation3] sm:$0xff] %vm340_vm2, %v1611_v47 }
  0xa6   : > { %v639_v25 = vpop.permute.xlu0 %638 }
  0xa7   : > { %v641_v26 = vpop.permute.xlu1 %640  ;;  %650 = vst.msk [vmem:[#allocation3 + $0x20] sm:$0xff] %vm426_vm4, %v639_v25  ;;  %v432_v28 = vld [vmem:[#allocation3 + $0x8] sm:$0xff] }
  0xa8   : > { %651 = vst.msk [vmem:[#allocation3 + $0x28] sm:$0xff] %vm426_vm4, %v641_v26  ;;  %1348 = vmatmul.mubr.bf16.vlgmr.msra.gmra.mrb[0].mxu0 %v432_v28 }
  0xa9   : > { %826 = vst.msk [vmem:[#allocation3 + $0x8] sm:$0xff] %vm340_vm2, %v1626_v57  ;;  %1380 = vmatpush3.bf16.msra.mxu0 %v1662_v10 }
  0xaa   : > { %v386_v29 = vpop.permute.xlu0 %385  ;;  %1381 = vmatprep.subr.bf16.mxu0 %v1448_v27 }
  0xab   : > { %v388_v30 = vpop.permute.xlu1 %387  ;;  %396 = vst.msk [vmem:[#allocation3 + $0x10] sm:$0xff] %vm393_vm3, %v386_v29 }
  0xac   : > { %397 = vst.msk [vmem:[#allocation3 + $0x18] sm:$0xff] %vm393_vm3, %v388_v30 }
  0xad   : > { %1382 = vmatpush3.bf16.msra.mxu0 %v1448_v27 }
  0xae   : > { %v419_v32 = vpop.permute.xlu0 %418  ;;  %v654_v34 = vld [vmem:[#allocation3 + $0x20] sm:$0xff]  ;;  %1383 = vmatprep.subr.bf16.mxu0 %v1449_v31 }
  0xaf   : > { %v421_v33 = vpop.permute.xlu1 %420  ;;  %v655_v35 = vld [vmem:[#allocation3 + $0x28] sm:$0xff]  ;;  %429 = vst.msk [vmem:[#allocation3 + $0x10] sm:$0xff] %vm426_vm4, %v419_v32  ;;  %1371 = vmatprep.mubr.bf16.mxu1 %v654_v34 }
  0xb0   : > { %430 = vst.msk [vmem:[#allocation3 + $0x18] sm:$0xff] %vm426_vm4, %v421_v33  ;;  %1372 = vmatmul.mubr.bf16.vlgmr.msra.gmra.mrb[0].mxu1 %v655_v35 }
  0xb1   : > { %1411 = vmatpush3.bf16.msra.mxu1 %v1662_v10  ;;  %1384 = vmatpush3.bf16.msra.mxu0 %v1449_v31 }
  0xb2   : > { %v611_v38 = vpop.permute.xlu0 %610  ;;  %1404 = vmatprep.subr.bf16.mxu1 %v1448_v27  ;;  %1385 = vmatprep.subr.bf16.mxu0 %v1450_v36 }
  0xb3   : > { %v613_v39 = vpop.permute.xlu1 %612  ;;  %620 = vst.msk [vmem:[#allocation3 + $0x30] sm:$0xff] %vm393_vm3, %v611_v38 }
  0xb4   : > { %621 = vst.msk [vmem:[#allocation3 + $0x38] sm:$0xff] %vm393_vm3, %v613_v39 }
  0xb5   : > { %1412 = vmatpush3.bf16.msra.mxu1 %v1448_v27  ;;  %1386 = vmatpush3.bf16.msra.mxu0 %v1450_v36 }
  0xb6   : > { %v643_v42 = vpop.permute.xlu0 %642  ;;  %v433_v44 = vld [vmem:[#allocation3 + $0x10] sm:$0xff]  ;;  %1405 = vmatprep.subr.bf16.mxu1 %v1449_v31  ;;  %1387 = vmatprep.subr.bf16.mxu0 %v1451_v40 }
  0xb7   : > { %v645_v43 = vpop.permute.xlu1 %644  ;;  %v434_v45 = vld [vmem:[#allocation3 + $0x18] sm:$0xff]  ;;  %652 = vst.msk [vmem:[#allocation3 + $0x30] sm:$0xff] %vm426_vm4, %v643_v42  ;;  %1351 = vmatprep.mubr.bf16.mxu0 %v433_v44 }
  0xb8   : > { %653 = vst.msk [vmem:[#allocation3 + $0x38] sm:$0xff] %vm426_vm4, %v645_v43  ;;  %1352 = vmatmul.mubr.bf16.gmra.mrb[4].mxu0 %v434_v45 }
  0xb9   : > { %827 = vst.msk [vmem:[#allocation3 + $0x10] sm:$0xff] %vm340_vm2, %v1640_v1  ;;  %828 = vst.msk [vmem:[#allocation3 + $0x18] sm:$0xff] %vm340_vm2, %v824_v41  ;;  %1413 = vmatpush3.bf16.msra.mxu1 %v1449_v31  ;;  %1388 = vmatpush3.bf16.msra.mxu0 %v1451_v40 }
  0xba   : > { %v846_v47 = vpop.permute.xlu0 %845  ;;  %1406 = vmatprep.subr.bf16.mxu1 %v1450_v36  ;;  %1389 = vmatprep.subr.bf16.mxu0 %v1452_v46 }
  0xbb   : > { %v848_v48 = vpop.permute.xlu1 %847  ;;  %857 = vst.msk [vmem:[#allocation3] sm:$0xff] %vm393_vm3, %v846_v47 }
  0xbc   : > { %858 = vst.msk [vmem:[#allocation3 + $0x8] sm:$0xff] %vm393_vm3, %v848_v48 }
  0xbd   : > { %1414 = vmatpush3.bf16.msra.mxu1 %v1450_v36  ;;  %1390 = vmatpush3.bf16.msra.mxu0 %v1452_v46 }
  0xbe   : > { %v878_v50 = vpop.permute.xlu0 %877  ;;  %v656_v52 = vld [vmem:[#allocation3 + $0x30] sm:$0xff]  ;;  %1407 = vmatprep.subr.bf16.mxu1 %v1451_v40  ;;  %1391 = vmatprep.subr.bf16.mxu0 %v1453_v49 }
  0xbf   : > { %v880_v51 = vpop.permute.xlu1 %879  ;;  %v657_v53 = vld [vmem:[#allocation3 + $0x38] sm:$0xff]  ;;  %889 = vst.msk [vmem:[#allocation3] sm:$0xff] %vm426_vm4, %v878_v50  ;;  %1375 = vmatprep.mubr.bf16.mxu1 %v656_v52 }
  0xc0   : > { %890 = vst.msk [vmem:[#allocation3 + $0x8] sm:$0xff] %vm426_vm4, %v880_v51  ;;  %1376 = vmatmul.mubr.bf16.gmra.mrb[4].mxu1 %v657_v53 }
  0xc1   : > { %1415 = vmatpush3.bf16.msra.mxu1 %v1451_v40  ;;  %1392 = vmatpush3.bf16.msra.mxu0 %v1453_v49 }
  0xc2   : > { %v850_v55 = vpop.permute.xlu0 %849  ;;  %1408 = vmatprep.subr.bf16.mxu1 %v1452_v46  ;;  %1393 = vmatprep.subr.bf16.mxu0 %v1454_v54 }
  0xc3   : > { %v852_v56 = vpop.permute.xlu1 %851  ;;  %859 = vst.msk [vmem:[#allocation3 + $0x10] sm:$0xff] %vm393_vm3, %v850_v55 }
  0xc4   : > { %860 = vst.msk [vmem:[#allocation3 + $0x18] sm:$0xff] %vm393_vm3, %v852_v56 }
  0xc5   : > { %1416 = vmatpush3.bf16.msra.mxu1 %v1452_v46  ;;  %1394 = vmatpush3.bf16.msra.mxu0 %v1454_v54 }
  0xc6   : > { %v882_v57 = vpop.permute.xlu0 %881  ;;  %v893_v59 = vld [vmem:[#allocation3] sm:$0xff]  ;;  %1409 = vmatprep.subr.bf16.mxu1 %v1453_v49 }
  0xc7   : > { %v884_v58 = vpop.permute.xlu1 %883  ;;  %v894_v60 = vld [vmem:[#allocation3 + $0x8] sm:$0xff]  ;;  %891 = vst.msk [vmem:[#allocation3 + $0x10] sm:$0xff] %vm426_vm4, %v882_v57  ;;  %1395 = vmatprep.mubr.bf16.mxu0 %v893_v59 }
  0xc8   : > { %892 = vst.msk [vmem:[#allocation3 + $0x18] sm:$0xff] %vm426_vm4, %v884_v58  ;;  %1396 = vmatmul.mubr.bf16.vlgmr.msra.gmra.mrb[8].mxu0 %v894_v60 }
  0xc9   : > { %1417 = vmatpush3.bf16.msra.mxu1 %v1453_v49 }
  0xca   : > { %1410 = vmatprep.subr.bf16.mxu1 %v1454_v54 }
  0xcd   : > { %1418 = vmatpush3.bf16.msra.mxu1 %v1454_v54 }
  0xce   : > { %v895_v61 = vld [vmem:[#allocation3 + $0x10] sm:$0xff] }
  0xcf   : > { %v896_v62 = vld [vmem:[#allocation3 + $0x18] sm:$0xff]  ;;  %1399 = vmatprep.mubr.bf16.mxu1 %v895_v61 }
  0xd0   : > { %1400 = vmatmul.mubr.bf16.vlgmr.msra.gmra.mrb[8].mxu1 %v896_v62 }
 0x17b   : > { %v1349_v63 = vpop.f32.mrb[0].mxu0 }
 0x17c   : > { %567 = vst.msk [vmem:[#allocation4 + $0x10] sm:$0xff] %vm564_vm5, %v1349_v63  ;;  %v533_v0 = vpop.f32.mrb[1].mxu0 }
 0x17d   : > { %565 = vst.msk [vmem:[#allocation4] sm:$0xff] %vm564_vm5, %v533_v0  ;;  %v1350_v1 = vpop.f32.mrb[2].mxu0 }
 0x17e   : > { %568 = vst.msk [vmem:[#allocation4 + $0x18] sm:$0xff] %vm564_vm5, %v1350_v1  ;;  %v536_v2 = vpop.f32.mrb[3].mxu0 }
 0x17f   : > { %566 = vst.msk [vmem:[#allocation4 + $0x8] sm:$0xff] %vm564_vm5, %v536_v2 }
 0x183   : > { %v1373_v3 = vpop.f32.mrb[0].mxu1  ;;  %v790_v4 = vld [vmem:[#allocation4 + $0x10] sm:$0xff] }
 0x184   : > { %v798_v5 = vadd.f32 %v1373_v3, %v790_v4  ;;  %v757_v6 = vpop.f32.mrb[1].mxu1  ;;  %v788_v7 = vld [vmem:[#allocation4] sm:$0xff] }
 0x185   : > { %v796_v8 = vadd.f32 %v788_v7, %v757_v6  ;;  %v1374_v9 = vpop.f32.mrb[2].mxu1  ;;  %v791_v10 = vld [vmem:[#allocation4 + $0x18] sm:$0xff] }
 0x186   : > { %806 = vst.msk [vmem:[#allocation4 + $0x10] sm:$0xff] %vm564_vm5, %v798_v5  ;;  %v799_v11 = vadd.f32 %v1374_v9, %v791_v10  ;;  %v760_v12 = vpop.f32.mrb[3].mxu1  ;;  %v789_v13 = vld [vmem:[#allocation4 + $0x8] sm:$0xff] }
 0x187   : > { %804 = vst.msk [vmem:[#allocation4] sm:$0xff] %vm564_vm5, %v796_v8  ;;  %v797_v14 = vadd.f32 %v789_v13, %v760_v12 }
 0x188   : > { %807 = vst.msk [vmem:[#allocation4 + $0x18] sm:$0xff] %vm564_vm5, %v799_v11 }
 0x189   : > { %805 = vst.msk [vmem:[#allocation4 + $0x8] sm:$0xff] %vm564_vm5, %v797_v14 }
 0x18b   : > { %v1353_v15 = vpop.f32.mrb[4].mxu0 }
 0x18c   : > { %571 = vst.msk [vmem:[#allocation4 + $0x30] sm:$0xff] %vm564_vm5, %v1353_v15  ;;  %v549_v16 = vpop.f32.mrb[5].mxu0 }
 0x18d   : > { %569 = vst.msk [vmem:[#allocation4 + $0x20] sm:$0xff] %vm564_vm5, %v549_v16  ;;  %v1354_v17 = vpop.f32.mrb[6].mxu0  ;;  %v1029_v32 = vld [vmem:[#allocation4 + $0x10] sm:$0xff] }
 0x18e   : > { %572 = vst.msk [vmem:[#allocation4 + $0x38] sm:$0xff] %vm564_vm5, %v1354_v17  ;;  %v552_v18 = vpop.f32.mrb[7].mxu0  ;;  %v1027_v35 = vld [vmem:[#allocation4] sm:$0xff] }
 0x18f   : > { %570 = vst.msk [vmem:[#allocation4 + $0x28] sm:$0xff] %vm564_vm5, %v552_v18  ;;  %v1030_v38 = vld [vmem:[#allocation4 + $0x18] sm:$0xff] }
 0x190   : > { %v1028_v41 = vld [vmem:[#allocation4 + $0x8] sm:$0xff] }
 0x193   : > { %v1377_v19 = vpop.f32.mrb[4].mxu1  ;;  %v794_v20 = vld [vmem:[#allocation4 + $0x30] sm:$0xff] }
 0x194   : > { %v802_v21 = vadd.f32 %v1377_v19, %v794_v20  ;;  %v773_v22 = vpop.f32.mrb[5].mxu1  ;;  %v792_v23 = vld [vmem:[#allocation4 + $0x20] sm:$0xff] }
 0x195   : > { %v800_v24 = vadd.f32 %v792_v23, %v773_v22  ;;  %v1378_v25 = vpop.f32.mrb[6].mxu1  ;;  %v795_v26 = vld [vmem:[#allocation4 + $0x38] sm:$0xff] }
 0x196   : > { %810 = vst.msk [vmem:[#allocation4 + $0x30] sm:$0xff] %vm564_vm5, %v802_v21  ;;  %v803_v27 = vadd.f32 %v1378_v25, %v795_v26  ;;  %v776_v28 = vpop.f32.mrb[7].mxu1  ;;  %v793_v29 = vld [vmem:[#allocation4 + $0x28] sm:$0xff] }
 0x197   : > { %808 = vst.msk [vmem:[#allocation4 + $0x20] sm:$0xff] %vm564_vm5, %v800_v24  ;;  %v801_v30 = vadd.f32 %v793_v29, %v776_v28 }
 0x198   : > { %811 = vst.msk [vmem:[#allocation4 + $0x38] sm:$0xff] %vm564_vm5, %v803_v27 }
 0x199   : > { %809 = vst.msk [vmem:[#allocation4 + $0x28] sm:$0xff] %vm564_vm5, %v801_v30 }
 0x19b   : > { %v1397_v31 = vpop.f32.mrb[8].mxu0 }
 0x19c   : > { %v1037_v33 = vadd.f32 %v1397_v31, %v1029_v32  ;;  %v996_v34 = vpop.f32.mrb[9].mxu0 }
 0x19d   : > { %v1035_v36 = vadd.f32 %v1027_v35, %v996_v34  ;;  %v1398_v37 = vpop.f32.mrb[10].mxu0  ;;  %v1033_v44 = vld [vmem:[#allocation4 + $0x30] sm:$0xff] }
 0x19e   : > { %1045 = vst.msk [vmem:[#allocation4 + $0x10] sm:$0xff] %vm564_vm5, %v1037_v33  ;;  %v1038_v39 = vadd.f32 %v1398_v37, %v1030_v38  ;;  %v999_v40 = vpop.f32.mrb[11].mxu0  ;;  %v1031_v47 = vld [vmem:[#allocation4 + $0x20] sm:$0xff] }
 0x19f   : > { %1043 = vst.msk [vmem:[#allocation4] sm:$0xff] %vm564_vm5, %v1035_v36  ;;  %v1036_v42 = vadd.f32 %v1028_v41, %v999_v40  ;;  %v1034_v51 = vld [vmem:[#allocation4 + $0x38] sm:$0xff] }
 0x1a0   : > { %1046 = vst.msk [vmem:[#allocation4 + $0x18] sm:$0xff] %vm564_vm5, %v1038_v39  ;;  %v1032_v55 = vld [vmem:[#allocation4 + $0x28] sm:$0xff] }
 0x1a1   : > { %1044 = vst.msk [vmem:[#allocation4 + $0x8] sm:$0xff] %vm564_vm5, %v1036_v42 }
 0x1a3   : > { %v1401_v43 = vpop.f32.mrb[8].mxu1 }
 0x1a4   : > { %v1041_v45 = vadd.f32 %v1401_v43, %v1033_v44  ;;  %v1012_v46 = vpop.f32.mrb[9].mxu1 }
 0x1a5   : > { %v1053_v48 = vld [vmem:[#allocation4 + $0x10] sm:$0xff]  ;;  %v1039_v49 = vadd.f32 %v1031_v47, %v1012_v46  ;;  %v1402_v50 = vpop.f32.mrb[10].mxu1 }
 0x1a6   : > { %1061 = vst.msk [vmem:[%s1530_s10 + $0x10] sm:$0xff] %vm564_vm5, %v1053_v48  ;;  %v1051_v52 = vld [vmem:[#allocation4] sm:$0xff]  ;;  %1049 = vst.msk [vmem:[#allocation4 + $0x30] sm:$0xff] %vm564_vm5, %v1041_v45  ;;  %v1042_v53 = vadd.f32 %v1402_v50, %v1034_v51  ;;  %v1015_v54 = vpop.f32.mrb[11].mxu1  ;;  %v1092_v60 = vmul.f32 %v1053_v48, %v1053_v48  ;;  %v1070_v1 = vsel %vm564_vm5, %v1053_v48, 0.0 }
 0x1a7   : > { %1059 = vst.msk [vmem:[%s1530_s10] sm:$0xff] %vm564_vm5, %v1051_v52  ;;  %v1090_v56 = vmul.f32 %v1051_v52, %v1051_v52  ;;  %v1054_v57 = vld [vmem:[#allocation4 + $0x18] sm:$0xff]  ;;  %1047 = vst.msk [vmem:[#allocation4 + $0x20] sm:$0xff] %vm564_vm5, %v1039_v49  ;;  %v1040_v58 = vadd.f32 %v1032_v55, %v1015_v54  ;;  %v1067_v61 = vsel %vm564_vm5, %v1051_v52, 0.0 }
 0x1a8   : > { %1062 = vst.msk [vmem:[%s1530_s10 + $0x18] sm:$0xff] %vm564_vm5, %v1054_v57  ;;  %v1052_v59 = vld [vmem:[#allocation4 + $0x8] sm:$0xff]  ;;  %1050 = vst.msk [vmem:[#allocation4 + $0x38] sm:$0xff] %vm564_vm5, %v1042_v53  ;;  %v1093_v3 = vmul.f32 %v1054_v57, %v1054_v57  ;;  %v1101_v7 = vsel %vm564_vm5, %v1092_v60, 0.0  ;;  %v1072_v8 = vsel %vm564_vm5, %v1054_v57, 0.0 }
 0x1a9   : > { %1060 = vst.msk [vmem:[%s1530_s10 + $0x8] sm:$0xff] %vm564_vm5, %v1052_v59  ;;  %v1068_v62 = vsel %vm564_vm5, %v1052_v59, 0.0  ;;  %v1091_v63 = vmul.f32 %v1052_v59, %v1052_v59  ;;  %1048 = vst.msk [vmem:[#allocation4 + $0x28] sm:$0xff] %vm564_vm5, %v1040_v58  ;;  %v1098_v2 = vsel %vm564_vm5, %v1090_v56, 0.0 }
 0x1aa   : > { %v1069_v0 = vadd.f32 %v1068_v62, %v1067_v61  ;;  %v1103_v13 = vsel %vm564_vm5, %v1093_v3, 0.0 }
 0x1ab   : > { %v1099_v4 = vsel %vm564_vm5, %v1091_v63, 0.0 }
 0x1ac   : > { %v1071_v5 = vadd.f32 %v1070_v1, %v1069_v0  ;;  %v1100_v6 = vadd.f32 %v1099_v4, %v1098_v2 }
 0x1ad   : > { %v1057_v9 = vld [vmem:[#allocation4 + $0x30] sm:$0xff] }
 0x1ae   : > { %v1102_v10 = vadd.f32 %v1101_v7, %v1100_v6  ;;  %1065 = vst.msk [vmem:[%s1530_s10 + $0x30] sm:$0xff] %vm564_vm5, %v1057_v9  ;;  %v1055_v11 = vld [vmem:[#allocation4 + $0x20] sm:$0xff]  ;;  %v1073_v12 = vadd.f32 %v1072_v8, %v1071_v5  ;;  %v1096_v20 = vmul.f32 %v1057_v9, %v1057_v9  ;;  %v1078_v26 = vsel %vm564_vm5, %v1057_v9, 0.0 }
 0x1af   : > { %1063 = vst.msk [vmem:[%s1530_s10 + $0x20] sm:$0xff] %vm564_vm5, %v1055_v11  ;;  %v1074_v14 = vsel %vm564_vm5, %v1055_v11, 0.0  ;;  %v1094_v15 = vmul.f32 %v1055_v11, %v1055_v11  ;;  %v1058_v16 = vld [vmem:[#allocation4 + $0x38] sm:$0xff] }
 0x1b0   : > { %v1075_v17 = vadd.f32 %v1074_v14, %v1073_v12  ;;  %v1104_v18 = vadd.f32 %v1103_v13, %v1102_v10  ;;  %1066 = vst.msk [vmem:[%s1530_s10 + $0x38] sm:$0xff] %vm564_vm5, %v1058_v16  ;;  %v1056_v19 = vld [vmem:[#allocation4 + $0x28] sm:$0xff]  ;;  %v1097_v27 = vmul.f32 %v1058_v16, %v1058_v16  ;;  %v1109_v31 = vsel %vm564_vm5, %v1096_v20, 0.0 }
 0x1b1   : > { %v1105_v21 = vsel %vm564_vm5, %v1094_v15, 0.0  ;;  %1064 = vst.msk [vmem:[%s1530_s10 + $0x28] sm:$0xff] %vm564_vm5, %v1056_v19  ;;  %v1076_v22 = vsel %vm564_vm5, %v1056_v19, 0.0  ;;  %v1095_v23 = vmul.f32 %v1056_v19, %v1056_v19  ;;  %v1080_v32 = vsel %vm564_vm5, %v1058_v16, 0.0 }
 0x1b2   : > { %v1106_v24 = vadd.f32 %v1105_v21, %v1104_v18  ;;  %v1077_v25 = vadd.f32 %v1076_v22, %v1075_v17  ;;  %v1111_v35 = vsel %vm564_vm5, %v1097_v27, 0.0 }
 0x1b3   : > { %v1107_v28 = vsel %vm564_vm5, %v1095_v23, 0.0 }
 0x1b4   : > { %v1079_v29 = vadd.f32 %v1078_v26, %v1077_v25  ;;  %v1108_v30 = vadd.f32 %v1107_v28, %v1106_v24 }
 0x1b6   : > { %v1081_v33 = vadd.f32 %v1080_v32, %v1079_v29  ;;  %v1110_v34 = vadd.f32 %v1109_v31, %v1108_v30 }
 0x1b8   : > { %v1082_v36 = vrot.slane %v1081_v33, 4  ;;  %v1112_v37 = vadd.f32 %v1111_v35, %v1110_v34 }
 0x1ba   : > { %v1083_v38 = vadd.f32 %v1082_v36, %v1081_v33  ;;  %v1113_v39 = vrot.slane %v1112_v37, 4 }
 0x1bc   : > { %v1084_v40 = vrot.slane %v1083_v38, 2  ;;  %v1114_v41 = vadd.f32 %v1113_v39, %v1112_v37 }
 0x1be   : > { %v1085_v42 = vadd.f32 %v1084_v40, %v1083_v38  ;;  %v1115_v43 = vrot.slane %v1114_v41, 2 }
 0x1c0   : > { %v1086_v44 = vrot.slane %v1085_v42, 1  ;;  %v1116_v45 = vadd.f32 %v1115_v43, %v1114_v41 }
 0x1c2   : > { %v1087_v46 = vadd.f32 %v1086_v44, %v1085_v42  ;;  %v1117_v47 = vrot.slane %v1116_v45, 1 }
 0x1c4   : > { %1089 = vst.msk [vmem:[%s292_s27] sm:$0x1] %vm1088_vm6, %v1087_v46  ;;  %v1118_v48 = vadd.f32 %v1117_v47, %v1116_v45 }
 0x1c6   : > { %1119 = vst.msk [vmem:[%s295_s13] sm:$0x1] %vm1088_vm6, %v1118_v48 }
 0x1c7 PF: > { %s18_s24 = sadd.s32 1, %s1461_s24  }
 0x1c8   : > { %p15_p5 = scmp.ge.s32.totalorder %s18_s24, 4  }
 0x1ca   :  { %17 = sbr.rel (!%p15_p5) target bundleno = 1 (0x1), region = 103 }

// kernel: double_conv_forward.6
= control target key start
LH: loop header
LB: loop body
LE: loop exit
PB: predicated region body
PF: predicated region fallthrough
CT: control target
= control target key end

     0   :  { %s1924_s24 = smov 0   ;;  %s2220_s0 = inlined_call_operand.vmem [shape: f32[2,4,4,8], index: 0, kind: input, shape index: {}]   ;;  %s2221_s1 = inlined_call_operand.vmem [shape: f32[1,1,8], index: 1, kind: input, shape index: {}]   ;;  %s2222_s2 = inlined_call_operand.vmem [shape: f32[1,1,8], index: 2, kind: input, shape index: {}]   ;;  %s2223_s3 = inlined_call_operand.vmem [shape: bf16[5,128,8], index: 3, kind: input, shape index: {}]   ;;  %s2224_s4 = inlined_call_operand.vmem [shape: f32[1,8], index: 4, kind: input, shape index: {}]   ;;  %s2225_s5 = inlined_call_operand.vmem [shape: f32[2,4,4,8], index: 5, kind: output, shape index: {0}]   ;;  %s2226_s6 = inlined_call_operand.vmem [shape: f32[2,1,8], index: 6, kind: output, shape index: {1}]   ;;  %s2227_s7 = inlined_call_operand.vmem [shape: f32[2,1,8], index: 7, kind: output, shape index: {2}]  }
   0x1 LB: > { %s1496_s25 = sadd.s32 4294967295, %s1874_s24   ;;  %p1500_p0 = scmp.ge.s32.totalorder %s1874_s24, 1  ;;  %s1874_s24 = sphi %s1924_s24, %s18_s24  }
   0x2   : > { %p242_p1 = scmp.lt.s32.totalorder %s1874_s24, 3 }
   0x4   : > { %p243_p2 = pnand %p1500_p0, %p242_p1 }
   0x5   : > { %p280_p3 = scmp.lt.s32.totalorder (!%p243_p2), %s1496_s25, 1  ;;  %p1505_p4 = scmp.ne.s32.totalorder (!%p243_p2), %s1496_s25, 0 }
   0x6   : > { %246 = sbr.rel (%p243_p2) target bundleno = 476 (0x1dc), region = 40 }
   0xd   : > { %s1932_s26 = scalar_select %p280_p3, %s1496_s25, 1 }
   0xe   : > { %300 = sbr.rel (%p1505_p4) target bundleno = 21 (0x15), region = 44  ;;  %vm301_vm0 = vcmask (!%p1505_p4), 64512   ;;  %v1876_v0 = vmov (!%p1505_p4), 0.0   ;;  %v1877_v1 = vmov (!%p1505_p4), 0  }
   0xf   : > { %s1615_s27 = sshll.u32 %s1932_s26, 4  ;;  %s292_s30 = scalar_lea.vmem %s2226_s6, %s1932_s26  ;;  %302 = vst.msk [vmem:[#allocation2] sm:$0xff] (!%p1505_p4), %vm301_vm0, %v1876_v0  ;;  %303 = vst.msk [vmem:[#allocation2 + $0x8] sm:$0xff] (!%p1505_p4), %vm301_vm0, %v1876_v0 }
  0x10   : > { %s1942_s10 = scalar_lea.vmem %s2220_s0, %s1615_s27  ;;  %s1947_s13 = scalar_lea.vmem %s2225_s5, %s1615_s27  ;;  %304 = vst.msk [vmem:[#allocation2 + $0x10] sm:$0xff] (!%p1505_p4), %vm301_vm0, %v1876_v0  ;;  %305 = vst.msk [vmem:[#allocation2 + $0x18] sm:$0xff] (!%p1505_p4), %vm301_vm0, %v1876_v0 }
  0x11   : > { %s295_s16 = scalar_lea.vmem %s2227_s7, %s1932_s26  ;;  %306 = vst.msk [vmem:[#allocation2 + $0x20] sm:$0xff] (!%p1505_p4), %vm301_vm0, %v1876_v0  ;;  %307 = vst.msk [vmem:[#allocation2 + $0x28] sm:$0xff] (!%p1505_p4), %vm301_vm0, %v1876_v0 }
  0x12   : > { %308 = vst.msk [vmem:[#allocation2 + $0x30] sm:$0xff] (!%p1505_p4), %vm301_vm0, %v1876_v0  ;;  %309 = vst.msk [vmem:[#allocation2 + $0x38] sm:$0xff] (!%p1505_p4), %vm301_vm0, %v1876_v0 }
  0x13   : > { %310 = vst [vmem:[#allocation3] sm:$0xff] (!%p1505_p4), %v1877_v1  ;;  %311 = vst [vmem:[#allocation3 + $0x8] sm:$0xff] (!%p1505_p4), %v1877_v1 }
  0x15 PF: > { %v312_v2 = vld [vmem:[%s1942_s10] sm:$0xf]  ;;  %v313_v3 = vld [vmem:[%s1942_s10 + $0x4] sm:$0xf]  ;;  %vm343_vm1 = vcmask 60416   ;;  %v1878_v14 = vmov 0.0  }
  0x16   : > { %v1506_v4 = vld [vmem:[%s2221_s1] ss:$0 sm:$0xff]  ;;  %v314_v12 = vld [vmem:[%s1942_s10 + $0x8] sm:$0xf]  ;;  %1662 = vmatprep.subr.bf16.mxu0 %v1878_v14  ;;  %1682 = vmatprep.subr.bf16.mxu1 %v1878_v14  ;;  %v315_v15 = vld [vmem:[%s1942_s10 + $0xc] sm:$0xf] }
  0x17   : > { %v323_v5 = vmul.f32 %v1506_v4, %v312_v2  ;;  %v324_v6 = vmul.f32 %v1506_v4, %v313_v3  ;;  %v1507_v7 = vld [vmem:[%s2222_s2] ss:$0 sm:$0xff]  ;;  %v325_v13 = vmul.f32 %v1506_v4, %v314_v12  ;;  %v326_v17 = vmul.f32 %v1506_v4, %v315_v15  ;;  %v1778_v18 = vld [vmem:[#allocation2 + $0x1] ss:$8 sps:$4 sm:$0xff]   ;;  %s1879_s27 = smov 8   ;;  %s1880_s28 = smov 24  }
  0x18   : > { %v1780_v19 = vld [vmem:[#allocation2 + $0x3] ss:$8 sps:$4 sm:$0xff]   ;;  %s1881_s29 = smov 16   ;;  %s1882_s8 = smov 32   ;;  %vm1883_vm2 = vmmov 0   ;;  %vm361_vm3 = vcmask 64512  }
  0x19   : > { %v334_v8 = vadd.f32 %v1507_v7, %v323_v5  ;;  %v335_v9 = vadd.f32 %v1507_v7, %v324_v6  ;;  %v336_v16 = vadd.f32 %v1507_v7, %v325_v13  ;;  %v337_v21 = vadd.f32 %v1507_v7, %v326_v17  ;;  %v1818_v22 = vld [vmem:[%s2223_s3] sm:$0xff]   ;;  %v1819_v26 = vld [vmem:[%s2223_s3 + $0x8] sm:$0xff]   ;;  %v1811_v5 = vld [vmem:[#allocation2 + $0x31] ss:$8 sps:$4 sm:$0xff]   ;;  %1678 = vmatprep.mubr.msk.bf16.mxu0 %vm1883_vm2, %v1878_v14 }
  0x1a   : > { %v1782_v23 = vld [vmem:[#allocation2 + $0x2] ss:$8 sps:$4 sm:$0xff]   ;;  %1663 = vmatpush3.bf16.msra.mxu0 %v1818_v22  ;;  %v1815_v12 = vld [vmem:[#allocation2 + $0x33] ss:$8 sps:$4 sm:$0xff]   ;;  %1698 = vmatprep.mubr.msk.bf16.mxu1 %vm1883_vm2, %v1878_v14  ;;  %vm380_vm4 = vcmask 130112   ;;  %vm399_vm5 = vcmask 195712  }
  0x1b   : > { %v338_v10 = vmax.f32 %v334_v8, 0.0  ;;  %v339_v11 = vmax.f32 %v335_v9, 0.0  ;;  %v340_v20 = vmax.f32 %v336_v16, 0.0  ;;  %v1784_v24 = vld [vmem:[#allocation2 + $0x4] ss:$8 sps:$4 sm:$0xff]   ;;  %v341_v25 = vmax.f32 %v337_v21, 0.0  ;;  %1664 = vmatprep.subr.bf16.mxu0 %v1878_v14 }
  0x1c   : > { %v1817_v15 = vld [vmem:[#allocation2 + $0x34] ss:$8 sps:$4 sm:$0xff]   ;;  %v1823_v21 = vld [vmem:[%s2223_s3 + $0x48] sm:$0xff]   ;;  %vm418_vm6 = vcmask 261312   ;;  %vm437_vm7 = vcmask 326912   ;;  %vm1377_vm8 = vcmask 57344  }
  0x1d   : > { %344 = vst.msk [vmem:[#allocation2 + $0x12] sm:$0xf] %vm343_vm1, %v338_v10  ;;  %345 = vst.msk [vmem:[#allocation2 + $0x1a] sm:$0xf] %vm343_vm1, %v339_v11  ;;  %v1813_v10 = vld [vmem:[#allocation2 + $0x32] ss:$8 sps:$4 sm:$0xff]  }
  0x1e   : > { %346 = vst.msk [vmem:[#allocation2 + $0x22] sm:$0xf] %vm343_vm1, %v340_v20  ;;  %347 = vst.msk [vmem:[#allocation2 + $0x2a] sm:$0xf] %vm343_vm1, %v341_v25  ;;  %1665 = vmatpush3.bf16.msra.mxu0 %v1819_v26  ;;  %v1820_v17 = vld [vmem:[%s2223_s3 + $0x10] sm:$0xff]   ;;  %v1822_v20 = vld [vmem:[%s2223_s3 + $0x18] sm:$0xff]  }
  0x1f   : > { %1666 = vmatprep.subr.bf16.mxu0 %v1878_v14  ;;  %v1825_v25 = vld [vmem:[%s2223_s3 + $0x50] sm:$0xff]   ;;  %v1826_v26 = vld [vmem:[#allocation2] ss:$8 sps:$4 sm:$0xff]  }
  0x22   : > { %1667 = vmatpush3.bf16.msra.mxu0 %v1820_v17  ;;  %v1851_v17 = vld [vmem:[%s2223_s3 + $0xe0] sm:$0xff]  }
  0x23   : > { %1668 = vmatprep.subr.bf16.mxu0 %v1878_v14 }
  0x24   : > { %v1779_v27 = vld [vmem:[#allocation2 + $0x11] ss:$8 sps:$4 sm:$0xff]  }
  0x25   : > { %v1781_v28 = vld [vmem:[#allocation2 + $0x13] ss:$8 sps:$4 sm:$0xff]   ;;  %v375_v29 = vpack.c.bf16 %v1779_v27, %v1778_v18  ;;  %v1795_v47 = vld [vmem:[#allocation2 + $0x21] ss:$8 sps:$4 sm:$0xff]  }
  0x26   : > { %v1783_v30 = vld [vmem:[#allocation2 + $0x12] ss:$8 sps:$4 sm:$0xff]   ;;  %v413_v31 = vpack.c.bf16 %v1781_v28, %v1780_v19  ;;  %v1797_v50 = vld [vmem:[#allocation2 + $0x22] ss:$8 sps:$4 sm:$0xff]   ;;  %1669 = vmatpush3.bf16.msra.mxu0 %v1822_v20 }
  0x27   : > { %v1785_v32 = vld [vmem:[#allocation2 + $0x14] ss:$8 sps:$4 sm:$0xff]   ;;  %377 = vrot.lane.b32.xlu0 %v375_v29, %s1879_s27  ;;  %v394_v33 = vpack.c.bf16 %v1783_v30, %v1782_v23  ;;  %v1799_v53 = vld [vmem:[#allocation2 + $0x23] ss:$8 sps:$4 sm:$0xff]   ;;  %1670 = vmatprep.subr.bf16.mxu0 %v1878_v14  ;;  %v1827_v27 = vld [vmem:[#allocation2 + $0x10] ss:$8 sps:$4 sm:$0xff]  }
  0x28   : > { %v1786_v34 = vld [vmem:[#allocation2 + $0x9] ss:$8 sps:$4 sm:$0xff]   ;;  %415 = vrot.lane.b32.xlu1 %v413_v31, %s1880_s28  ;;  %v432_v35 = vpack.c.bf16 %v1785_v32, %v1784_v24  ;;  %v1787_v37 = vld [vmem:[#allocation2 + $0x19] ss:$8 sps:$4 sm:$0xff]   ;;  %v360_v28 = vpack.c.bf16 %v1827_v27, %v1826_v26 }
  0x29   : > { %v1788_v36 = vld [vmem:[#allocation2 + $0xa] ss:$8 sps:$4 sm:$0xff]   ;;  %v1789_v38 = vld [vmem:[#allocation2 + $0x1a] ss:$8 sps:$4 sm:$0xff]   ;;  %v575_v39 = vpack.c.bf16 %v1787_v37, %v1786_v34 }
  0x2a   : > { %v1790_v40 = vld [vmem:[#allocation2 + $0xb] ss:$8 sps:$4 sm:$0xff]   ;;  %v1791_v41 = vld [vmem:[#allocation2 + $0x1b] ss:$8 sps:$4 sm:$0xff]   ;;  %v593_v42 = vpack.c.bf16 %v1789_v38, %v1788_v36  ;;  %362 = vst.msk [vmem:[#allocation3] sm:$0xff] %vm361_vm3, %v360_v28 }
  0x2b   : > { %396 = vrot.lane.b32.xlu0 %v394_v33, %s1881_s29  ;;  %v1792_v43 = vld [vmem:[#allocation2 + $0xc] ss:$8 sps:$4 sm:$0xff]   ;;  %v1793_v44 = vld [vmem:[#allocation2 + $0x1c] ss:$8 sps:$4 sm:$0xff]   ;;  %v611_v45 = vpack.c.bf16 %v1791_v41, %v1790_v40  ;;  %v1832_v31 = vld [vmem:[#allocation2 + $0x8] ss:$8 sps:$4 sm:$0xff]  }
  0x2c   : > { %434 = vrot.lane.b32.xlu1 %v432_v35, %s1882_s8  ;;  %v1794_v46 = vld [vmem:[#allocation2 + $0x11] ss:$8 sps:$4 sm:$0xff]   ;;  %v629_v48 = vpack.c.bf16 %v1793_v44, %v1792_v43  ;;  %v1801_v56 = vld [vmem:[#allocation2 + $0x24] ss:$8 sps:$4 sm:$0xff]  }
  0x2d   : > { %v1796_v49 = vld [vmem:[#allocation2 + $0x12] ss:$8 sps:$4 sm:$0xff]   ;;  %v774_v51 = vpack.c.bf16 %v1795_v47, %v1794_v46  ;;  %v1810_v7 = vld [vmem:[#allocation2 + $0x21] ss:$8 sps:$4 sm:$0xff]  }
  0x2e   : > { %v1798_v52 = vld [vmem:[#allocation2 + $0x13] ss:$8 sps:$4 sm:$0xff]   ;;  %v792_v54 = vpack.c.bf16 %v1797_v50, %v1796_v49  ;;  %v1812_v9 = vld [vmem:[#allocation2 + $0x22] ss:$8 sps:$4 sm:$0xff]   ;;  %v1174_v16 = vpack.c.bf16 %v1811_v5, %v1810_v7 }
  0x2f   : > { %577 = vrot.lane.b32.xlu0 %v575_v39, %s1879_s27  ;;  %v1800_v55 = vld [vmem:[#allocation2 + $0x14] ss:$8 sps:$4 sm:$0xff]   ;;  %v810_v58 = vpack.c.bf16 %v1799_v53, %v1798_v52  ;;  %v1814_v11 = vld [vmem:[#allocation2 + $0x23] ss:$8 sps:$4 sm:$0xff]   ;;  %v1192_v18 = vpack.c.bf16 %v1813_v10, %v1812_v9  ;;  %v1845_v44 = vld [vmem:[#allocation2 + $0x10] ss:$8 sps:$4 sm:$0xff]  }
  0x30   : > { %595 = vrot.lane.b32.xlu1 %v593_v42, %s1881_s29  ;;  %v1802_v57 = vld [vmem:[#allocation2 + $0x19] ss:$8 sps:$4 sm:$0xff]   ;;  %v1803_v59 = vld [vmem:[#allocation2 + $0x29] ss:$8 sps:$4 sm:$0xff]   ;;  %v828_v60 = vpack.c.bf16 %v1801_v56, %v1800_v55  ;;  %v1210_v22 = vpack.c.bf16 %v1815_v12, %v1814_v11 }
  0x31   : > { %v1804_v61 = vld [vmem:[#allocation2 + $0x1a] ss:$8 sps:$4 sm:$0xff]   ;;  %v1805_v62 = vld [vmem:[#allocation2 + $0x2a] ss:$8 sps:$4 sm:$0xff]   ;;  %v974_v1 = vpack.c.bf16 %v1803_v59, %v1802_v57 }
  0x32   : > { %v1806_v63 = vld [vmem:[#allocation2 + $0x1b] ss:$8 sps:$4 sm:$0xff]   ;;  %v1807_v0 = vld [vmem:[#allocation2 + $0x2b] ss:$8 sps:$4 sm:$0xff]   ;;  %v992_v3 = vpack.c.bf16 %v1805_v62, %v1804_v61 }
  0x33   : > { %613 = vrot.lane.b32.xlu0 %v611_v45, %s1880_s28  ;;  %v1808_v2 = vld [vmem:[#allocation2 + $0x1c] ss:$8 sps:$4 sm:$0xff]   ;;  %v1809_v4 = vld [vmem:[#allocation2 + $0x2c] ss:$8 sps:$4 sm:$0xff]   ;;  %v1010_v6 = vpack.c.bf16 %v1807_v0, %v1806_v63  ;;  %v1833_v32 = vld [vmem:[#allocation2 + $0x18] ss:$8 sps:$4 sm:$0xff]  }
  0x34   : > { %631 = vrot.lane.b32.xlu1 %v629_v48, %s1882_s8  ;;  %v1028_v8 = vpack.c.bf16 %v1809_v4, %v1808_v2  ;;  %v1816_v13 = vld [vmem:[#allocation2 + $0x24] ss:$8 sps:$4 sm:$0xff]   ;;  %v1829_v30 = vld [vmem:[%s2223_s3 + $0x58] sm:$0xff]   ;;  %v1830_v33 = vld [vmem:[%s2223_s3 + $0x30] sm:$0xff]   ;;  %v560_v35 = vpack.c.bf16 %v1833_v32, %v1832_v31 }
  0x35   : > { %v1821_v19 = vld [vmem:[%s2223_s3 + $0x40] sm:$0xff]   ;;  %v1228_v24 = vpack.c.bf16 %v1817_v15, %v1816_v13  ;;  %v1828_v29 = vld [vmem:[%s2223_s3 + $0x28] sm:$0xff]   ;;  %v1834_v36 = vld [vmem:[%s2223_s3 + $0x38] sm:$0xff]  }
  0x36   : > { %1683 = vmatpush3.bf16.msra.mxu1 %v1821_v19  ;;  %v1824_v23 = vld [vmem:[%s2223_s3 + $0x20] sm:$0xff]   ;;  %562 = vst.msk [vmem:[#allocation3 + $0x8] sm:$0xff] %vm361_vm3, %v560_v35  ;;  %v1835_v37 = vld [vmem:[%s2223_s3 + $0x68] sm:$0xff]   ;;  %v1837_v38 = vld [vmem:[%s2223_s3 + $0x70] sm:$0xff]  }
  0x37   : > { %776 = vrot.lane.b32.xlu0 %v774_v51, %s1879_s27  ;;  %1684 = vmatprep.subr.bf16.mxu1 %v1878_v14  ;;  %v1831_v34 = vld [vmem:[%s2223_s3 + $0x60] sm:$0xff]   ;;  %v1839_v39 = vld [vmem:[%s2223_s3 + $0x78] sm:$0xff]   ;;  %v1838_v55 = vld [vmem:[%s2223_s3 + $0x88] sm:$0xff]  }
  0x38   : > { %794 = vrot.lane.b32.xlu1 %v792_v54, %s1881_s29  ;;  %1671 = vmatpush3.bf16.msra.mxu0 %v1824_v23  ;;  %v1846_v45 = vld [vmem:[#allocation2 + $0x20] ss:$8 sps:$4 sm:$0xff]   ;;  %v1847_v7 = vld [vmem:[%s2223_s3 + $0xd0] sm:$0xff]   ;;  %v1849_v12 = vld [vmem:[%s2223_s3 + $0xd8] sm:$0xff]  }
  0x39   : > { %1672 = vmatprep.subr.bf16.mxu0 %v1878_v14  ;;  %v760_v48 = vpack.c.bf16 %v1846_v45, %v1845_v44  ;;  %v1836_v50 = vld [vmem:[%s2223_s3 + $0x80] sm:$0xff]   ;;  %v1853_v54 = vld [vmem:[#allocation2 + $0x28] ss:$8 sps:$4 sm:$0xff]  }
  0x3a   : > { %1685 = vmatpush3.bf16.msra.mxu1 %v1823_v21  ;;  %v1852_v53 = vld [vmem:[#allocation2 + $0x18] ss:$8 sps:$4 sm:$0xff]   ;;  %v1843_v2 = vld [vmem:[%s2223_s3 + $0xc8] sm:$0xff]   ;;  %v1857_v23 = vld [vmem:[%s2223_s3 + $0xf0] sm:$0xff]  }
  0x3b   : > { %812 = vrot.lane.b32.xlu0 %v810_v58, %s1880_s28  ;;  %1686 = vmatprep.subr.bf16.mxu1 %v1878_v14  ;;  %v960_v58 = vpack.c.bf16 %v1853_v54, %v1852_v53  ;;  %v1841_v59 = vld [vmem:[%s2223_s3 + $0xc0] sm:$0xff]   ;;  %v1848_v13 = vld [vmem:[%s2223_s3 + $0xa8] sm:$0xff]   ;;  %v1860_v28 = vld [vmem:[%s2223_s3 + $0x110] sm:$0xff]  }
  0x3c   : > { %830 = vrot.lane.b32.xlu1 %v828_v60, %s1882_s8  ;;  %1673 = vmatpush3.bf16.msra.mxu0 %v1828_v29  ;;  %v1840_v60 = vld [vmem:[%s2223_s3 + $0x90] sm:$0xff]   ;;  %v1863_v0 = vld [vmem:[#allocation2 + $0x20] ss:$8 sps:$4 sm:$0xff]   ;;  %v1861_v29 = vld [vmem:[%s2223_s3 + $0x118] sm:$0xff]  }
  0x3d   : > { %1674 = vmatprep.subr.bf16.mxu0 %v1878_v14  ;;  %v1855_v21 = vld [vmem:[%s2223_s3 + $0xe8] sm:$0xff]   ;;  %v1866_v32 = vld [vmem:[%s2223_s3 + $0x130] sm:$0xff]  }
  0x3e   : > { %1687 = vmatpush3.bf16.msra.mxu1 %v1825_v25  ;;  %v1859_v25 = vld [vmem:[%s2223_s3 + $0xf8] sm:$0xff]   ;;  %v1858_v26 = vld [vmem:[%s2223_s3 + $0x108] sm:$0xff]  }
  0x3f   : > { %976 = vrot.lane.b32.xlu0 %v974_v1, %s1879_s27  ;;  %1688 = vmatprep.subr.bf16.mxu1 %v1878_v14  ;;  %v1864_v1 = vld [vmem:[#allocation2 + $0x30] ss:$8 sps:$4 sm:$0xff]   ;;  %v1865_v31 = vld [vmem:[%s2223_s3 + $0x128] sm:$0xff]  }
  0x40   : > { %994 = vrot.lane.b32.xlu1 %v992_v3, %s1881_s29  ;;  %1675 = vmatpush3.bf16.msra.mxu0 %v1830_v33  ;;  %v1842_v3 = vld [vmem:[%s2223_s3 + $0x98] sm:$0xff]  }
  0x41   : > { %1676 = vmatprep.subr.bf16.mxu0 %v1878_v14  ;;  %v1867_v33 = vld [vmem:[%s2223_s3 + $0x138] sm:$0xff]  }
  0x42   : > { %1689 = vmatpush3.bf16.msra.mxu1 %v1829_v30  ;;  %v1862_v30 = vld [vmem:[%s2223_s3 + $0x120] sm:$0xff]  }
  0x43   : > { %1012 = vrot.lane.b32.xlu0 %v1010_v6, %s1880_s28  ;;  %1690 = vmatprep.subr.bf16.mxu1 %v1878_v14  ;;  %v1160_v6 = vpack.c.bf16 %v1864_v1, %v1863_v0 }
  0x44   : > { %1030 = vrot.lane.b32.xlu1 %v1028_v8, %s1882_s8  ;;  %1677 = vmatpush3.bf16.msra.mxu0 %v1834_v36  ;;  %v1844_v8 = vld [vmem:[%s2223_s3 + $0xa0] sm:$0xff]  }
  0x45   : > { %1702 = vmatprep.subr.bf16.mxu0 %v1878_v14 }
  0x46   : > { %1691 = vmatpush3.bf16.msra.mxu1 %v1831_v34 }
  0x47   : > { %1176 = vrot.lane.b32.xlu0 %v1174_v16, %s1879_s27  ;;  %1692 = vmatprep.subr.bf16.mxu1 %v1878_v14 }
  0x48   : > { %1194 = vrot.lane.b32.xlu1 %v1192_v18, %s1881_s29  ;;  %v1850_v18 = vld [vmem:[%s2223_s3 + $0xb0] sm:$0xff]  }
  0x4a   : > { %1693 = vmatpush3.bf16.msra.mxu1 %v1835_v37 }
  0x4b   : > { %1212 = vrot.lane.b32.xlu0 %v1210_v22, %s1880_s28  ;;  %1694 = vmatprep.subr.bf16.mxu1 %v1878_v14  ;;  %v1854_v22 = vld [vmem:[%s2223_s3 + $0xb8] sm:$0xff]  }
  0x4c   : > { %1230 = vrot.lane.b32.xlu1 %v1228_v24, %s1882_s8  ;;  %v1856_v24 = vld [vmem:[%s2223_s3 + $0x100] sm:$0xff]  }
  0x4e   : > { %1695 = vmatpush3.bf16.msra.mxu1 %v1837_v38 }
  0x4f   : > { %1696 = vmatprep.subr.bf16.mxu1 %v1878_v14 }
  0x52   : > { %1697 = vmatpush3.bf16.msra.mxu1 %v1839_v39 }
  0x53   : > { %1722 = vmatprep.subr.bf16.mxu1 %v1878_v14 }
  0x99   : > { %v378_v40 = vpop.permute.xlu0 %377 }
  0x9a   : > { %381 = vst.msk [vmem:[#allocation3] sm:$0xff] %vm380_vm4, %v378_v40  ;;  %v416_v41 = vpop.permute.xlu1 %415 }
  0x9d   : > { %v397_v42 = vpop.permute.xlu0 %396 }
  0x9e   : > { %400 = vst.msk [vmem:[#allocation3] sm:$0xff] %vm399_vm5, %v397_v42  ;;  %v435_v43 = vpop.permute.xlu1 %434 }
  0x9f   : > { %419 = vst.msk [vmem:[#allocation3] sm:$0xff] %vm418_vm6, %v416_v41 }
  0xa0   : > { %438 = vst.msk [vmem:[#allocation3] sm:$0xff] %vm437_vm7, %v435_v43 }
  0xa1   : > { %v578_v46 = vpop.permute.xlu0 %577 }
  0xa2   : > { %580 = vst.msk [vmem:[#allocation3 + $0x8] sm:$0xff] %vm380_vm4, %v578_v46  ;;  %v596_v47 = vpop.permute.xlu1 %595 }
  0xa3   : > { %598 = vst.msk [vmem:[#allocation3 + $0x8] sm:$0xff] %vm399_vm5, %v596_v47 }
  0xa5   : > { %v614_v49 = vpop.permute.xlu0 %613 }
  0xa6   : > { %616 = vst.msk [vmem:[#allocation3 + $0x8] sm:$0xff] %vm418_vm6, %v614_v49  ;;  %v632_v51 = vpop.permute.xlu1 %631 }
  0xa7   : > { %634 = vst.msk [vmem:[#allocation3 + $0x8] sm:$0xff] %vm437_vm7, %v632_v51  ;;  %v439_v52 = vld [vmem:[#allocation3] sm:$0xff] }
  0xa8   : > { %1679 = vmatmul.mubr.bf16.vlgmr.msra.gmra.mrb[0].mxu0 %v439_v52  ;;  %761 = vst.msk [vmem:[#allocation3] sm:$0xff] %vm361_vm3, %v760_v48 }
  0xa9   : > { %1703 = vmatpush3.bf16.msra.mxu0 %v1836_v50  ;;  %v777_v56 = vpop.permute.xlu0 %776  ;;  %1718 = vmatprep.mubr.msk.bf16.mxu0 %vm1883_vm2, %v1878_v14 }
  0xaa   : > { %1704 = vmatprep.subr.bf16.mxu0 %v1878_v14  ;;  %779 = vst.msk [vmem:[#allocation3] sm:$0xff] %vm380_vm4, %v777_v56  ;;  %v795_v57 = vpop.permute.xlu1 %794 }
  0xab   : > { %797 = vst.msk [vmem:[#allocation3] sm:$0xff] %vm399_vm5, %v795_v57 }
  0xad   : > { %1705 = vmatpush3.bf16.msra.mxu0 %v1838_v55  ;;  %v813_v61 = vpop.permute.xlu0 %812 }
  0xae   : > { %1706 = vmatprep.subr.bf16.mxu0 %v1878_v14  ;;  %v635_v62 = vld [vmem:[#allocation3 + $0x8] sm:$0xff]  ;;  %815 = vst.msk [vmem:[#allocation3] sm:$0xff] %vm418_vm6, %v813_v61  ;;  %v831_v63 = vpop.permute.xlu1 %830 }
  0xaf   : > { %1699 = vmatmul.mubr.bf16.vlgmr.msra.gmra.mrb[0].mxu1 %v635_v62  ;;  %833 = vst.msk [vmem:[#allocation3] sm:$0xff] %vm437_vm7, %v831_v63 }
  0xb0   : > { %961 = vst.msk [vmem:[#allocation3 + $0x8] sm:$0xff] %vm361_vm3, %v960_v58  ;;  %1723 = vmatpush3.bf16.msra.mxu1 %v1841_v59  ;;  %1738 = vmatprep.mubr.msk.bf16.mxu1 %vm1883_vm2, %v1878_v14 }
  0xb1   : > { %1707 = vmatpush3.bf16.msra.mxu0 %v1840_v60  ;;  %1724 = vmatprep.subr.bf16.mxu1 %v1878_v14  ;;  %v977_v4 = vpop.permute.xlu0 %976 }
  0xb2   : > { %1708 = vmatprep.subr.bf16.mxu0 %v1878_v14  ;;  %979 = vst.msk [vmem:[#allocation3 + $0x8] sm:$0xff] %vm380_vm4, %v977_v4  ;;  %v995_v5 = vpop.permute.xlu1 %994 }
  0xb3   : > { %997 = vst.msk [vmem:[#allocation3 + $0x8] sm:$0xff] %vm399_vm5, %v995_v5 }
  0xb4   : > { %1725 = vmatpush3.bf16.msra.mxu1 %v1843_v2 }
  0xb5   : > { %1709 = vmatpush3.bf16.msra.mxu0 %v1842_v3  ;;  %1726 = vmatprep.subr.bf16.mxu1 %v1878_v14  ;;  %v1013_v9 = vpop.permute.xlu0 %1012 }
  0xb6   : > { %1710 = vmatprep.subr.bf16.mxu0 %v1878_v14  ;;  %1015 = vst.msk [vmem:[#allocation3 + $0x8] sm:$0xff] %vm418_vm6, %v1013_v9  ;;  %v834_v10 = vld [vmem:[#allocation3] sm:$0xff]  ;;  %v1031_v11 = vpop.permute.xlu1 %1030 }
  0xb7   : > { %1033 = vst.msk [vmem:[#allocation3 + $0x8] sm:$0xff] %vm437_vm7, %v1031_v11 }
  0xb8   : > { %1161 = vst.msk [vmem:[#allocation3] sm:$0xff] %vm361_vm3, %v1160_v6  ;;  %1727 = vmatpush3.bf16.msra.mxu1 %v1847_v7  ;;  %v1612_v6 = vld [vmem:[%s2224_s4] ss:$0 sm:$0xff] }
  0xb9   : > { %1711 = vmatpush3.bf16.msra.mxu0 %v1844_v8  ;;  %1728 = vmatprep.subr.bf16.mxu1 %v1878_v14  ;;  %v1177_v15 = vpop.permute.xlu0 %1176 }
  0xba   : > { %1712 = vmatprep.subr.bf16.mxu0 %v1878_v14  ;;  %1179 = vst.msk [vmem:[#allocation3] sm:$0xff] %vm380_vm4, %v1177_v15  ;;  %v1195_v16 = vpop.permute.xlu1 %1194 }
  0xbb   : > { %1197 = vst.msk [vmem:[#allocation3] sm:$0xff] %vm399_vm5, %v1195_v16 }
  0xbc   : > { %1729 = vmatpush3.bf16.msra.mxu1 %v1849_v12 }
  0xbd   : > { %1713 = vmatpush3.bf16.msra.mxu0 %v1848_v13  ;;  %1730 = vmatprep.subr.bf16.mxu1 %v1878_v14  ;;  %v1213_v19 = vpop.permute.xlu0 %1212 }
  0xbe   : > { %1714 = vmatprep.subr.bf16.mxu0 %v1878_v14  ;;  %1215 = vst.msk [vmem:[#allocation3] sm:$0xff] %vm418_vm6, %v1213_v19  ;;  %v1231_v20 = vpop.permute.xlu1 %1230  ;;  %v1034_v27 = vld [vmem:[#allocation3 + $0x8] sm:$0xff] }
  0xbf   : > { %1233 = vst.msk [vmem:[#allocation3] sm:$0xff] %vm437_vm7, %v1231_v20 }
  0xc0   : > { %1731 = vmatpush3.bf16.msra.mxu1 %v1851_v17 }
  0xc1   : > { %1715 = vmatpush3.bf16.msra.mxu0 %v1850_v18  ;;  %1732 = vmatprep.subr.bf16.mxu1 %v1878_v14 }
  0xc2   : > { %1716 = vmatprep.subr.bf16.mxu0 %v1878_v14 }
  0xc4   : > { %1733 = vmatpush3.bf16.msra.mxu1 %v1855_v21 }
  0xc5   : > { %1717 = vmatpush3.bf16.msra.mxu0 %v1854_v22  ;;  %1734 = vmatprep.subr.bf16.mxu1 %v1878_v14 }
  0xc6   : > { %1742 = vmatprep.subr.bf16.mxu0 %v1878_v14  ;;  %v1234_v34 = vld [vmem:[#allocation3] sm:$0xff] }
  0xc8   : > { %1719 = vmatmul.mubr.bf16.vlgmr.msra.gmra.mrb[4].mxu0 %v834_v10  ;;  %1735 = vmatpush3.bf16.msra.mxu1 %v1857_v23 }
  0xc9   : > { %1743 = vmatpush3.bf16.msra.mxu0 %v1856_v24  ;;  %1736 = vmatprep.subr.bf16.mxu1 %v1878_v14 }
  0xca   : > { %1744 = vmatprep.subr.bf16.mxu0 %v1878_v14  ;;  %1758 = vmatprep.mubr.msk.bf16.mxu0 %vm1883_vm2, %v1878_v14 }
  0xcc   : > { %1737 = vmatpush3.bf16.msra.mxu1 %v1859_v25 }
  0xcd   : > { %1745 = vmatpush3.bf16.msra.mxu0 %v1858_v26 }
  0xce   : > { %1746 = vmatprep.subr.bf16.mxu0 %v1878_v14 }
  0xcf   : > { %1739 = vmatmul.mubr.bf16.vlgmr.msra.gmra.mrb[4].mxu1 %v1034_v27 }
  0xd1   : > { %1747 = vmatpush3.bf16.msra.mxu0 %v1860_v28 }
  0xd2   : > { %1748 = vmatprep.subr.bf16.mxu0 %v1878_v14 }
  0xd5   : > { %1749 = vmatpush3.bf16.msra.mxu0 %v1861_v29 }
  0xd6   : > { %1750 = vmatprep.subr.bf16.mxu0 %v1878_v14 }
  0xd9   : > { %1751 = vmatpush3.bf16.msra.mxu0 %v1862_v30 }
  0xda   : > { %1752 = vmatprep.subr.bf16.mxu0 %v1878_v14 }
  0xdd   : > { %1753 = vmatpush3.bf16.msra.mxu0 %v1865_v31 }
  0xde   : > { %1754 = vmatprep.subr.bf16.mxu0 %v1878_v14 }
  0xe1   : > { %1755 = vmatpush3.bf16.msra.mxu0 %v1866_v32 }
  0xe2   : > { %1756 = vmatprep.subr.bf16.mxu0 %v1878_v14 }
  0xe5   : > { %1757 = vmatpush3.bf16.msra.mxu0 %v1867_v33 }
  0xe8   : > { %1759 = vmatmul.mubr.bf16.vlgmr.msra.gmra.mrb[8].mxu0 %v1234_v34 }
 0x17b   : > { %v538_v35 = vpop.f32.mrb[0].mxu0 }
 0x17c   : > { %545 = vst.msk [vmem:[#allocation4] sm:$0xff] %vm361_vm3, %v538_v35  ;;  %v1680_v36 = vpop.f32.mrb[1].mxu0 }
 0x17d   : > { %v541_v37 = vpop.f32.mrb[2].mxu0 }
 0x17e   : > { %546 = vst.msk [vmem:[#allocation4 + $0x8] sm:$0xff] %vm361_vm3, %v541_v37  ;;  %v1681_v38 = vpop.f32.mrb[3].mxu0 }
 0x182   : > { %v735_v39 = vpop.f32.mrb[0].mxu1 }
 0x183   : > { %v742_v40 = vld [vmem:[#allocation4] sm:$0xff]  ;;  %v1700_v41 = vpop.f32.mrb[1].mxu1 }
 0x184   : > { %v744_v42 = vadd.f32 %v742_v40, %v735_v39  ;;  %v738_v43 = vpop.f32.mrb[2].mxu1 }
 0x185   : > { %v743_v44 = vld [vmem:[#allocation4 + $0x8] sm:$0xff]  ;;  %v1701_v45 = vpop.f32.mrb[3].mxu1 }
 0x186   : > { %746 = vst.msk [vmem:[#allocation4] sm:$0xff] %vm361_vm3, %v744_v42  ;;  %v745_v14 = vadd.f32 %v743_v44, %v738_v43 }
 0x188   : > { %747 = vst.msk [vmem:[#allocation4 + $0x8] sm:$0xff] %vm361_vm3, %v745_v14 }
 0x18d   : > { %v941_v47 = vld [vmem:[#allocation4] sm:$0xff] }
 0x18f   : > { %v942_v51 = vld [vmem:[#allocation4 + $0x8] sm:$0xff] }
 0x19b   : > { %v934_v46 = vpop.f32.mrb[4].mxu0 }
 0x19c   : > { %v943_v48 = vadd.f32 %v941_v47, %v934_v46  ;;  %v1720_v49 = vpop.f32.mrb[5].mxu0 }
 0x19d   : > { %v937_v50 = vpop.f32.mrb[6].mxu0 }
 0x19e   : > { %945 = vst.msk [vmem:[#allocation4] sm:$0xff] %vm361_vm3, %v943_v48  ;;  %v944_v52 = vadd.f32 %v942_v51, %v937_v50  ;;  %v1721_v53 = vpop.f32.mrb[7].mxu0 }
 0x1a0   : > { %946 = vst.msk [vmem:[#allocation4 + $0x8] sm:$0xff] %vm361_vm3, %v944_v52 }
 0x1a2   : > { %v1134_v54 = vpop.f32.mrb[4].mxu1 }
 0x1a3   : > { %v1740_v55 = vpop.f32.mrb[5].mxu1 }
 0x1a4   : > { %v1137_v56 = vpop.f32.mrb[6].mxu1 }
 0x1a5   : > { %v1141_v57 = vld [vmem:[#allocation4] sm:$0xff]  ;;  %v1741_v58 = vpop.f32.mrb[7].mxu1 }
 0x1a6   : > { %v1143_v59 = vadd.f32 %v1141_v57, %v1134_v54 }
 0x1a7   : > { %v1142_v60 = vld [vmem:[#allocation4 + $0x8] sm:$0xff] }
 0x1a8   : > { %1145 = vst.msk [vmem:[#allocation4] sm:$0xff] %vm361_vm3, %v1143_v59  ;;  %v1144_v61 = vadd.f32 %v1142_v60, %v1137_v56 }
 0x1aa   : > { %1146 = vst.msk [vmem:[#allocation4 + $0x8] sm:$0xff] %vm361_vm3, %v1144_v61 }
 0x1af   : > { %v1341_v63 = vld [vmem:[#allocation4] sm:$0xff] }
 0x1b1   : > { %v1342_v3 = vld [vmem:[#allocation4 + $0x8] sm:$0xff] }
 0x1bb   : > { %v1334_v62 = vpop.f32.mrb[8].mxu0 }
 0x1bc   : > { %v1343_v0 = vadd.f32 %v1341_v63, %v1334_v62  ;;  %v1760_v1 = vpop.f32.mrb[9].mxu0 }
 0x1bd   : > { %v1337_v2 = vpop.f32.mrb[10].mxu0 }
 0x1be   : > { %1345 = vst.msk [vmem:[#allocation4] sm:$0xff] %vm361_vm3, %v1343_v0  ;;  %v1344_v4 = vadd.f32 %v1342_v3, %v1337_v2  ;;  %v1761_v5 = vpop.f32.mrb[11].mxu0 }
 0x1c0   : > { %1346 = vst.msk [vmem:[#allocation4 + $0x8] sm:$0xff] %vm361_vm3, %v1344_v4 }
 0x1c5   : > { %v1347_v7 = vld [vmem:[#allocation4] sm:$0xff] }
 0x1c6   : > { %v1356_v8 = vadd.f32 %v1612_v6, %v1347_v7 }
 0x1c7   : > { %v1348_v9 = vld [vmem:[#allocation4 + $0x8] sm:$0xff] }
 0x1c8   : > { %v1360_v10 = vcombine.high %v1356_v8, %v1356_v8  ;;  %1364 = vst.msk [vmem:[%s1947_s13] sm:$0xf] %vm343_vm1, %v1356_v8  ;;  %v1379_v11 = vmul.f32 %v1356_v8, %v1356_v8  ;;  %v1357_v12 = vadd.f32 %v1612_v6, %v1348_v9  ;;  %v1368_v13 = vsel %vm361_vm3, %v1356_v8, 0.0 }
 0x1ca   : > { %1365 = vst.msk [vmem:[%s1947_s13 + $0x4] sm:$0xf] %vm343_vm1, %v1360_v10  ;;  %v1361_v15 = vcombine.high %v1357_v12, %v1357_v12  ;;  %1366 = vst.msk [vmem:[%s1947_s13 + $0x8] sm:$0xf] %vm343_vm1, %v1357_v12  ;;  %v1369_v16 = vsel %vm361_vm3, %v1357_v12, 0.0  ;;  %v1380_v17 = vmul.f32 %v1357_v12, %v1357_v12  ;;  %v1381_v19 = vsel %vm361_vm3, %v1379_v11, 0.0 }
 0x1cb   : > { %v1370_v18 = vadd.f32 %v1369_v16, %v1368_v13 }
 0x1cc   : > { %1367 = vst.msk [vmem:[%s1947_s13 + $0xc] sm:$0xf] %vm343_vm1, %v1361_v15  ;;  %v1382_v20 = vsel %vm361_vm3, %v1380_v17, 0.0 }
 0x1cd   : > { %v1371_v21 = vrot.slane %v1370_v18, 4  ;;  %v1383_v22 = vadd.f32 %v1382_v20, %v1381_v19 }
 0x1cf   : > { %v1372_v23 = vadd.f32 %v1371_v21, %v1370_v18  ;;  %v1384_v24 = vrot.slane %v1383_v22, 4 }
 0x1d1   : > { %v1373_v25 = vrot.slane %v1372_v23, 2  ;;  %v1385_v26 = vadd.f32 %v1384_v24, %v1383_v22 }
 0x1d3   : > { %v1374_v27 = vadd.f32 %v1373_v25, %v1372_v23  ;;  %v1386_v28 = vrot.slane %v1385_v26, 2 }
 0x1d5   : > { %v1375_v29 = vrot.slane %v1374_v27, 1  ;;  %v1387_v30 = vadd.f32 %v1386_v28, %v1385_v26 }
 0x1d7   : > { %v1376_v31 = vadd.f32 %v1375_v29, %v1374_v27  ;;  %v1388_v32 = vrot.slane %v1387_v30, 1 }
 0x1d9   : > { %1378 = vst.msk [vmem:[%s292_s30] sm:$0x1] %vm1377_vm8, %v1376_v31  ;;  %v1389_v33 = vadd.f32 %v1388_v32, %v1387_v30 }
 0x1db   : > { %1390 = vst.msk [vmem:[%s295_s16] sm:$0x1] %vm1377_vm8, %v1389_v33 }
 0x1dc PF: > { %s18_s24 = sadd.s32 1, %s1874_s24  }
 0x1dd   : > { %p15_p5 = scmp.ge.s32.totalorder %s18_s24, 4  }
 0x1df   :  { %17 = sbr.rel (!%p15_p5) target bundleno = 1 (0x1), region = 107 }

</bundles_post_ra>
